<compile_context>
chip_gen: v5e
topology: v5e:2x2
jax: 0.10.0
libtpu: 0.0.40
codegen_flags: <defaults>
</compile_context>

<pallas_src>
import jax
import jax.numpy as jnp
from jax.experimental import pallas as pl
from jax.experimental.pallas import tpu as pltpu


def _group_conv_kernel(p_ref, w_ref, o_ref):
    # p_ref: (GB, P, K) bf16; w_ref: (GB, K, Coutp) bf16; o_ref: (GB, P, Coutp) f32
    gb = p_ref.shape[0]
    for g in range(gb):  # static unroll over in-block groups (GB = 8)
        o_ref[g] = jnp.dot(
            p_ref[g], w_ref[g], preferred_element_type=jnp.float32
        ).astype(o_ref.dtype)


def grouped_conv2d(x, weight, *, groups, stride, padding, groups_per_block=8):
    """x: (1, Cin, H, W) NCHW f32; weight: (Cout, Cin//groups, KH, KW) OIHW f32."""
    N, C, H, W = x.shape
    Cout_total, Cin_g, KH, KW = weight.shape
    assert N == 1 and C == Cin_g * groups and Cout_total % groups == 0
    assert groups % groups_per_block == 0
    Cout_g = Cout_total // groups
    OH = (H + 2 * padding - KH) // stride + 1
    OW = (W + 2 * padding - KW) // stride + 1
    T = KH * KW
    P = OH * OW

    # lane-aligned paddings
    Cin_gp = ((Cin_g + 127) // 128) * 128      # 120 -> 128
    Cout_gp = ((Cout_g + 127) // 128) * 128    # 120 -> 128
    K = T * Cin_gp                             # 9 * 128 = 1152

    # --- plain-JAX glue: group-major, channel-padded im2col (fused taps) ---
    xp = jnp.pad(x, ((0, 0), (0, 0), (padding, padding), (padding, padding)))
    xg = xp.reshape(groups, Cin_g, H + 2 * padding, W + 2 * padding)
    xg = jnp.pad(xg, ((0, 0), (0, Cin_gp - Cin_g), (0, 0), (0, 0)))

    taps = []
    for kh in range(KH):
        for kw in range(KW):
            sl = xg[:, :,
                    kh:kh + stride * (OH - 1) + 1:stride,
                    kw:kw + stride * (OW - 1) + 1:stride]      # (G, Cin_gp, OH, OW)
            taps.append(sl.transpose(0, 2, 3, 1).reshape(groups, P, Cin_gp))
    # fuse taps along K -> one long-K matmul per group
    patches = jnp.concatenate(taps, axis=-1).astype(jnp.bfloat16)   # (G, P, K)

    wg = weight.reshape(groups, Cout_g, Cin_g, KH, KW)
    wg = jnp.pad(wg, ((0, 0), (0, Cout_gp - Cout_g),
                      (0, Cin_gp - Cin_g), (0, 0), (0, 0)))
    wg = wg.transpose(0, 3, 4, 2, 1)                                 # (G, KH, KW, Cin_gp, Cout_gp)
    wg = wg.reshape(groups, K, Cout_gp).astype(jnp.bfloat16)         # (G, K, Cout_gp)

    GB = groups_per_block
    n_steps = groups // GB

    bytes_accessed = patches.size * 2 + wg.size * 2 + groups * P * Cout_gp * 4
    cost = pl.CostEstimate(
        flops=2 * groups * P * K * Cout_gp,
        transcendentals=0,
        bytes_accessed=bytes_accessed,
    )

    # --- Pallas kernel: 2 grid steps x 8 groups, one MXU matmul per group ---
    out = pl.pallas_call(
        _group_conv_kernel,
        out_shape=jax.ShapeDtypeStruct((groups, P, Cout_gp), jnp.float32),
        grid_spec=pltpu.PrefetchScalarGridSpec(
            num_scalar_prefetch=0,
            grid=(n_steps,),
            in_specs=[
                pl.BlockSpec((GB, P, K), lambda i: (i, 0, 0)),
                pl.BlockSpec((GB, K, Cout_gp), lambda i: (i, 0, 0)),
            ],
            out_specs=pl.BlockSpec((GB, P, Cout_gp), lambda i: (i, 0, 0)),
        ),
        compiler_params=pltpu.CompilerParams(
            dimension_semantics=("parallel",),
            vmem_limit_bytes=32 * 1024 * 1024,
        ),
        cost_estimate=cost,
    )(patches, wg)

    # (G, P, Cout_gp) -> drop Cout pad -> (1, G*Cout_g, OH, OW)
    y = out[..., :Cout_g].reshape(groups, OH, OW, Cout_g).transpose(0, 3, 1, 2)
    return y.reshape(1, groups * Cout_g, OH, OW)


if __name__ == "__main__":
    key = jax.random.PRNGKey(0)
    kx, kw = jax.random.split(key)

    # Module-consistent shapes: Conv2d(1920, 1920, 3x3, stride 2, pad 1, groups 16)
    N, C, H, W = 1, 1920, 14, 14
    groups, Cout = 16, 1920
    Cin_g = C // groups

    x = jax.random.normal(kx, (N, C, H, W), dtype=jnp.float32)
    weight = jax.random.normal(kw, (Cout, Cin_g, 3, 3), dtype=jnp.float32) * 0.03

    y = grouped_conv2d(x, weight, groups=groups, stride=2, padding=1)
    y = jax.block_until_ready(y)
    assert y.shape == (1, 1920, 7, 7), y.shape

    # reference check against XLA's conv (f32); tolerance sized for bf16 kernel inputs
    ref = jax.lax.conv_general_dilated(
        x, weight, window_strides=(2, 2), padding=((1, 1), (1, 1)),
        feature_group_count=groups,
        dimension_numbers=("NCHW", "OIHW", "NCHW"))
    ref = jax.block_until_ready(ref)

    if not jnp.allclose(y, ref, rtol=2e-2, atol=2e-2):
        raise AssertionError("Pallas grouped conv mismatch vs lax reference")

    print("KERNEL_OK")
</pallas_src>

<mosaic_0001>
module attributes {stable_mosaic.version = 11 : i64} {
  func.func @_group_conv_kernel(%arg0: i32, %arg1: memref<8x49x1152xbf16, #tpu.memory_space<vmem>>, %arg2: memref<8x1152x128xbf16, #tpu.memory_space<vmem>>, %arg3: memref<8x49x128xf32, #tpu.memory_space<vmem>>) attributes {dimension_semantics = [#tpu.dimension_semantics<parallel>], iteration_bounds = array<i64: 2>, scalar_prefetch = 0 : i64, scratch_operands = 0 : i64, tpu.core_type = #tpu.core_type<tc>, window_params = [{transform_indices = @transform_0, window_bounds = array<i64: 8, 49, 1152>}, {transform_indices = @transform_1, window_bounds = array<i64: 8, 1152, 128>}, {transform_indices = @transform_2, window_bounds = array<i64: 8, 49, 128>}]} {
    %c0 = arith.constant 0 : index
    %c0_0 = arith.constant 0 : index
    %c0_1 = arith.constant 0 : index
    %0 = vector.load %arg1[%c0, %c0_0, %c0_1] : memref<8x49x1152xbf16, #tpu.memory_space<vmem>>, vector<1x49x1152xbf16>
    %1 = vector.shape_cast %0 : vector<1x49x1152xbf16> to vector<49x1152xbf16>
    %c0_2 = arith.constant 0 : index
    %c0_3 = arith.constant 0 : index
    %c0_4 = arith.constant 0 : index
    %2 = vector.load %arg2[%c0_2, %c0_3, %c0_4] : memref<8x1152x128xbf16, #tpu.memory_space<vmem>>, vector<1x1152x128xbf16>
    %3 = vector.shape_cast %2 : vector<1x1152x128xbf16> to vector<1152x128xbf16>
    %cst = arith.constant dense<0.000000e+00> : vector<49x128xf32>
    %4 = tpu.matmul %1, %3, %cst {dimension_numbers = #tpu.dot_dimension_numbers<[1], [0], [0], [1], [0, 0, 1, 1], [], []>} : vector<49x1152xbf16>, vector<1152x128xbf16>, vector<49x128xf32> -> vector<49x128xf32>
    %c0_5 = arith.constant 0 : index
    %c0_6 = arith.constant 0 : index
    %c0_7 = arith.constant 0 : index
    %5 = vector.load %arg3[%c0_5, %c0_6, %c0_7] : memref<8x49x128xf32, #tpu.memory_space<vmem>>, vector<1x49x128xf32>
    %6 = vector.shape_cast %5 : vector<1x49x128xf32> to vector<49x128xf32>
    %7 = vector.shape_cast %4 : vector<49x128xf32> to vector<1x49x128xf32>
    tpu.vector_store %arg3[%c0_5, %c0_6, %c0_7], %7 {strides = array<i32>} : memref<8x49x128xf32, #tpu.memory_space<vmem>>, vector<1x49x128xf32>,
    %c1 = arith.constant 1 : index
    %c0_8 = arith.constant 0 : index
    %c0_9 = arith.constant 0 : index
    %8 = vector.load %arg1[%c1, %c0_8, %c0_9] : memref<8x49x1152xbf16, #tpu.memory_space<vmem>>, vector<1x49x1152xbf16>
    %9 = vector.shape_cast %8 : vector<1x49x1152xbf16> to vector<49x1152xbf16>
    %c1_10 = arith.constant 1 : index
    %c0_11 = arith.constant 0 : index
    %c0_12 = arith.constant 0 : index
    %10 = vector.load %arg2[%c1_10, %c0_11, %c0_12] : memref<8x1152x128xbf16, #tpu.memory_space<vmem>>, vector<1x1152x128xbf16>
    %11 = vector.shape_cast %10 : vector<1x1152x128xbf16> to vector<1152x128xbf16>
    %cst_13 = arith.constant dense<0.000000e+00> : vector<49x128xf32>
    %12 = tpu.matmul %9, %11, %cst_13 {dimension_numbers = #tpu.dot_dimension_numbers<[1], [0], [0], [1], [0, 0, 1, 1], [], []>} : vector<49x1152xbf16>, vector<1152x128xbf16>, vector<49x128xf32> -> vector<49x128xf32>
    %c1_14 = arith.constant 1 : index
    %c0_15 = arith.constant 0 : index
    %c0_16 = arith.constant 0 : index
    %13 = vector.load %arg3[%c1_14, %c0_15, %c0_16] : memref<8x49x128xf32, #tpu.memory_space<vmem>>, vector<1x49x128xf32>
    %14 = vector.shape_cast %13 : vector<1x49x128xf32> to vector<49x128xf32>
    %15 = vector.shape_cast %12 : vector<49x128xf32> to vector<1x49x128xf32>
    tpu.vector_store %arg3[%c1_14, %c0_15, %c0_16], %15 {strides = array<i32>} : memref<8x49x128xf32, #tpu.memory_space<vmem>>, vector<1x49x128xf32>,
    %c2 = arith.constant 2 : index
    %c0_17 = arith.constant 0 : index
    %c0_18 = arith.constant 0 : index
    %16 = vector.load %arg1[%c2, %c0_17, %c0_18] : memref<8x49x1152xbf16, #tpu.memory_space<vmem>>, vector<1x49x1152xbf16>
    %17 = vector.shape_cast %16 : vector<1x49x1152xbf16> to vector<49x1152xbf16>
    %c2_19 = arith.constant 2 : index
    %c0_20 = arith.constant 0 : index
    %c0_21 = arith.constant 0 : index
    %18 = vector.load %arg2[%c2_19, %c0_20, %c0_21] : memref<8x1152x128xbf16, #tpu.memory_space<vmem>>, vector<1x1152x128xbf16>
    %19 = vector.shape_cast %18 : vector<1x1152x128xbf16> to vector<1152x128xbf16>
    %cst_22 = arith.constant dense<0.000000e+00> : vector<49x128xf32>
    %20 = tpu.matmul %17, %19, %cst_22 {dimension_numbers = #tpu.dot_dimension_numbers<[1], [0], [0], [1], [0, 0, 1, 1], [], []>} : vector<49x1152xbf16>, vector<1152x128xbf16>, vector<49x128xf32> -> vector<49x128xf32>
    %c2_23 = arith.constant 2 : index
    %c0_24 = arith.constant 0 : index
    %c0_25 = arith.constant 0 : index
    %21 = vector.load %arg3[%c2_23, %c0_24, %c0_25] : memref<8x49x128xf32, #tpu.memory_space<vmem>>, vector<1x49x128xf32>
    %22 = vector.shape_cast %21 : vector<1x49x128xf32> to vector<49x128xf32>
    %23 = vector.shape_cast %20 : vector<49x128xf32> to vector<1x49x128xf32>
    tpu.vector_store %arg3[%c2_23, %c0_24, %c0_25], %23 {strides = array<i32>} : memref<8x49x128xf32, #tpu.memory_space<vmem>>, vector<1x49x128xf32>,
    %c3 = arith.constant 3 : index
    %c0_26 = arith.constant 0 : index
    %c0_27 = arith.constant 0 : index
    %24 = vector.load %arg1[%c3, %c0_26, %c0_27] : memref<8x49x1152xbf16, #tpu.memory_space<vmem>>, vector<1x49x1152xbf16>
    %25 = vector.shape_cast %24 : vector<1x49x1152xbf16> to vector<49x1152xbf16>
    %c3_28 = arith.constant 3 : index
    %c0_29 = arith.constant 0 : index
    %c0_30 = arith.constant 0 : index
    %26 = vector.load %arg2[%c3_28, %c0_29, %c0_30] : memref<8x1152x128xbf16, #tpu.memory_space<vmem>>, vector<1x1152x128xbf16>
    %27 = vector.shape_cast %26 : vector<1x1152x128xbf16> to vector<1152x128xbf16>
    %cst_31 = arith.constant dense<0.000000e+00> : vector<49x128xf32>
    %28 = tpu.matmul %25, %27, %cst_31 {dimension_numbers = #tpu.dot_dimension_numbers<[1], [0], [0], [1], [0, 0, 1, 1], [], []>} : vector<49x1152xbf16>, vector<1152x128xbf16>, vector<49x128xf32> -> vector<49x128xf32>
    %c3_32 = arith.constant 3 : index
    %c0_33 = arith.constant 0 : index
    %c0_34 = arith.constant 0 : index
    %29 = vector.load %arg3[%c3_32, %c0_33, %c0_34] : memref<8x49x128xf32, #tpu.memory_space<vmem>>, vector<1x49x128xf32>
    %30 = vector.shape_cast %29 : vector<1x49x128xf32> to vector<49x128xf32>
    %31 = vector.shape_cast %28 : vector<49x128xf32> to vector<1x49x128xf32>
    tpu.vector_store %arg3[%c3_32, %c0_33, %c0_34], %31 {strides = array<i32>} : memref<8x49x128xf32, #tpu.memory_space<vmem>>, vector<1x49x128xf32>,
    %c4 = arith.constant 4 : index
    %c0_35 = arith.constant 0 : index
    %c0_36 = arith.constant 0 : index
    %32 = vector.load %arg1[%c4, %c0_35, %c0_36] : memref<8x49x1152xbf16, #tpu.memory_space<vmem>>, vector<1x49x1152xbf16>
    %33 = vector.shape_cast %32 : vector<1x49x1152xbf16> to vector<49x1152xbf16>
    %c4_37 = arith.constant 4 : index
    %c0_38 = arith.constant 0 : index
    %c0_39 = arith.constant 0 : index
    %34 = vector.load %arg2[%c4_37, %c0_38, %c0_39] : memref<8x1152x128xbf16, #tpu.memory_space<vmem>>, vector<1x1152x128xbf16>
    %35 = vector.shape_cast %34 : vector<1x1152x128xbf16> to vector<1152x128xbf16>
    %cst_40 = arith.constant dense<0.000000e+00> : vector<49x128xf32>
    %36 = tpu.matmul %33, %35, %cst_40 {dimension_numbers = #tpu.dot_dimension_numbers<[1], [0], [0], [1], [0, 0, 1, 1], [], []>} : vector<49x1152xbf16>, vector<1152x128xbf16>, vector<49x128xf32> -> vector<49x128xf32>
    %c4_41 = arith.constant 4 : index
    %c0_42 = arith.constant 0 : index
    %c0_43 = arith.constant 0 : index
    %37 = vector.load %arg3[%c4_41, %c0_42, %c0_43] : memref<8x49x128xf32, #tpu.memory_space<vmem>>, vector<1x49x128xf32>
    %38 = vector.shape_cast %37 : vector<1x49x128xf32> to vector<49x128xf32>
    %39 = vector.shape_cast %36 : vector<49x128xf32> to vector<1x49x128xf32>
    tpu.vector_store %arg3[%c4_41, %c0_42, %c0_43], %39 {strides = array<i32>} : memref<8x49x128xf32, #tpu.memory_space<vmem>>, vector<1x49x128xf32>,
    %c5 = arith.constant 5 : index
    %c0_44 = arith.constant 0 : index
    %c0_45 = arith.constant 0 : index
    %40 = vector.load %arg1[%c5, %c0_44, %c0_45] : memref<8x49x1152xbf16, #tpu.memory_space<vmem>>, vector<1x49x1152xbf16>
    %41 = vector.shape_cast %40 : vector<1x49x1152xbf16> to vector<49x1152xbf16>
    %c5_46 = arith.constant 5 : index
    %c0_47 = arith.constant 0 : index
    %c0_48 = arith.constant 0 : index
    %42 = vector.load %arg2[%c5_46, %c0_47, %c0_48] : memref<8x1152x128xbf16, #tpu.memory_space<vmem>>, vector<1x1152x128xbf16>
    %43 = vector.shape_cast %42 : vector<1x1152x128xbf16> to vector<1152x128xbf16>
    %cst_49 = arith.constant dense<0.000000e+00> : vector<49x128xf32>
    %44 = tpu.matmul %41, %43, %cst_49 {dimension_numbers = #tpu.dot_dimension_numbers<[1], [0], [0], [1], [0, 0, 1, 1], [], []>} : vector<49x1152xbf16>, vector<1152x128xbf16>, vector<49x128xf32> -> vector<49x128xf32>
    %c5_50 = arith.constant 5 : index
    %c0_51 = arith.constant 0 : index
    %c0_52 = arith.constant 0 : index
    %45 = vector.load %arg3[%c5_50, %c0_51, %c0_52] : memref<8x49x128xf32, #tpu.memory_space<vmem>>, vector<1x49x128xf32>
    %46 = vector.shape_cast %45 : vector<1x49x128xf32> to vector<49x128xf32>
    %47 = vector.shape_cast %44 : vector<49x128xf32> to vector<1x49x128xf32>
    tpu.vector_store %arg3[%c5_50, %c0_51, %c0_52], %47 {strides = array<i32>} : memref<8x49x128xf32, #tpu.memory_space<vmem>>, vector<1x49x128xf32>,
    %c6 = arith.constant 6 : index
    %c0_53 = arith.constant 0 : index
    %c0_54 = arith.constant 0 : index
    %48 = vector.load %arg1[%c6, %c0_53, %c0_54] : memref<8x49x1152xbf16, #tpu.memory_space<vmem>>, vector<1x49x1152xbf16>
    %49 = vector.shape_cast %48 : vector<1x49x1152xbf16> to vector<49x1152xbf16>
    %c6_55 = arith.constant 6 : index
    %c0_56 = arith.constant 0 : index
    %c0_57 = arith.constant 0 : index
    %50 = vector.load %arg2[%c6_55, %c0_56, %c0_57] : memref<8x1152x128xbf16, #tpu.memory_space<vmem>>, vector<1x1152x128xbf16>
    %51 = vector.shape_cast %50 : vector<1x1152x128xbf16> to vector<1152x128xbf16>
    %cst_58 = arith.constant dense<0.000000e+00> : vector<49x128xf32>
    %52 = tpu.matmul %49, %51, %cst_58 {dimension_numbers = #tpu.dot_dimension_numbers<[1], [0], [0], [1], [0, 0, 1, 1], [], []>} : vector<49x1152xbf16>, vector<1152x128xbf16>, vector<49x128xf32> -> vector<49x128xf32>
    %c6_59 = arith.constant 6 : index
    %c0_60 = arith.constant 0 : index
    %c0_61 = arith.constant 0 : index
    %53 = vector.load %arg3[%c6_59, %c0_60, %c0_61] : memref<8x49x128xf32, #tpu.memory_space<vmem>>, vector<1x49x128xf32>
    %54 = vector.shape_cast %53 : vector<1x49x128xf32> to vector<49x128xf32>
    %55 = vector.shape_cast %52 : vector<49x128xf32> to vector<1x49x128xf32>
    tpu.vector_store %arg3[%c6_59, %c0_60, %c0_61], %55 {strides = array<i32>} : memref<8x49x128xf32, #tpu.memory_space<vmem>>, vector<1x49x128xf32>,
    %c7 = arith.constant 7 : index
    %c0_62 = arith.constant 0 : index
    %c0_63 = arith.constant 0 : index
    %56 = vector.load %arg1[%c7, %c0_62, %c0_63] : memref<8x49x1152xbf16, #tpu.memory_space<vmem>>, vector<1x49x1152xbf16>
    %57 = vector.shape_cast %56 : vector<1x49x1152xbf16> to vector<49x1152xbf16>
    %c7_64 = arith.constant 7 : index
    %c0_65 = arith.constant 0 : index
    %c0_66 = arith.constant 0 : index
    %58 = vector.load %arg2[%c7_64, %c0_65, %c0_66] : memref<8x1152x128xbf16, #tpu.memory_space<vmem>>, vector<1x1152x128xbf16>
    %59 = vector.shape_cast %58 : vector<1x1152x128xbf16> to vector<1152x128xbf16>
    %cst_67 = arith.constant dense<0.000000e+00> : vector<49x128xf32>
    %60 = tpu.matmul %57, %59, %cst_67 {dimension_numbers = #tpu.dot_dimension_numbers<[1], [0], [0], [1], [0, 0, 1, 1], [], []>} : vector<49x1152xbf16>, vector<1152x128xbf16>, vector<49x128xf32> -> vector<49x128xf32>
    %c7_68 = arith.constant 7 : index
    %c0_69 = arith.constant 0 : index
    %c0_70 = arith.constant 0 : index
    %61 = vector.load %arg3[%c7_68, %c0_69, %c0_70] : memref<8x49x128xf32, #tpu.memory_space<vmem>>, vector<1x49x128xf32>
    %62 = vector.shape_cast %61 : vector<1x49x128xf32> to vector<49x128xf32>
    %63 = vector.shape_cast %60 : vector<49x128xf32> to vector<1x49x128xf32>
    tpu.vector_store %arg3[%c7_68, %c0_69, %c0_70], %63 {strides = array<i32>} : memref<8x49x128xf32, #tpu.memory_space<vmem>>, vector<1x49x128xf32>,
    return
  }
  func.func @transform_0(%arg0: i32) -> (i32, i32, i32) {
    %c0_i32 = arith.constant 0 : i32
    %c0_i32_0 = arith.constant 0 : i32
    %c0_i32_1 = arith.constant 0 : i32
    return %arg0, %c0_i32, %c0_i32_0 : i32, i32, i32
  }
  func.func @transform_1(%arg0: i32) -> (i32, i32, i32) {
    %c0_i32 = arith.constant 0 : i32
    %c0_i32_0 = arith.constant 0 : i32
    %c0_i32_1 = arith.constant 0 : i32
    return %arg0, %c0_i32, %c0_i32_0 : i32, i32, i32
  }
  func.func @transform_2(%arg0: i32) -> (i32, i32, i32) {
    %c0_i32 = arith.constant 0 : i32
    %c0_i32_0 = arith.constant 0 : i32
    %c0_i32_1 = arith.constant 0 : i32
    return %arg0, %c0_i32, %c0_i32_0 : i32, i32, i32
  }
}

</mosaic_0001>

<bundles_post_ra>
// kernel: tpu_custom_call.1
= control target key start
LH: loop header
LB: loop body
LE: loop exit
PB: predicated region body
PF: predicated region fallthrough
CT: control target
= control target key end

     0   :  { %7 = vsyncpa [#allocation3], 0  ;;  %s16037_s0 = inlined_call_operand.vmem [shape: bf16[16,49,1152], index: 0, kind: input, shape index: {}]   ;;  %s16038_s1 = inlined_call_operand.hbm [shape: bf16[16,1152,128], index: 1, kind: input, shape index: {}]   ;;  %s16039_s2 = inlined_call_operand.vmem [shape: f32[16,49,128], index: 2, kind: output, shape index: {}]  }
   0x1   :  { %9 = vsyncpa [#allocation3 + $0x1], 0  ;;  %s14023_s9 = smov 0   ;;  %s14025_s10 = smov 0  }
   0x2   :  { %s14027_s11 = smov 0   ;;  %s14029_s12 = smov 0  }
   0x3 LB: > { %s8618_s13 = sadd.s32 4294967295, %s14004_s12   ;;  %s14043_s14 = sadd.s32 1, %s14004_s12   ;;  %s14004_s12 = sphi %s14029_s12, %s16045_s12   ;;  %s14000_s11 = sphi %s14027_s11, %s16044_s11   ;;  %s13996_s10 = sphi %s14025_s10, %s16043_s10   ;;  %s13992_s9 = sphi %s14023_s9, %s16042_s9  }
   0x4   : > { %s45_s15 = ssub.s32 %s14004_s12, %s14043_s14  ;;  %s48_s16 = sadd.s32 1, %s14000_s11 }
   0x5   : > { %p46_p0 = scmp.eq.s32.totalorder %s45_s15, 0  ;;  %p55_p1 = scmp.ne.s32.totalorder %s14000_s11, %s13996_s10 }
   0x6   : > { %p56_p2 = scmp.eq.s32.totalorder %s14004_s12, 0  ;;  %p61_p3 = scmp.ne.s32.totalorder %s13996_s10, %s13992_s9 }
   0x7   : > { %s14053_s17 = scalar_select %p46_p0, %s14000_s11, %s48_s16  }
   0x8   : > { %p57_p4 = por %p56_p2, %p55_p1  ;;  %p62_p5 = scmp.eq.s32.totalorder %s8618_s13, 0 }
   0x9   : > { %p13905_p6 = scmp.lt.s32.totalorder %s14004_s12, 2  ;;  %s121_s19 = sand.u32 1, %s14000_s11  }
   0xa   : > { %p14058_p7 = por %p62_p5, %p61_p3  ;;  %s13894_s20 = smul.u32 4608, %s121_s19 }
   0xb   : > { %s13895_s21 = smul.u32 4608, %s14004_s12  ;;  %p14064_p8 = pnand %p13905_p6, %p57_p4 }
   0xc   : > { %s125_s26 = scalar_lea.vmem [#allocation2], %s13894_s20  ;;  %p8625_p9 = scmp.ge.s32.totalorder %s14004_s12, 1 }
   0xd   : > { %s131_s25 = scalar_lea.hbm %s16038_s1, %s13895_s21  ;;  %s134_s27 = sshll.u32 %s125_s26, 4  ;;  %s135_s27 = int_to_ptr.vmem [resolvable:$true] %s134_s27 }
   0xe   : > { %s132_s28 = sshll.u32 %s131_s25, 4  ;;  %s122_s29 = scalar_lea.sflag [#allocation3], %s121_s19  ;;  %s133_s28 = int_to_ptr.hbm [resolvable:$true] %s132_s28 }
   0xf   : > { %s13940_s30 = sshra.s32 %s133_s28, 4  ;;  %p13944_p11 = pneg %p14064_p8  ;;  %s13941_s30 = int_to_ptr.hbm [resolvable:$true] %s13940_s30 }
  0x10   : > { %s13942_s3 = scalar_lea.hbm %s13941_s30, 4608  ;;  %s13947_s6 = scalar_lea.hbm %s16038_s1, 9216 }
  0x11   : > { %p13943_p10 = scmp.ne.s32.totalorder %s13941_s30, %s13942_s3  ;;  %p13948_p0 = scmp.lt.s32.totalorder %s13941_s30, %s16038_s1 }
  0x12   : > { %p13949_p1 = scmp.lt.s32.totalorder %s13947_s6, %s13942_s3 }
  0x13   : > { %p13945_p12 = pnand %p13944_p11, %p13943_p10 }
  0x14   : > { %p13950_p2 = por %p13949_p1, %p13948_p0 }
  0x15   : > { %p13946_p13 = pneg %p13945_p12 }
  0x17   : > { %p13951_p3 = pnand %p13950_p2, %p13946_p13 }
  0x19   : > { %13954 = shalt.err (!%p13951_p3)
}
  0x1a   : > { %s14006_s9 = smov 64   ;;  %s14007_s15 = smov 4  }
  0x1b   : > { %13904 = dma.hbm_to_vmem [thread:$0]  (!%p14064_p8), %s133_s28, 73728, %s135_s27, %s122_s29, %s14006_s9, %s14006_s9, %s14007_s15  }
  0x1c   : > { %p142_p4 = scmp.lt.s32.totalorder %s14004_s12, 3 }
  0x1e   : > { %p143_p5 = pnand %p8625_p9, %p142_p4 }
  0x1f   : > { %s148_s16 = sand.u32 (!%p143_p5), 1, %s13996_s10  }
  0x20   : > { %146 = sbr.rel (%p143_p5) target bundleno = 1349 (0x545), region = 28  ;;  %s149_s20 = scalar_lea.sflag (!%p143_p5), [#allocation3], %s148_s16 }
  0x21   : > { %s13896_s19 = smul.u32 (!%p143_p5), 4608, %s148_s16 }
  0x23   : > { %s14086_s21 = scalar_lea.vmem (!%p143_p5), [#allocation2], %s13896_s19 }
  0x25   : > { %13987 = dma.done.wait (%p14058_p7), %s149_s20, 73728  }
  0x26   : > { %13989 = vsyncadd (%p14058_p7), %s149_s20, 4294893568  ;;  %v13136_v0 = vld [vmem:[%s14086_s21 + $0x38] sm:$0xff]  ;;  %v13135_v4 = vld [vmem:[%s14086_s21 + $0x30] sm:$0xff]  ;;  %s8626_s18 = sshll.u32 %s8618_s13, 3 }
  0x27   : > { %v13144_v1 = vld [vmem:[%s14086_s21 + $0x78] sm:$0xff]  ;;  %977 = vmatpush.bf16.msra.mxu0 %v13136_v0  ;;  %v13143_v5 = vld [vmem:[%s14086_s21 + $0x70] sm:$0xff]  ;;  %v13134_v8 = vld [vmem:[%s14086_s21 + $0x28] sm:$0xff]  ;;  %p182_p6 = scmp.lt.s32.totalorder %s8626_s18, 15 }
  0x28   : > { %v13152_v2 = vld [vmem:[%s14086_s21 + $0xb8] sm:$0xff]  ;;  %1005 = vmatpush.bf16.msra.mxu1 %v13144_v1  ;;  %v13151_v6 = vld [vmem:[%s14086_s21 + $0xb0] sm:$0xff]  ;;  %v13142_v9 = vld [vmem:[%s14086_s21 + $0x68] sm:$0xff] }
  0x29   : > { %v13160_v3 = vld [vmem:[%s14086_s21 + $0xf8] sm:$0xff]  ;;  %1033 = vmatpush.bf16.msra.mxu2 %v13152_v2  ;;  %v13159_v7 = vld [vmem:[%s14086_s21 + $0xf0] sm:$0xff]  ;;  %v13150_v10 = vld [vmem:[%s14086_s21 + $0xa8] sm:$0xff]  ;;  %s16047_s18 = smov (!%p182_p6, %s8626_s18), 15 }
  0x2a   : > { %1061 = vmatpush.bf16.msra.mxu3 %v13160_v3  ;;  %v13158_v11 = vld [vmem:[%s14086_s21 + $0xe8] sm:$0xff]  ;;  %v13133_v12 = vld [vmem:[%s14086_s21 + $0x20] sm:$0xff]  ;;  %v13132_v16 = vld [vmem:[%s14086_s21 + $0x18] sm:$0xff]  ;;  %s13897_s12 = smul.u32 252, %s16047_s18 }
  0x2b   : > { %978 = vmatpush.bf16.msra.mxu0 %v13135_v4  ;;  %v13141_v13 = vld [vmem:[%s14086_s21 + $0x60] sm:$0xff]  ;;  %v13140_v17 = vld [vmem:[%s14086_s21 + $0x58] sm:$0xff]  ;;  %v13131_v20 = vld [vmem:[%s14086_s21 + $0x10] sm:$0xff]  ;;  %s13898_s24 = smul.u32 56, %s16047_s18 }
  0x2c   : > { %1006 = vmatpush.bf16.msra.mxu1 %v13143_v5  ;;  %v13149_v14 = vld [vmem:[%s14086_s21 + $0xa0] sm:$0xff]  ;;  %v13148_v18 = vld [vmem:[%s14086_s21 + $0x98] sm:$0xff]  ;;  %v13139_v21 = vld [vmem:[%s14086_s21 + $0x50] sm:$0xff]  ;;  %s14126_s23 = scalar_lea.vmem %s16037_s0, %s13897_s12 }
  0x2d   : > { %1034 = vmatpush.bf16.msra.mxu2 %v13151_v6  ;;  %v13157_v15 = vld [vmem:[%s14086_s21 + $0xe0] sm:$0xff]  ;;  %v13156_v19 = vld [vmem:[%s14086_s21 + $0xd8] sm:$0xff]  ;;  %v13147_v22 = vld [vmem:[%s14086_s21 + $0x90] sm:$0xff]  ;;  %s14477_s27 = scalar_lea.vmem %s16039_s2, %s13898_s24 }
  0x2e   : > { %1062 = vmatpush.bf16.msra.mxu3 %v13159_v7  ;;  %v13155_v23 = vld [vmem:[%s14086_s21 + $0xd0] sm:$0xff]  ;;  %v13130_v24 = vld [vmem:[%s14086_s21 + $0x8] sm:$0xff]  ;;  %v13129_v28 = vld [vmem:[%s14086_s21] sm:$0xff] }
  0x2f   : > { %979 = vmatpush.bf16.msra.mxu0 %v13134_v8  ;;  %v13138_v25 = vld [vmem:[%s14086_s21 + $0x48] sm:$0xff]  ;;  %v13137_v29 = vld [vmem:[%s14086_s21 + $0x40] sm:$0xff]  ;;  %v8642_v39 = vld [vmem:[%s14126_s23 + $0x2c] sm:$0xf0] }
  0x30   : > { %1007 = vmatpush.bf16.msra.mxu1 %v13142_v9  ;;  %v13146_v26 = vld [vmem:[%s14086_s21 + $0x88] sm:$0xff]  ;;  %v13145_v30 = vld [vmem:[%s14086_s21 + $0x80] sm:$0xff]  ;;  %v13184_v40 = vld [vmem:[%s14086_s21 + $0x1b8] sm:$0xff] }
  0x31   : > { %1035 = vmatpush.bf16.msra.mxu2 %v13150_v10  ;;  %v13154_v27 = vld [vmem:[%s14086_s21 + $0xc8] sm:$0xff]  ;;  %v13153_v31 = vld [vmem:[%s14086_s21 + $0xc0] sm:$0xff]  ;;  %v13192_v41 = vld [vmem:[%s14086_s21 + $0x1f8] sm:$0xff] }
  0x32   : > { %1063 = vmatpush.bf16.msra.mxu3 %v13158_v11  ;;  %v8632_v32 = vld [vmem:[%s14126_s23] sm:$0xf]  ;;  %v13106_v33 = vld [vmem:[%s14126_s23 + $0x20] sm:$0xf0]  ;;  %v8634_v35 = vld [vmem:[%s14126_s23 + $0x24] sm:$0xf0] }
  0x33   : > { %980 = vmatpush.bf16.msra.mxu0 %v13133_v12  ;;  %v13102_v34 = vld [vmem:[%s14126_s23 + $0x4] sm:$0xf]  ;;  %v8640_v36 = vld [vmem:[%s14126_s23 + $0x8] sm:$0xf]  ;;  %v13107_v37 = vld [vmem:[%s14126_s23 + $0x28] sm:$0xf0]  ;;  %v8633_v42 = vor.u32 %v13106_v33, %v8632_v32 }
  0x34   : > { %1008 = vmatpush.bf16.msra.mxu1 %v13141_v13  ;;  %v13103_v38 = vld [vmem:[%s14126_s23 + $0xc] sm:$0xf]  ;;  %v8637_v43 = vor.u32 %v13102_v34, %v8634_v35  ;;  %v8641_v44 = vor.u32 %v13107_v37, %v8640_v36  ;;  %v13168_v46 = vld [vmem:[%s14086_s21 + $0x138] sm:$0xff]  ;;  %v13183_v48 = vld [vmem:[%s14086_s21 + $0x1b0] sm:$0xff] }
  0x35   : > { %1036 = vmatpush.bf16.msra.mxu2 %v13149_v14  ;;  %v8645_v45 = vor.u32 %v13103_v38, %v8642_v39  ;;  %v13176_v47 = vld [vmem:[%s14086_s21 + $0x178] sm:$0xff]  ;;  %v13191_v49 = vld [vmem:[%s14086_s21 + $0x1f0] sm:$0xff]  ;;  %v13182_v52 = vld [vmem:[%s14086_s21 + $0x1a8] sm:$0xff] }
  0x36   : > { %1064 = vmatpush.bf16.msra.mxu3 %v13157_v15  ;;  %v13167_v50 = vld [vmem:[%s14086_s21 + $0x130] sm:$0xff]  ;;  %v13190_v53 = vld [vmem:[%s14086_s21 + $0x1e8] sm:$0xff]  ;;  %v13181_v57 = vld [vmem:[%s14086_s21 + $0x1a0] sm:$0xff] }
  0x37   : > { %981 = vmatpush.bf16.msra.mxu0 %v13132_v16  ;;  %v13175_v51 = vld [vmem:[%s14086_s21 + $0x170] sm:$0xff]  ;;  %v13166_v54 = vld [vmem:[%s14086_s21 + $0x128] sm:$0xff]  ;;  %v13189_v58 = vld [vmem:[%s14086_s21 + $0x1e0] sm:$0xff] }
  0x38   : > { %1009 = vmatpush.bf16.msra.mxu1 %v13140_v17  ;;  %v13174_v55 = vld [vmem:[%s14086_s21 + $0x168] sm:$0xff]  ;;  %v8670_v61 = vld [vmem:[%s14126_s23 + $0x6c] sm:$0xf0]  ;;  %v13116_v63 = vld [vmem:[%s14126_s23 + $0x70] sm:$0xf0] }
  0x39   : > { %1037 = vmatpush.bf16.msra.mxu2 %v13148_v18  ;;  %v8668_v56 = vld [vmem:[%s14126_s23 + $0x48] sm:$0xf]  ;;  %v13115_v59 = vld [vmem:[%s14126_s23 + $0x68] sm:$0xf0]  ;;  %v8676_v62 = vld [vmem:[%s14126_s23 + $0x50] sm:$0xf] }
  0x3a   : > { %1065 = vmatpush.bf16.msra.mxu3 %v13156_v19  ;;  %v13111_v60 = vld [vmem:[%s14126_s23 + $0x4c] sm:$0xf]  ;;  %v13112_v0 = vld [vmem:[%s14126_s23 + $0x54] sm:$0xf]  ;;  %v8678_v1 = vld [vmem:[%s14126_s23 + $0x74] sm:$0xf0]  ;;  %v8669_v6 = vor.u32 %v13115_v59, %v8668_v56  ;;  %v8677_v8 = vor.u32 %v13116_v63, %v8676_v62 }
  0x3b   : > { %982 = vmatpush.bf16.msra.mxu0 %v13131_v20  ;;  %v13165_v2 = vld [vmem:[%s14086_s21 + $0x120] sm:$0xff]  ;;  %v13180_v4 = vld [vmem:[%s14086_s21 + $0x198] sm:$0xff]  ;;  %v8673_v7 = vor.u32 %v13111_v60, %v8670_v61  ;;  %v8681_v9 = vor.u32 %v13112_v0, %v8678_v1  ;;  %v13179_v12 = vld [vmem:[%s14086_s21 + $0x190] sm:$0xff] }
  0x3c   : > { %1010 = vmatpush.bf16.msra.mxu1 %v13139_v21  ;;  %v13173_v3 = vld [vmem:[%s14086_s21 + $0x160] sm:$0xff]  ;;  %v13188_v5 = vld [vmem:[%s14086_s21 + $0x1d8] sm:$0xff]  ;;  %v13187_v13 = vld [vmem:[%s14086_s21 + $0x1d0] sm:$0xff] }
  0x3d   : > { %1038 = vmatpush.bf16.msra.mxu2 %v13147_v22  ;;  %v13164_v10 = vld [vmem:[%s14086_s21 + $0x118] sm:$0xff]  ;;  %v13163_v14 = vld [vmem:[%s14086_s21 + $0x110] sm:$0xff]  ;;  %v13178_v16 = vld [vmem:[%s14086_s21 + $0x188] sm:$0xff] }
  0x3e   : > { %1066 = vmatpush.bf16.msra.mxu3 %v13155_v23  ;;  %v13172_v11 = vld [vmem:[%s14086_s21 + $0x158] sm:$0xff]  ;;  %v13171_v15 = vld [vmem:[%s14086_s21 + $0x150] sm:$0xff]  ;;  %v13186_v17 = vld [vmem:[%s14086_s21 + $0x1c8] sm:$0xff] }
  0x3f   : > { %983 = vmatpush.bf16.msra.mxu0 %v13130_v24  ;;  %v13162_v18 = vld [vmem:[%s14086_s21 + $0x108] sm:$0xff]  ;;  %v8704_v20 = vld [vmem:[%s14126_s23 + $0x90] sm:$0xf]  ;;  %v13177_v21 = vld [vmem:[%s14086_s21 + $0x180] sm:$0xff] }
  0x40   : > { %1011 = vmatpush.bf16.msra.mxu1 %v13138_v25  ;;  %v13170_v19 = vld [vmem:[%s14086_s21 + $0x148] sm:$0xff]  ;;  %v13185_v22 = vld [vmem:[%s14086_s21 + $0x1c0] sm:$0xff]  ;;  %v13124_v23 = vld [vmem:[%s14126_s23 + $0xb0] sm:$0xf0] }
  0x41   : > { %1039 = vmatpush.bf16.msra.mxu2 %v13146_v26  ;;  %v13120_v24 = vld [vmem:[%s14126_s23 + $0x94] sm:$0xf]  ;;  %v8706_v25 = vld [vmem:[%s14126_s23 + $0xb4] sm:$0xf0]  ;;  %v8705_v32 = vor.u32 %v13124_v23, %v8704_v20  ;;  %v13198_v56 = vld [vmem:[%s14086_s21 + $0x228] sm:$0xff] }
  0x42   : > { %1067 = vmatpush.bf16.msra.mxu3 %v13154_v27  ;;  %v8712_v26 = vld [vmem:[%s14126_s23 + $0x98] sm:$0xf]  ;;  %v13125_v27 = vld [vmem:[%s14126_s23 + $0xb8] sm:$0xf0]  ;;  %v8709_v33 = vor.u32 %v13120_v24, %v8706_v25  ;;  %v13248_v59 = vld [vmem:[%s14086_s21 + $0x2e0] sm:$0xff] }
  0x43   : > { %984 = vmatpush.bf16.msra.mxu0 %v13129_v28  ;;  %v13121_v28 = vld [vmem:[%s14126_s23 + $0x9c] sm:$0xf]  ;;  %v8713_v34 = vor.u32 %v13125_v27, %v8712_v26  ;;  %v13197_v60 = vld [vmem:[%s14086_s21 + $0x220] sm:$0xff]  ;;  %v8648_v62 = vld [vmem:[%s14126_s23 + $0x10] sm:$0xf] }
  0x44   : > { %1012 = vmatpush.bf16.msra.mxu1 %v13137_v29  ;;  %v8714_v29 = vld [vmem:[%s14126_s23 + $0xbc] sm:$0xf0]  ;;  %v13243_v36 = vld [vmem:[%s14086_s21 + $0x2b8] sm:$0xff]  ;;  %v13108_v63 = vld [vmem:[%s14126_s23 + $0x30] sm:$0xf0] }
  0x45   : > { %1040 = vmatpush.bf16.msra.mxu2 %v13145_v30  ;;  %v13161_v30 = vld [vmem:[%s14086_s21 + $0x100] sm:$0xff]  ;;  %v8717_v35 = vor.u32 %v13121_v28, %v8714_v29  ;;  %v13251_v37 = vld [vmem:[%s14086_s21 + $0x2f8] sm:$0xff]  ;;  %v13104_v0 = vld [vmem:[%s14126_s23 + $0x14] sm:$0xf] }
  0x46   : > { %1068 = vmatpush.bf16.msra.mxu3 %v13153_v31  ;;  %985 = vmatmul.bf16.vlgmr.msra.gmra.mxu0 %v8633_v42  ;;  %v13169_v31 = vld [vmem:[%s14086_s21 + $0x140] sm:$0xff]  ;;  %v13200_v38 = vld [vmem:[%s14086_s21 + $0x238] sm:$0xff]  ;;  %v13199_v42 = vld [vmem:[%s14086_s21 + $0x230] sm:$0xff] }
  0x47   : > { %1013 = vmatmul.bf16.vlgmr.msra.gmra.mxu1 %v8637_v43  ;;  %1089 = vmatpush.bf16.msrb.mxu0 %v13168_v46  ;;  %v13235_v39 = vld [vmem:[%s14086_s21 + $0x278] sm:$0xff]  ;;  %v13234_v43 = vld [vmem:[%s14086_s21 + $0x270] sm:$0xff]  ;;  %v13232_v61 = vld [vmem:[%s14086_s21 + $0x260] sm:$0xff] }
  0x48   : > { %1041 = vmatmul.bf16.vlgmr.msra.gmra.mxu2 %v8641_v44  ;;  %1117 = vmatpush.bf16.msrb.mxu1 %v13176_v47  ;;  %v226_v44 = vld [vmem:[%s14126_s23 + $0xd8] sm:$0x11]  ;;  %v13118_v23 = vld [vmem:[%s14126_s23 + $0x80] sm:$0xf0]  ;;  %v8694_v25 = vld [vmem:[%s14126_s23 + $0x84] sm:$0xf0] }
  0x49   : > { %1145 = vmatpush.bf16.msrb.mxu2 %v13184_v40  ;;  %1069 = vmatmul.bf16.vlgmr.msra.gmra.mxu3 %v8645_v45  ;;  %v13242_v40 = vld [vmem:[%s14086_s21 + $0x2b0] sm:$0xff]  ;;  %v227_v45 = vld [vmem:[%s14126_s23 + $0xe0] sm:$0x11]  ;;  %v464_v46 = vunpack.c.l.b16 %v226_v44  ;;  %v465_v47 = vunpack.c.h.b16 %v226_v44  ;;  %v8650_v1 = vld [vmem:[%s14126_s23 + $0x34] sm:$0xf0] }
  0x4a   : > { %1173 = vmatpush.bf16.msrb.mxu3 %v13192_v41  ;;  %v13250_v41 = vld [vmem:[%s14086_s21 + $0x2f0] sm:$0xff]  ;;  %v13113_v20 = vld [vmem:[%s14126_s23 + $0x5c] sm:$0xf]  ;;  %v13114_v24 = vld [vmem:[%s14126_s23 + $0x64] sm:$0xf] }
  0x4b   : > { %1090 = vmatpush.bf16.msrb.mxu0 %v13167_v50  ;;  %v500_v50 = vpack.c.b16 %v464_v46, %v464_v46  ;;  %v8697_v29 = vor.u32 %v13114_v24, %v8694_v25  ;;  %v13193_v46 = vld [vmem:[%s14086_s21 + $0x200] sm:$0xff] }
  0x4c   : > { %1118 = vmatpush.bf16.msrb.mxu1 %v13175_v51  ;;  %v501_v51 = vpack.c.b16 %v465_v47, %v465_v47  ;;  %v13228_v47 = vld [vmem:[%s14086_s21 + $0x240] sm:$0xff] }
  0x4d   : > { %1146 = vmatpush.bf16.msrb.mxu2 %v13183_v48  ;;  %v466_v48 = vunpack.c.l.b16 %v227_v45  ;;  %v13256_v25 = vld [vmem:[%s14086_s21 + $0x320] sm:$0xff] }
  0x4e   : > { %1174 = vmatpush.bf16.msrb.mxu3 %v13191_v49  ;;  %v467_v49 = vunpack.c.h.b16 %v227_v45 }
  0x4f   : > { %1091 = vmatpush.bf16.msrb.mxu0 %v13166_v54  ;;  %v13241_v54 = vld [vmem:[%s14086_s21 + $0x2a8] sm:$0xff] }
  0x50   : > { %1119 = vmatpush.bf16.msrb.mxu1 %v13174_v55  ;;  %v13249_v55 = vld [vmem:[%s14086_s21 + $0x2e8] sm:$0xff] }
  0x51   : > { %1147 = vmatpush.bf16.msrb.mxu2 %v13182_v52  ;;  %v502_v52 = vpack.c.b16 %v466_v48, %v466_v48 }
  0x52   : > { %1175 = vmatpush.bf16.msrb.mxu3 %v13190_v53  ;;  %v503_v53 = vpack.c.b16 %v467_v49, %v467_v49 }
  0x53   : > { %1092 = vmatpush.bf16.msrb.mxu0 %v13165_v2  ;;  %v8656_v2 = vld [vmem:[%s14126_s23 + $0x18] sm:$0xf] }
  0x54   : > { %1120 = vmatpush.bf16.msrb.mxu1 %v13173_v3  ;;  %v13109_v3 = vld [vmem:[%s14126_s23 + $0x38] sm:$0xf0] }
  0x55   : > { %1148 = vmatpush.bf16.msrb.mxu2 %v13181_v57  ;;  %v13233_v57 = vld [vmem:[%s14086_s21 + $0x268] sm:$0xff] }
  0x56   : > { %1176 = vmatpush.bf16.msrb.mxu3 %v13189_v58  ;;  %990 = vmatmul.bf16.gmra.mxu0 %v8669_v6  ;;  %v13240_v58 = vld [vmem:[%s14086_s21 + $0x2a0] sm:$0xff]  ;;  %v8649_v6 = vor.u32 %v13108_v63, %v8648_v62 }
  0x57   : > { %1018 = vmatmul.bf16.gmra.mxu1 %v8673_v7  ;;  %1093 = vmatpush.bf16.msrb.mxu0 %v13164_v10  ;;  %v8653_v7 = vor.u32 %v13104_v0, %v8650_v1  ;;  %v13239_v10 = vld [vmem:[%s14086_s21 + $0x298] sm:$0xff] }
  0x58   : > { %1046 = vmatmul.bf16.gmra.mxu2 %v8677_v8  ;;  %1121 = vmatpush.bf16.msrb.mxu1 %v13172_v11  ;;  %v8657_v8 = vor.u32 %v13109_v3, %v8656_v2  ;;  %v13247_v11 = vld [vmem:[%s14086_s21 + $0x2d8] sm:$0xff]  ;;  %v13258_v2 = vld [vmem:[%s14086_s21 + $0x330] sm:$0xff] }
  0x59   : > { %1149 = vmatpush.bf16.msrb.mxu2 %v13180_v4  ;;  %1074 = vmatmul.bf16.gmra.mxu3 %v8681_v9  ;;  %v13105_v4 = vld [vmem:[%s14126_s23 + $0x1c] sm:$0xf]  ;;  %v13266_v3 = vld [vmem:[%s14086_s21 + $0x370] sm:$0xff] }
  0x5a   : > { %1177 = vmatpush.bf16.msrb.mxu3 %v13188_v5  ;;  %v8658_v5 = vld [vmem:[%s14126_s23 + $0x3c] sm:$0xf0] }
  0x5b   : > { %1094 = vmatpush.bf16.msrb.mxu0 %v13163_v14  ;;  %v8661_v9 = vor.u32 %v13105_v4, %v8658_v5  ;;  %v13238_v14 = vld [vmem:[%s14086_s21 + $0x290] sm:$0xff]  ;;  %v13273_v4 = vld [vmem:[%s14086_s21 + $0x3a8] sm:$0xff] }
  0x5c   : > { %1122 = vmatpush.bf16.msrb.mxu1 %v13171_v15  ;;  %v13246_v15 = vld [vmem:[%s14086_s21 + $0x2d0] sm:$0xff]  ;;  %v13281_v5 = vld [vmem:[%s14086_s21 + $0x3e8] sm:$0xff] }
  0x5d   : > { %1150 = vmatpush.bf16.msrb.mxu2 %v13179_v12  ;;  %v13196_v12 = vld [vmem:[%s14086_s21 + $0x218] sm:$0xff] }
  0x5e   : > { %1178 = vmatpush.bf16.msrb.mxu3 %v13187_v13  ;;  %v13231_v13 = vld [vmem:[%s14086_s21 + $0x258] sm:$0xff] }
  0x5f   : > { %1095 = vmatpush.bf16.msrb.mxu0 %v13162_v18  ;;  %v8684_v18 = vld [vmem:[%s14126_s23 + $0x58] sm:$0xf] }
  0x60   : > { %1123 = vmatpush.bf16.msrb.mxu1 %v13170_v19  ;;  %v13117_v19 = vld [vmem:[%s14126_s23 + $0x78] sm:$0xf0] }
  0x61   : > { %1151 = vmatpush.bf16.msrb.mxu2 %v13178_v16  ;;  %v13195_v16 = vld [vmem:[%s14086_s21 + $0x210] sm:$0xff]  ;;  %v8685_v26 = vor.u32 %v13117_v19, %v8684_v18 }
  0x62   : > { %1179 = vmatpush.bf16.msrb.mxu3 %v13186_v17  ;;  %v13230_v17 = vld [vmem:[%s14086_s21 + $0x250] sm:$0xff] }
  0x63   : > { %1096 = vmatpush.bf16.msrb.mxu0 %v13161_v30  ;;  %v13237_v30 = vld [vmem:[%s14086_s21 + $0x288] sm:$0xff] }
  0x64   : > { %1124 = vmatpush.bf16.msrb.mxu1 %v13169_v31  ;;  %v13245_v31 = vld [vmem:[%s14086_s21 + $0x2c8] sm:$0xff] }
  0x65   : > { %1152 = vmatpush.bf16.msrb.mxu2 %v13177_v21  ;;  %v8686_v21 = vld [vmem:[%s14126_s23 + $0x7c] sm:$0xf0] }
  0x66   : > { %1180 = vmatpush.bf16.msrb.mxu3 %v13185_v22  ;;  %995 = vmatmul.bf16.gmra.mxu0 %v8705_v32  ;;  %v8692_v22 = vld [vmem:[%s14126_s23 + $0x60] sm:$0xf]  ;;  %v8689_v27 = vor.u32 %v13113_v20, %v8686_v21  ;;  %v13194_v32 = vld [vmem:[%s14086_s21 + $0x208] sm:$0xff] }
  0x67   : > { %1023 = vmatmul.bf16.gmra.mxu1 %v8709_v33  ;;  %1201 = vmatpush.bf16.msra.mxu0 %v13200_v38  ;;  %v8693_v28 = vor.u32 %v13118_v23, %v8692_v22  ;;  %v13229_v33 = vld [vmem:[%s14086_s21 + $0x248] sm:$0xff]  ;;  %v13122_v38 = vld [vmem:[%s14126_s23 + $0xa4] sm:$0xf] }
  0x68   : > { %1051 = vmatmul.bf16.gmra.mxu2 %v8713_v34  ;;  %2019 = vmatpush.bf16.msra.mxu1 %v13235_v39  ;;  %v13236_v34 = vld [vmem:[%s14086_s21 + $0x280] sm:$0xff]  ;;  %v8722_v39 = vld [vmem:[%s14126_s23 + $0xc4] sm:$0xf0] }
  0x69   : > { %1079 = vmatmul.bf16.gmra.mxu3 %v8717_v35  ;;  %2047 = vmatpush.bf16.msra.mxu2 %v13243_v36  ;;  %v13244_v35 = vld [vmem:[%s14086_s21 + $0x2c0] sm:$0xff]  ;;  %v8725_v45 = vor.u32 %v13122_v38, %v8722_v39  ;;  %v13270_v38 = vld [vmem:[%s14086_s21 + $0x390] sm:$0xff]  ;;  %v8700_v39 = vld [vmem:[%s14126_s23 + $0x68] sm:$0xf] }
  0x6a   : > { %2075 = vmatpush.bf16.msra.mxu3 %v13251_v37  ;;  %v8720_v36 = vld [vmem:[%s14126_s23 + $0xa0] sm:$0xf]  ;;  %v13126_v37 = vld [vmem:[%s14126_s23 + $0xc0] sm:$0xf0] }
  0x6b   : > { %1202 = vmatpush.bf16.msra.mxu0 %v13199_v42  ;;  %v13123_v42 = vld [vmem:[%s14126_s23 + $0xac] sm:$0xf]  ;;  %v8721_v44 = vor.u32 %v13126_v37, %v8720_v36  ;;  %v13255_v36 = vld [vmem:[%s14086_s21 + $0x318] sm:$0xff] }
  0x6c   : > { %2020 = vmatpush.bf16.msra.mxu1 %v13234_v43  ;;  %v8730_v43 = vld [vmem:[%s14126_s23 + $0xcc] sm:$0xf0]  ;;  %v13263_v37 = vld [vmem:[%s14086_s21 + $0x358] sm:$0xff] }
  0x6d   : > { %2048 = vmatpush.bf16.msra.mxu2 %v13242_v40  ;;  %v8728_v40 = vld [vmem:[%s14126_s23 + $0xa8] sm:$0xf]  ;;  %v8733_v49 = vor.u32 %v13123_v42, %v8730_v43  ;;  %v9243_v42 = vld [vmem:[%s14126_s23 + $0x144] sm:$0xf] }
  0x6e   : > { %2076 = vmatpush.bf16.msra.mxu3 %v13250_v41  ;;  %v13127_v41 = vld [vmem:[%s14126_s23 + $0xc8] sm:$0xf0]  ;;  %v13214_v43 = vld [vmem:[%s14126_s23 + $0x164] sm:$0xf0] }
  0x6f   : > { %1203 = vmatpush.bf16.msra.mxu0 %v13198_v56  ;;  %v8729_v48 = vor.u32 %v13127_v41, %v8728_v40  ;;  %v13274_v56 = vld [vmem:[%s14086_s21 + $0x3b0] sm:$0xff]  ;;  %v13119_v40 = vld [vmem:[%s14126_s23 + $0x88] sm:$0xf0] }
  0x70   : > { %2021 = vmatpush.bf16.msra.mxu1 %v13233_v57  ;;  %v13278_v41 = vld [vmem:[%s14086_s21 + $0x3d0] sm:$0xff] }
  0x71   : > { %2049 = vmatpush.bf16.msra.mxu2 %v13241_v54  ;;  %v13259_v54 = vld [vmem:[%s14086_s21 + $0x338] sm:$0xff] }
  0x72   : > { %2077 = vmatpush.bf16.msra.mxu3 %v13249_v55  ;;  %v13267_v55 = vld [vmem:[%s14086_s21 + $0x378] sm:$0xff] }
  0x73   : > { %1204 = vmatpush.bf16.msra.mxu0 %v13197_v60 }
  0x74   : > { %2022 = vmatpush.bf16.msra.mxu1 %v13232_v61 }
  0x75   : > { %2050 = vmatpush.bf16.msra.mxu2 %v13240_v58 }
  0x76   : > { %1000 = vmatmul.bf16.gmra.mxu0 %v500_v50  ;;  %2078 = vmatpush.bf16.msra.mxu3 %v13248_v59  ;;  %v13275_v50 = vld [vmem:[%s14086_s21 + $0x3b8] sm:$0xff]  ;;  %v13282_v59 = vld [vmem:[%s14086_s21 + $0x3f0] sm:$0xff] }
  0x77   : > { %1028 = vmatmul.bf16.gmra.mxu1 %v501_v51  ;;  %1205 = vmatpush.bf16.msra.mxu0 %v13196_v12  ;;  %v13283_v51 = vld [vmem:[%s14086_s21 + $0x3f8] sm:$0xff] }
  0x78   : > { %1056 = vmatmul.bf16.gmra.mxu2 %v502_v52  ;;  %2023 = vmatpush.bf16.msra.mxu1 %v13231_v13  ;;  %v228_v52 = vld [vmem:[%s14126_s23 + $0xe8] sm:$0x11]  ;;  %v9207_v12 = vld [vmem:[%s14126_s23 + $0xfc] sm:$0xf]  ;;  %v13205_v13 = vld [vmem:[%s14126_s23 + $0x11c] sm:$0xf0] }
  0x79   : > { %1084 = vmatmul.bf16.gmra.mxu3 %v503_v53  ;;  %2051 = vmatpush.bf16.msra.mxu2 %v13239_v10  ;;  %v229_v53 = vld [vmem:[%s14126_s23 + $0xf0] sm:$0x11]  ;;  %v468_v57 = vunpack.c.l.b16 %v228_v52  ;;  %v469_v58 = vunpack.c.h.b16 %v228_v52  ;;  %v13110_v10 = vld [vmem:[%s14126_s23 + $0x40] sm:$0xf0]  ;;  %v9208_v19 = vor.u32 %v13205_v13, %v9207_v12  ;;  %v9279_v12 = vld [vmem:[%s14126_s23 + $0x18c] sm:$0xf] }
  0x7a   : > { %2079 = vmatpush.bf16.msra.mxu3 %v13247_v11  ;;  %v470_v60 = vunpack.c.l.b16 %v229_v53  ;;  %v471_v61 = vunpack.c.h.b16 %v229_v53  ;;  %v13280_v11 = vld [vmem:[%s14086_s21 + $0x3e0] sm:$0xff]  ;;  %v13223_v13 = vld [vmem:[%s14126_s23 + $0x1ac] sm:$0xf0] }
  0x7b   : > { %1206 = vmatpush.bf16.msra.mxu0 %v13195_v16  ;;  %v504_v62 = vpack.c.b16 %v468_v57, %v468_v57  ;;  %v505_v63 = vpack.c.b16 %v469_v58, %v469_v58  ;;  %v9215_v16 = vld [vmem:[%s14126_s23 + $0x104] sm:$0xf] }
  0x7c   : > { %2024 = vmatpush.bf16.msra.mxu1 %v13230_v17  ;;  %v506_v0 = vpack.c.b16 %v470_v60, %v470_v60  ;;  %v507_v1 = vpack.c.b16 %v471_v61, %v471_v61  ;;  %v13206_v17 = vld [vmem:[%s14126_s23 + $0x124] sm:$0xf0]  ;;  %v13262_v60 = vld [vmem:[%s14086_s21 + $0x350] sm:$0xff] }
  0x7d   : > { %2052 = vmatpush.bf16.msra.mxu2 %v13238_v14  ;;  %v13201_v14 = vld [vmem:[%s14126_s23 + $0x100] sm:$0xf]  ;;  %v9216_v23 = vor.u32 %v13206_v17, %v9215_v16  ;;  %v13269_v61 = vld [vmem:[%s14086_s21 + $0x388] sm:$0xff]  ;;  %v9287_v16 = vld [vmem:[%s14126_s23 + $0x194] sm:$0xf] }
  0x7e   : > { %2080 = vmatpush.bf16.msra.mxu3 %v13246_v15  ;;  %v9209_v15 = vld [vmem:[%s14126_s23 + $0x120] sm:$0xf0]  ;;  %v13224_v17 = vld [vmem:[%s14126_s23 + $0x1b4] sm:$0xf0] }
  0x7f   : > { %1207 = vmatpush.bf16.msra.mxu0 %v13194_v32  ;;  %v9212_v22 = vor.u32 %v13201_v14, %v9209_v15  ;;  %v13219_v14 = vld [vmem:[%s14126_s23 + $0x190] sm:$0xf]  ;;  %v9281_v15 = vld [vmem:[%s14126_s23 + $0x1b0] sm:$0xf0] }
  0x80   : > { %2025 = vmatpush.bf16.msra.mxu1 %v13229_v33 }
  0x81   : > { %2053 = vmatpush.bf16.msra.mxu2 %v13237_v30 }
  0x82   : > { %2081 = vmatpush.bf16.msra.mxu3 %v13245_v31 }
  0x83   : > { %1208 = vmatpush.bf16.msra.mxu0 %v13193_v46  ;;  %v9251_v46 = vld [vmem:[%s14126_s23 + $0x14c] sm:$0xf] }
  0x84   : > { %2026 = vmatpush.bf16.msra.mxu1 %v13228_v47  ;;  %v13215_v47 = vld [vmem:[%s14126_s23 + $0x16c] sm:$0xf0] }
  0x85   : > { %2054 = vmatpush.bf16.msra.mxu2 %v13236_v34 }
  0x86   : > { %1097 = vmatmul.bf16.vlgmr.msrb.gmra.mxu0 %v8649_v6  ;;  %2082 = vmatpush.bf16.msra.mxu3 %v13244_v35  ;;  %v13257_v6 = vld [vmem:[%s14086_s21 + $0x328] sm:$0xff] }
  0x87   : > { %1125 = vmatmul.bf16.vlgmr.msrb.gmra.mxu1 %v8653_v7  ;;  %2103 = vmatpush.bf16.msrb.mxu0 %v13259_v54  ;;  %v13265_v7 = vld [vmem:[%s14086_s21 + $0x368] sm:$0xff] }
  0x88   : > { %1153 = vmatmul.bf16.vlgmr.msrb.gmra.mxu2 %v8657_v8  ;;  %2131 = vmatpush.bf16.msrb.mxu1 %v13267_v55  ;;  %v13272_v8 = vld [vmem:[%s14086_s21 + $0x3a0] sm:$0xff] }
  0x89   : > { %1181 = vmatmul.bf16.vlgmr.msrb.gmra.mxu3 %v8661_v9  ;;  %2159 = vmatpush.bf16.msrb.mxu2 %v13275_v50  ;;  %v8664_v9 = vld [vmem:[%s14126_s23 + $0x20] sm:$0xf]  ;;  %v8701_v50 = vor.u32 %v13119_v40, %v8700_v39  ;;  %v230_v39 = vld [vmem:[%s14126_s23 + $0xf8] sm:$0x1] }
  0x8a   : > { %2187 = vmatpush.bf16.msrb.mxu3 %v13283_v51  ;;  %v8665_v18 = vor.u32 %v13110_v10, %v8664_v9  ;;  %v9244_v51 = vor.u32 %v13214_v43, %v9243_v42  ;;  %v8736_v9 = vld [vmem:[%s14126_s23 + $0xb0] sm:$0xf]  ;;  %v13128_v10 = vld [vmem:[%s14126_s23 + $0xd0] sm:$0xf0]  ;;  %v14319_v42 = vld [vmem:[%s14126_s23 + $0x1dc] sm:$0x11] }
  0x8b   : > { %2104 = vmatpush.bf16.msrb.mxu0 %v13258_v2  ;;  %v9056_v40 = vld [vmem:[%s14126_s23 + $0x1d4] sm:$0x11] }
  0x8c   : > { %2132 = vmatpush.bf16.msrb.mxu1 %v13266_v3 }
  0x8d   : > { %2160 = vmatpush.bf16.msrb.mxu2 %v13274_v56  ;;  %v9252_v56 = vor.u32 %v13215_v47, %v9251_v46  ;;  %v13291_v46 = vld [vmem:[%s14086_s21 + $0x438] sm:$0xff] }
  0x8e   : > { %2188 = vmatpush.bf16.msrb.mxu3 %v13282_v59  ;;  %v13254_v59 = vld [vmem:[%s14086_s21 + $0x310] sm:$0xff]  ;;  %v13299_v47 = vld [vmem:[%s14086_s21 + $0x478] sm:$0xff] }
  0x8f   : > { %2105 = vmatpush.bf16.msrb.mxu0 %v13257_v6  ;;  %v13253_v6 = vld [vmem:[%s14086_s21 + $0x308] sm:$0xff] }
  0x90   : > { %2133 = vmatpush.bf16.msrb.mxu1 %v13265_v7  ;;  %v13261_v7 = vld [vmem:[%s14086_s21 + $0x348] sm:$0xff] }
  0x91   : > { %2161 = vmatpush.bf16.msrb.mxu2 %v13273_v4 }
  0x92   : > { %2189 = vmatpush.bf16.msrb.mxu3 %v13281_v5 }
  0x93   : > { %2106 = vmatpush.bf16.msrb.mxu0 %v13256_v25 }
  0x95   : > { %2162 = vmatpush.bf16.msrb.mxu2 %v13272_v8  ;;  %v13268_v8 = vld [vmem:[%s14086_s21 + $0x380] sm:$0xff] }
  0x96   : > { %1102 = vmatmul.bf16.gmra.mxu0 %v8685_v26  ;;  %2190 = vmatpush.bf16.msrb.mxu3 %v13280_v11  ;;  %v13264_v26 = vld [vmem:[%s14086_s21 + $0x360] sm:$0xff] }
  0x97   : > { %1130 = vmatmul.bf16.gmra.mxu1 %v8689_v27  ;;  %v13271_v27 = vld [vmem:[%s14086_s21 + $0x398] sm:$0xff]  ;;  %2107 = vmatpush.bf16.msrb.mxu0 %v13255_v36  ;;  %v13276_v11 = vld [vmem:[%s14086_s21 + $0x3c0] sm:$0xff] }
  0x98   : > { %1158 = vmatmul.bf16.gmra.mxu2 %v8693_v28  ;;  %v13279_v28 = vld [vmem:[%s14086_s21 + $0x3d8] sm:$0xff]  ;;  %2134 = vmatpush.bf16.msrb.mxu1 %v13264_v26 }
  0x99   : > { %1186 = vmatmul.bf16.gmra.mxu3 %v8697_v29  ;;  %2163 = vmatpush.bf16.msrb.mxu2 %v13271_v27  ;;  %v9284_v27 = vor.u32 %v13219_v14, %v9281_v15  ;;  %v13289_v14 = vld [vmem:[%s14086_s21 + $0x428] sm:$0xff] }
  0x9a   : > { %2191 = vmatpush.bf16.msrb.mxu3 %v13279_v28  ;;  %v9288_v28 = vor.u32 %v13224_v17, %v9287_v16  ;;  %v13297_v15 = vld [vmem:[%s14086_s21 + $0x468] sm:$0xff]  ;;  %v13331_v16 = vld [vmem:[%s14086_s21 + $0x4a0] sm:$0xff]  ;;  %v13207_v17 = vld [vmem:[%s14126_s23 + $0x12c] sm:$0xf0] }
  0x9b   : > { %2108 = vmatpush.bf16.msrb.mxu0 %v13254_v59 }
  0x9c   : > { %2135 = vmatpush.bf16.msrb.mxu1 %v13263_v37 }
  0x9d   : > { %2164 = vmatpush.bf16.msrb.mxu2 %v13270_v38 }
  0x9e   : > { %2192 = vmatpush.bf16.msrb.mxu3 %v13278_v41 }
  0x9f   : > { %2109 = vmatpush.bf16.msrb.mxu0 %v13253_v6 }
  0xa0   : > { %2136 = vmatpush.bf16.msrb.mxu1 %v13262_v60 }
  0xa1   : > { %2165 = vmatpush.bf16.msrb.mxu2 %v13269_v61 }
  0xa4   : > { %2137 = vmatpush.bf16.msrb.mxu1 %v13261_v7 }
  0xa5   : > { %2166 = vmatpush.bf16.msrb.mxu2 %v13268_v8 }
  0xa6   : > { %1107 = vmatmul.bf16.gmra.mxu0 %v8721_v44  ;;  %v13210_v44 = vld [vmem:[%s14126_s23 + $0x148] sm:$0xf] }
  0xa7   : > { %1135 = vmatmul.bf16.gmra.mxu1 %v8725_v45  ;;  %v9245_v45 = vld [vmem:[%s14126_s23 + $0x168] sm:$0xf0] }
  0xa8   : > { %1163 = vmatmul.bf16.gmra.mxu2 %v8729_v48  ;;  %v9248_v55 = vor.u32 %v13210_v44, %v9245_v45  ;;  %v472_v44 = vunpack.c.l.b16 %v230_v39  ;;  %v1506_v45 = vunpack.c.l.b16 %v9056_v40 }
  0xa9   : > { %1191 = vmatmul.bf16.gmra.mxu3 %v8733_v49 }
  0xb6   : > { %1112 = vmatmul.bf16.gmra.mxu0 %v504_v62  ;;  %v13277_v62 = vld [vmem:[%s14086_s21 + $0x3c8] sm:$0xff] }
  0xb7   : > { %1140 = vmatmul.bf16.gmra.mxu1 %v505_v63  ;;  %2193 = vmatpush.bf16.msrb.mxu3 %v13277_v62 }
  0xb8   : > { %1168 = vmatmul.bf16.gmra.mxu2 %v506_v0 }
  0xb9   : > { %1196 = vmatmul.bf16.gmra.mxu3 %v507_v1 }
  0xbb   : > { %2194 = vmatpush.bf16.msrb.mxu3 %v13276_v11  ;;  %v13202_v11 = vld [vmem:[%s14126_s23 + $0x108] sm:$0xf] }
  0xc3   : > { %v986_v20 = vpop.f32.mrf.mxu0 }
  0xc4   : > { %v1014_v21 = vpop.f32.mrf.mxu1 }
  0xc5   : > { %v1015_v24 = vadd.f32 %v1014_v21, %v986_v20  ;;  %v8737_v20 = vor.u32 %v13128_v10, %v8736_v9  ;;  %v9280_v21 = vor.u32 %v13223_v13, %v9279_v12  ;;  %v9217_v12 = vld [vmem:[%s14126_s23 + $0x128] sm:$0xf0] }
  0xc6   : > { %1209 = vmatmul.bf16.vlgmr.msra.gmra.mxu0 %v8665_v18  ;;  %v9223_v13 = vld [vmem:[%s14126_s23 + $0x10c] sm:$0xf] }
  0xc7   : > { %2027 = vmatmul.bf16.vlgmr.msra.gmra.mxu1 %v9208_v19 }
  0xc8   : > { %2055 = vmatmul.bf16.vlgmr.msra.gmra.mxu2 %v9212_v22  ;;  %v13252_v22 = vld [vmem:[%s14086_s21 + $0x300] sm:$0xff] }
  0xc9   : > { %2083 = vmatmul.bf16.vlgmr.msra.gmra.mxu3 %v9216_v23  ;;  %v13260_v23 = vld [vmem:[%s14086_s21 + $0x340] sm:$0xff]  ;;  %2110 = vmatpush.bf16.msrb.mxu0 %v13252_v22  ;;  %v13208_v22 = vld [vmem:[%s14126_s23 + $0x134] sm:$0xf0] }
  0xca   : > { %2138 = vmatpush.bf16.msrb.mxu1 %v13260_v23 }
  0xcb   : > { %v1042_v29 = vpop.f32.mrf.mxu2  ;;  %v988_v32 = vpop.f32.mrf.mxu0 }
  0xcc   : > { %v1070_v30 = vpop.f32.mrf.mxu3  ;;  %v1043_v31 = vadd.f32 %v1042_v29, %v1015_v24  ;;  %v1016_v33 = vpop.f32.mrf.mxu1 }
  0xcd   : > { %v1017_v34 = vadd.f32 %v1016_v33, %v988_v32  ;;  %v13342_v32 = vld [vmem:[%s14086_s21 + $0x4f8] sm:$0xff]  ;;  %2215 = vmatpush.bf16.msra.mxu0 %v13291_v46 }
  0xce   : > { %v14276_v35 = vadd.f32 %v1070_v30, %v1043_v31  ;;  %v13334_v31 = vld [vmem:[%s14086_s21 + $0x4b8] sm:$0xff]  ;;  %3090 = vmatpush.bf16.msra.mxu3 %v13342_v32  ;;  %2243 = vmatpush.bf16.msra.mxu1 %v13299_v47  ;;  %v13288_v32 = vld [vmem:[%s14086_s21 + $0x420] sm:$0xff] }
  0xcf   : > { %3062 = vmatpush.bf16.msra.mxu2 %v13334_v31  ;;  %v13287_v46 = vld [vmem:[%s14086_s21 + $0x418] sm:$0xff] }
  0xd0   : > { %v13295_v47 = vld [vmem:[%s14086_s21 + $0x458] sm:$0xff] }
  0xd3   : > { %v1044_v48 = vpop.f32.mrf.mxu2  ;;  %v991_v53 = vpop.f32.mrf.mxu0 }
  0xd4   : > { %v1072_v49 = vpop.f32.mrf.mxu3  ;;  %v1045_v52 = vadd.f32 %v1044_v48, %v1017_v34  ;;  %v1019_v54 = vpop.f32.mrf.mxu1  ;;  %v13333_v48 = vld [vmem:[%s14086_s21 + $0x4b0] sm:$0xff] }
  0xd5   : > { %v1020_v57 = vadd.f32 %v1019_v54, %v991_v53  ;;  %3063 = vmatpush.bf16.msra.mxu2 %v13333_v48  ;;  %v508_v54 = vpack.c.b16 %v472_v44, %v472_v44  ;;  %v9253_v44 = vld [vmem:[%s14126_s23 + $0x170] sm:$0xf0] }
  0xd6   : > { %v14290_v58 = vadd.f32 %v1072_v49, %v1045_v52  ;;  %1214 = vmatmul.bf16.gmra.mxu0 %v8701_v50  ;;  %v1507_v49 = vunpack.c.h.b16 %v9056_v40  ;;  %v1508_v50 = vunpack.c.l.b16 %v14319_v42  ;;  %v13329_v48 = vld [vmem:[%s14086_s21 + $0x490] sm:$0xff] }
  0xd7   : > { %2032 = vmatmul.bf16.gmra.mxu1 %v9244_v51  ;;  %v13341_v51 = vld [vmem:[%s14086_s21 + $0x4f0] sm:$0xff] }
  0xd8   : > { %2060 = vmatmul.bf16.gmra.mxu2 %v9248_v55  ;;  %3091 = vmatpush.bf16.msra.mxu3 %v13341_v51  ;;  %v1542_v55 = vpack.c.b16 %v1506_v45, %v1506_v45  ;;  %v1543_v60 = vpack.c.b16 %v1507_v49, %v1507_v49  ;;  %v1544_v61 = vpack.c.b16 %v1508_v50, %v1508_v50  ;;  %v9259_v45 = vld [vmem:[%s14126_s23 + $0x154] sm:$0xf]  ;;  %v13216_v49 = vld [vmem:[%s14126_s23 + $0x174] sm:$0xf0] }
  0xd9   : > { %2088 = vmatmul.bf16.gmra.mxu3 %v9252_v56  ;;  %v13212_v50 = vld [vmem:[%s14126_s23 + $0x158] sm:$0xf]  ;;  %v13337_v51 = vld [vmem:[%s14086_s21 + $0x4d0] sm:$0xff] }
  0xdb   : > { %v1047_v63 = vpop.f32.mrf.mxu2  ;;  %v993_v2 = vpop.f32.mrf.mxu0 }
  0xdc   : > { %v1075_v0 = vpop.f32.mrf.mxu3  ;;  %v1048_v1 = vadd.f32 %v1047_v63, %v1020_v57  ;;  %v1021_v3 = vpop.f32.mrf.mxu1 }
  0xdd   : > { %v1022_v4 = vadd.f32 %v1021_v3, %v993_v2  ;;  %v13332_v2 = vld [vmem:[%s14086_s21 + $0x4a8] sm:$0xff] }
  0xde   : > { %v14296_v5 = vadd.f32 %v1075_v0, %v1048_v1  ;;  %v13290_v0 = vld [vmem:[%s14086_s21 + $0x430] sm:$0xff]  ;;  %v13340_v3 = vld [vmem:[%s14086_s21 + $0x4e8] sm:$0xff]  ;;  %3064 = vmatpush.bf16.msra.mxu2 %v13332_v2 }
  0xdf   : > { %v13298_v1 = vld [vmem:[%s14086_s21 + $0x470] sm:$0xff]  ;;  %2216 = vmatpush.bf16.msra.mxu0 %v13290_v0  ;;  %3092 = vmatpush.bf16.msra.mxu3 %v13340_v3  ;;  %v13328_v3 = vld [vmem:[%s14086_s21 + $0x488] sm:$0xff] }
  0xe0   : > { %2244 = vmatpush.bf16.msra.mxu1 %v13298_v1  ;;  %v13286_v1 = vld [vmem:[%s14086_s21 + $0x410] sm:$0xff] }
  0xe1   : > { %v13294_v2 = vld [vmem:[%s14086_s21 + $0x450] sm:$0xff] }
  0xe2   : > { %3065 = vmatpush.bf16.msra.mxu2 %v13331_v16  ;;  %v13335_v16 = vld [vmem:[%s14086_s21 + $0x4c0] sm:$0xff] }
  0xe3   : > { %v1049_v18 = vpop.f32.mrf.mxu2  ;;  %v996_v25 = vpop.f32.mrf.mxu0  ;;  %2217 = vmatpush.bf16.msra.mxu0 %v13289_v14  ;;  %v13220_v14 = vld [vmem:[%s14126_s23 + $0x198] sm:$0xf] }
  0xe4   : > { %v1077_v19 = vpop.f32.mrf.mxu3  ;;  %v1050_v24 = vadd.f32 %v1049_v18, %v1022_v4  ;;  %v1024_v26 = vpop.f32.mrf.mxu1  ;;  %v13203_v18 = vld [vmem:[%s14126_s23 + $0x110] sm:$0xf]  ;;  %2245 = vmatpush.bf16.msra.mxu1 %v13297_v15  ;;  %v9289_v15 = vld [vmem:[%s14126_s23 + $0x1b8] sm:$0xf0] }
  0xe5   : > { %v1025_v29 = vadd.f32 %v1024_v26, %v996_v25  ;;  %v9220_v25 = vor.u32 %v13202_v11, %v9217_v12  ;;  %v9224_v26 = vor.u32 %v13207_v17, %v9223_v13  ;;  %v13285_v11 = vld [vmem:[%s14086_s21 + $0x408] sm:$0xff]  ;;  %v13327_v13 = vld [vmem:[%s14086_s21 + $0x480] sm:$0xff]  ;;  %v9295_v17 = vld [vmem:[%s14126_s23 + $0x19c] sm:$0xf] }
  0xe6   : > { %v14312_v30 = vadd.f32 %v1077_v19, %v1050_v24  ;;  %1219 = vmatmul.bf16.gmra.mxu0 %v8737_v20  ;;  %v13339_v19 = vld [vmem:[%s14086_s21 + $0x4e0] sm:$0xff]  ;;  %v9225_v20 = vld [vmem:[%s14126_s23 + $0x130] sm:$0xf0]  ;;  %v13293_v12 = vld [vmem:[%s14086_s21 + $0x448] sm:$0xff] }
  0xe7   : > { %2037 = vmatmul.bf16.gmra.mxu1 %v9280_v21  ;;  %v9231_v21 = vld [vmem:[%s14126_s23 + $0x114] sm:$0xf]  ;;  %3093 = vmatpush.bf16.msra.mxu3 %v13339_v19  ;;  %v13221_v19 = vld [vmem:[%s14126_s23 + $0x1a0] sm:$0xf] }
  0xe8   : > { %2065 = vmatmul.bf16.gmra.mxu2 %v9284_v27  ;;  %v9232_v31 = vor.u32 %v13208_v22, %v9231_v21  ;;  %2218 = vmatpush.bf16.msra.mxu0 %v13288_v32  ;;  %v9303_v21 = vld [vmem:[%s14126_s23 + $0x1a4] sm:$0xf]  ;;  %v13226_v22 = vld [vmem:[%s14126_s23 + $0x1c4] sm:$0xf0] }
  0xe9   : > { %2093 = vmatmul.bf16.gmra.mxu3 %v9288_v28 }
  0xeb   : > { %v1052_v33 = vpop.f32.mrf.mxu2  ;;  %v998_v37 = vpop.f32.mrf.mxu0 }
  0xec   : > { %v1080_v34 = vpop.f32.mrf.mxu3  ;;  %v1053_v36 = vadd.f32 %v1052_v33, %v1025_v29  ;;  %v1026_v38 = vpop.f32.mrf.mxu1  ;;  %v9228_v29 = vor.u32 %v13203_v18, %v9225_v20  ;;  %v13296_v33 = vld [vmem:[%s14086_s21 + $0x460] sm:$0xff]  ;;  %2219 = vmatpush.bf16.msra.mxu0 %v13287_v46 }
  0xed   : > { %v1027_v41 = vadd.f32 %v1026_v38, %v998_v37  ;;  %2246 = vmatpush.bf16.msra.mxu1 %v13296_v33  ;;  %v13225_v18 = vld [vmem:[%s14126_s23 + $0x1bc] sm:$0xf0]  ;;  %v9297_v20 = vld [vmem:[%s14126_s23 + $0x1c0] sm:$0xf0] }
  0xee   : > { %v14321_v43 = vadd.f32 %v1080_v34, %v1053_v36  ;;  %v13330_v34 = vld [vmem:[%s14086_s21 + $0x498] sm:$0xff] }
  0xef   : > { %v13338_v36 = vld [vmem:[%s14086_s21 + $0x4d8] sm:$0xff]  ;;  %3066 = vmatpush.bf16.msra.mxu2 %v13330_v34  ;;  %v9300_v34 = vor.u32 %v13221_v19, %v9297_v20 }
  0xf0   : > { %3094 = vmatpush.bf16.msra.mxu3 %v13338_v36  ;;  %2220 = vmatpush.bf16.msra.mxu0 %v13286_v1  ;;  %v9304_v36 = vor.u32 %v13226_v22, %v9303_v21 }
  0xf1   : > { %2247 = vmatpush.bf16.msra.mxu1 %v13295_v47 }
  0xf3   : > { %v1054_v52 = vpop.f32.mrf.mxu2  ;;  %v1001_v57 = vpop.f32.mrf.mxu0  ;;  %3067 = vmatpush.bf16.msra.mxu2 %v13329_v48 }
  0xf4   : > { %v1082_v53 = vpop.f32.mrf.mxu3  ;;  %v1055_v56 = vadd.f32 %v1054_v52, %v1027_v41  ;;  %v1029_v59 = vpop.f32.mrf.mxu1  ;;  %v13211_v41 = vld [vmem:[%s14126_s23 + $0x150] sm:$0xf]  ;;  %v9261_v52 = vld [vmem:[%s14126_s23 + $0x178] sm:$0xf0]  ;;  %3095 = vmatpush.bf16.msra.mxu3 %v13337_v51  ;;  %2221 = vmatpush.bf16.msra.mxu0 %v13285_v11  ;;  %v1509_v51 = vunpack.c.h.b16 %v14319_v42 }
  0xf5   : > { %v1030_v62 = vadd.f32 %v1029_v59, %v1001_v57  ;;  %v9256_v57 = vor.u32 %v13211_v41, %v9253_v44  ;;  %v9260_v59 = vor.u32 %v13216_v49, %v9259_v45  ;;  %2248 = vmatpush.bf16.msra.mxu1 %v13294_v2  ;;  %v13366_v41 = vld [vmem:[%s14086_s21 + $0x5b8] sm:$0xff]  ;;  %v9058_v49 = vld [vmem:[%s14126_s23 + $0x1e4] sm:$0x11] }
  0xf6   : > { %v14328_v63 = vadd.f32 %v1082_v53, %v1055_v56  ;;  %1224 = vmatmul.bf16.gmra.mxu0 %v508_v54  ;;  %v9267_v53 = vld [vmem:[%s14126_s23 + $0x15c] sm:$0xf]  ;;  %v13217_v54 = vld [vmem:[%s14126_s23 + $0x17c] sm:$0xf0]  ;;  %v1545_v42 = vpack.c.b16 %v1509_v51, %v1509_v51 }
  0xf7   : > { %2042 = vmatmul.bf16.gmra.mxu1 %v1542_v55  ;;  %v9268_v0 = vor.u32 %v13217_v54, %v9267_v53  ;;  %3068 = vmatpush.bf16.msra.mxu2 %v13328_v3  ;;  %v13374_v44 = vld [vmem:[%s14086_s21 + $0x5f8] sm:$0xff] }
  0xf8   : > { %2070 = vmatmul.bf16.gmra.mxu2 %v1543_v60  ;;  %v13350_v53 = vld [vmem:[%s14086_s21 + $0x538] sm:$0xff] }
  0xf9   : > { %2098 = vmatmul.bf16.gmra.mxu3 %v1544_v61  ;;  %2249 = vmatpush.bf16.msra.mxu1 %v13293_v12  ;;  %v13358_v54 = vld [vmem:[%s14086_s21 + $0x578] sm:$0xff] }
  0xfb   : > { %v1057_v4 = vpop.f32.mrf.mxu2  ;;  %v1003_v8 = vpop.f32.mrf.mxu0  ;;  %3069 = vmatpush.bf16.msra.mxu2 %v13327_v13 }
  0xfc   : > { %v1085_v6 = vpop.f32.mrf.mxu3  ;;  %v1058_v7 = vadd.f32 %v1057_v4, %v1030_v62  ;;  %v1031_v9 = vpop.f32.mrf.mxu1  ;;  %v9264_v62 = vor.u32 %v13212_v50, %v9261_v52  ;;  %v13336_v4 = vld [vmem:[%s14086_s21 + $0x4c8] sm:$0xff]  ;;  %v1510_v52 = vunpack.c.l.b16 %v9058_v49 }
  0xfd   : > { %3096 = vmatpush.bf16.msra.mxu3 %v13336_v4  ;;  %v14430_v50 = vld [vmem:[%s14126_s23 + $0x1ec] sm:$0x11] }
  0xfe   : > { %v14334_v10 = vadd.f32 %v1085_v6, %v1058_v7  ;;  %v1546_v3 = vpack.c.b16 %v1510_v52, %v1510_v52  ;;  %v13304_v52 = vld [vmem:[%s14126_s23 + $0x218] sm:$0xf0] }
 0x101   : > { %3097 = vmatpush.bf16.msra.mxu3 %v13335_v16  ;;  %v13364_v16 = vld [vmem:[%s14086_s21 + $0x5a8] sm:$0xff] }
 0x103   : > { %v1059_v23 = vpop.f32.mrf.mxu2  ;;  %v14348_v27 = vpop.f32.mrf.mxu0 }
 0x104   : > { %v1087_v24 = vpop.f32.mrf.mxu3  ;;  %v14350_v28 = vpop.f32.mrf.mxu1 }
 0x106   : > { %2111 = vmatmul.bf16.vlgmr.msrb.gmra.mxu0 %v9220_v25  ;;  %v9292_v25 = vor.u32 %v13220_v14, %v9289_v15  ;;  %v13349_v14 = vld [vmem:[%s14086_s21 + $0x530] sm:$0xff] }
 0x107   : > { %2139 = vmatmul.bf16.vlgmr.msrb.gmra.mxu1 %v9224_v26  ;;  %v9296_v26 = vor.u32 %v13225_v18, %v9295_v17  ;;  %v13357_v15 = vld [vmem:[%s14086_s21 + $0x570] sm:$0xff]  ;;  %v13372_v17 = vld [vmem:[%s14086_s21 + $0x5e8] sm:$0xff]  ;;  %v1099_v18 = vadd.f32 %v14348_v27, %v14276_v35  ;;  %v13204_v27 = vld [vmem:[%s14126_s23 + $0x118] sm:$0xf] }
 0x108   : > { %2167 = vmatmul.bf16.vlgmr.msrb.gmra.mxu2 %v9228_v29  ;;  %v13284_v29 = vld [vmem:[%s14086_s21 + $0x400] sm:$0xff] }
 0x109   : > { %2195 = vmatmul.bf16.vlgmr.msrb.gmra.mxu3 %v9232_v31  ;;  %v13292_v31 = vld [vmem:[%s14086_s21 + $0x440] sm:$0xff]  ;;  %2222 = vmatpush.bf16.msra.mxu0 %v13284_v29  ;;  %v1127_v35 = vadd.f32 %v14350_v28, %v1099_v18 }
 0x10a   : > { %2250 = vmatpush.bf16.msra.mxu1 %v13292_v31  ;;  %3174 = vmatpush.bf16.msrb.mxu2 %v13366_v41  ;;  %v13348_v31 = vld [vmem:[%s14086_s21 + $0x528] sm:$0xff]  ;;  %v13209_v41 = vld [vmem:[%s14126_s23 + $0x13c] sm:$0xf0] }
 0x10b   : > { %v14356_v37 = vpop.f32.mrf.mxu2  ;;  %v14360_v39 = vpop.f32.mrf.mxu0  ;;  %3202 = vmatpush.bf16.msrb.mxu3 %v13374_v44  ;;  %v9789_v44 = vld [vmem:[%s14126_s23 + $0x1f8] sm:$0xf] }
 0x10c   : > { %v14358_v38 = vpop.f32.mrf.mxu3  ;;  %v14362_v40 = vpop.f32.mrf.mxu1  ;;  %v1155_v29 = vadd.f32 %v14356_v37, %v1127_v35  ;;  %v1101_v51 = vadd.f32 %v14360_v39, %v14290_v58 }
 0x10d   : > { %3118 = vmatpush.bf16.msrb.mxu0 %v13350_v53  ;;  %v13300_v53 = vld [vmem:[%s14126_s23 + $0x1fc] sm:$0xf] }
 0x10e   : > { %3146 = vmatpush.bf16.msrb.mxu1 %v13358_v54  ;;  %v9791_v54 = vld [vmem:[%s14126_s23 + $0x21c] sm:$0xf0]  ;;  %v1183_v28 = vadd.f32 %v14358_v38, %v1155_v29  ;;  %v1129_v38 = vadd.f32 %v14362_v40, %v1101_v51  ;;  %v13313_v51 = vld [vmem:[%s14126_s23 + $0x260] sm:$0xf0] }
 0x111   : > { %3119 = vmatpush.bf16.msrb.mxu0 %v13349_v14  ;;  %v13355_v14 = vld [vmem:[%s14086_s21 + $0x560] sm:$0xff] }
 0x112   : > { %3147 = vmatpush.bf16.msrb.mxu1 %v13357_v15  ;;  %v13362_v15 = vld [vmem:[%s14086_s21 + $0x598] sm:$0xff] }
 0x113   : > { %v14376_v55 = vpop.f32.mrf.mxu2  ;;  %v14380_v60 = vpop.f32.mrf.mxu0 }
 0x114   : > { %v14378_v56 = vpop.f32.mrf.mxu3  ;;  %v14382_v61 = vpop.f32.mrf.mxu1 }
 0x115   : > { %3120 = vmatpush.bf16.msrb.mxu0 %v13348_v31  ;;  %v13346_v31 = vld [vmem:[%s14086_s21 + $0x518] sm:$0xff] }
 0x116   : > { %2116 = vmatmul.bf16.gmra.mxu0 %v9256_v57  ;;  %v13365_v57 = vld [vmem:[%s14086_s21 + $0x5b0] sm:$0xff] }
 0x117   : > { %2144 = vmatmul.bf16.gmra.mxu1 %v9260_v59  ;;  %v1511_v59 = vunpack.c.h.b16 %v9058_v49  ;;  %3175 = vmatpush.bf16.msrb.mxu2 %v13365_v57  ;;  %v13371_v49 = vld [vmem:[%s14086_s21 + $0x5e0] sm:$0xff] }
 0x118   : > { %2172 = vmatmul.bf16.gmra.mxu2 %v9264_v62  ;;  %v1512_v62 = vunpack.c.l.b16 %v14430_v50 }
 0x119   : > { %2200 = vmatmul.bf16.gmra.mxu3 %v9268_v0  ;;  %v13373_v0 = vld [vmem:[%s14086_s21 + $0x5f0] sm:$0xff]  ;;  %v1547_v12 = vpack.c.b16 %v1511_v59, %v1511_v59 }
 0x11a   : > { %3203 = vmatpush.bf16.msrb.mxu3 %v13373_v0  ;;  %v1548_v13 = vpack.c.b16 %v1512_v62, %v1512_v62  ;;  %v9790_v0 = vor.u32 %v13304_v52, %v9789_v44  ;;  %v9825_v44 = vld [vmem:[%s14126_s23 + $0x240] sm:$0xf]  ;;  %v13309_v52 = vld [vmem:[%s14126_s23 + $0x244] sm:$0xf] }
 0x11b   : > { %v14388_v6 = vpop.f32.mrf.mxu2  ;;  %v14392_v8 = vpop.f32.mrf.mxu0  ;;  %3176 = vmatpush.bf16.msrb.mxu2 %v13364_v16  ;;  %v13370_v16 = vld [vmem:[%s14086_s21 + $0x5d8] sm:$0xff] }
 0x11c   : > { %v14390_v7 = vpop.f32.mrf.mxu3  ;;  %v14394_v9 = vpop.f32.mrf.mxu1 }
 0x11e   : > { %3204 = vmatpush.bf16.msrb.mxu3 %v13372_v17  ;;  %v1104_v17 = vadd.f32 %v14380_v60, %v14296_v5 }
 0x120   : > { %v1132_v5 = vadd.f32 %v14382_v61, %v1104_v17  ;;  %v1106_v61 = vadd.f32 %v14392_v8, %v14312_v30  ;;  %v9826_v8 = vor.u32 %v13313_v51, %v9825_v44  ;;  %v13351_v51 = vld [vmem:[%s14086_s21 + $0x540] sm:$0xff] }
 0x122   : > { %3205 = vmatpush.bf16.msrb.mxu3 %v13371_v49  ;;  %v1160_v29 = vadd.f32 %v14388_v6, %v1132_v5  ;;  %v13369_v49 = vld [vmem:[%s14086_s21 + $0x5d0] sm:$0xff]  ;;  %v9305_v5 = vld [vmem:[%s14126_s23 + $0x1c8] sm:$0xf0] }
 0x123   : > { %v14408_v23 = vpop.f32.mrf.mxu2  ;;  %v14414_v32 = vpop.f32.mrf.mxu0 }
 0x124   : > { %v14410_v24 = vpop.f32.mrf.mxu3  ;;  %v14416_v33 = vpop.f32.mrf.mxu1  ;;  %v1188_v6 = vadd.f32 %v14390_v7, %v1160_v29  ;;  %v13322_v29 = vld [vmem:[%s14126_s23 + $0x2a8] sm:$0xf0] }
 0x126   : > { %2121 = vmatmul.bf16.gmra.mxu0 %v9292_v25  ;;  %v9233_v25 = vld [vmem:[%s14126_s23 + $0x138] sm:$0xf0]  ;;  %3206 = vmatpush.bf16.msrb.mxu3 %v13370_v16 }
 0x127   : > { %2149 = vmatmul.bf16.gmra.mxu1 %v9296_v26  ;;  %v9239_v26 = vld [vmem:[%s14126_s23 + $0x11c] sm:$0xf]  ;;  %v9236_v59 = vor.u32 %v13204_v27, %v9233_v25  ;;  %v13213_v25 = vld [vmem:[%s14126_s23 + $0x160] sm:$0xf] }
 0x128   : > { %2177 = vmatmul.bf16.gmra.mxu2 %v9300_v34  ;;  %v13356_v34 = vld [vmem:[%s14086_s21 + $0x568] sm:$0xff]  ;;  %v9240_v62 = vor.u32 %v13209_v41, %v9239_v26  ;;  %v9269_v26 = vld [vmem:[%s14126_s23 + $0x180] sm:$0xf0] }
 0x129   : > { %2205 = vmatmul.bf16.gmra.mxu3 %v9304_v36  ;;  %v13363_v36 = vld [vmem:[%s14086_s21 + $0x5a0] sm:$0xff]  ;;  %3148 = vmatpush.bf16.msrb.mxu1 %v13356_v34  ;;  %v13354_v34 = vld [vmem:[%s14086_s21 + $0x558] sm:$0xff]  ;;  %v13218_v41 = vld [vmem:[%s14126_s23 + $0x184] sm:$0xf0] }
 0x12a   : > { %3177 = vmatpush.bf16.msrb.mxu2 %v13363_v36  ;;  %v13361_v36 = vld [vmem:[%s14086_s21 + $0x590] sm:$0xff]  ;;  %3207 = vmatpush.bf16.msrb.mxu3 %v13369_v49 }
 0x12b   : > { %v14420_v45 = vpop.f32.mrf.mxu2  ;;  %v14424_v47 = vpop.f32.mrf.mxu0 }
 0x12c   : > { %v14422_v46 = vpop.f32.mrf.mxu3  ;;  %v14426_v48 = vpop.f32.mrf.mxu1 }
 0x12d   : > { %3149 = vmatpush.bf16.msrb.mxu1 %v13355_v14  ;;  %v1109_v14 = vadd.f32 %v14414_v32, %v14321_v43 }
 0x12e   : > { %3178 = vmatpush.bf16.msrb.mxu2 %v13362_v15 }
 0x12f   : > { %v1137_v43 = vadd.f32 %v14416_v33, %v1109_v14  ;;  %v9861_v33 = vld [vmem:[%s14126_s23 + $0x288] sm:$0xf]  ;;  %v13390_v14 = vld [vmem:[%s14086_s21 + $0x678] sm:$0xff] }
 0x131   : > { %3150 = vmatpush.bf16.msrb.mxu1 %v13354_v34  ;;  %v9863_v34 = vld [vmem:[%s14126_s23 + $0x2ac] sm:$0xf0] }
 0x132   : > { %3179 = vmatpush.bf16.msrb.mxu2 %v13361_v36 }
 0x133   : > { %v14438_v1 = vpop.f32.mrf.mxu2  ;;  %v14442_v4 = vpop.f32.mrf.mxu0 }
 0x134   : > { %v14440_v2 = vpop.f32.mrf.mxu3  ;;  %v14444_v11 = vpop.f32.mrf.mxu1 }
 0x136   : > { %2126 = vmatmul.bf16.gmra.mxu0 %v1545_v42  ;;  %v9794_v42 = vor.u32 %v13300_v53, %v9791_v54  ;;  %v9827_v53 = vld [vmem:[%s14126_s23 + $0x264] sm:$0xf0] }
 0x137   : > { %2154 = vmatmul.bf16.gmra.mxu1 %v1546_v3 }
 0x138   : > { %2182 = vmatmul.bf16.gmra.mxu2 %v1547_v12  ;;  %v1157_v12 = vadd.f32 %v14376_v55, %v1129_v38  ;;  %v13345_v38 = vld [vmem:[%s14086_s21 + $0x510] sm:$0xff] }
 0x139   : > { %2210 = vmatmul.bf16.gmra.mxu3 %v1548_v13  ;;  %v13347_v13 = vld [vmem:[%s14086_s21 + $0x520] sm:$0xff] }
 0x13a   : > { %3121 = vmatpush.bf16.msrb.mxu0 %v13347_v13  ;;  %v1185_v40 = vadd.f32 %v14378_v56, %v1157_v12  ;;  %v9275_v56 = vld [vmem:[%s14126_s23 + $0x164] sm:$0xf]  ;;  %v13360_v12 = vld [vmem:[%s14086_s21 + $0x588] sm:$0xff] }
 0x13b   : > { %v14452_v19 = vpop.f32.mrf.mxu2  ;;  %v1115_v21 = vpop.f32.mrf.mxu0  ;;  %v13368_v13 = vld [vmem:[%s14086_s21 + $0x5c8] sm:$0xff]  ;;  %3180 = vmatpush.bf16.msrb.mxu2 %v13360_v12 }
 0x13c   : > { %v14454_v20 = vpop.f32.mrf.mxu3  ;;  %v1143_v22 = vpop.f32.mrf.mxu1  ;;  %3208 = vmatpush.bf16.msrb.mxu3 %v13368_v13  ;;  %v13382_v13 = vld [vmem:[%s14086_s21 + $0x638] sm:$0xff] }
 0x13e   : > { %3122 = vmatpush.bf16.msrb.mxu0 %v13346_v31  ;;  %v13318_v31 = vld [vmem:[%s14126_s23 + $0x28c] sm:$0xf] }
 0x142   : > { %3123 = vmatpush.bf16.msrb.mxu0 %v13345_v38 }
 0x143   : > { %v1171_v37 = vpop.f32.mrf.mxu2  ;;  %v1210_v58 = vpop.f32.mrf.mxu0 }
 0x144   : > { %v1199_v57 = vpop.f32.mrf.mxu3  ;;  %v2028_v39 = vpop.f32.mrf.mxu1  ;;  %v1211_v3 = vadd.f32 %v1210_v58, %v1183_v28  ;;  %v9272_v37 = vor.u32 %v13213_v25, %v9269_v26  ;;  %v9830_v58 = vor.u32 %v13309_v52, %v9827_v53  ;;  %v9311_v25 = vld [vmem:[%s14126_s23 + $0x1ac] sm:$0xf]  ;;  %v13227_v26 = vld [vmem:[%s14126_s23 + $0x1cc] sm:$0xf0] }
 0x145   : > { %v9276_v57 = vor.u32 %v13218_v41, %v9275_v56  ;;  %v1111_v56 = vadd.f32 %v14424_v47, %v14328_v63  ;;  %v9312_v49 = vor.u32 %v13227_v26, %v9311_v25  ;;  %v9862_v63 = vor.u32 %v13322_v29, %v9861_v33  ;;  %v13431_v25 = vld [vmem:[%s14086_s21 + $0x6e8] sm:$0xff] }
 0x146   : > { %1229 = vst [vmem:[%s14477_s27] sm:$0xff] %v1211_v3  ;;  %2223 = vmatmul.bf16.vlgmr.msra.gmra.mxu0 %v9236_v59  ;;  %v13353_v3 = vld [vmem:[%s14086_s21 + $0x550] sm:$0xff]  ;;  %v9866_v47 = vor.u32 %v13318_v31, %v9863_v34 }
 0x147   : > { %2251 = vmatmul.bf16.vlgmr.msra.gmra.mxu1 %v9240_v62 }
 0x148   : > { %3070 = vmatmul.bf16.vlgmr.msra.gmra.mxu2 %v9790_v0  ;;  %3151 = vmatpush.bf16.msrb.mxu1 %v13353_v3  ;;  %v9638_v3 = vld [vmem:[%s14126_s23 + $0x2d0] sm:$0x11] }
 0x149   : > { %3098 = vmatmul.bf16.vlgmr.msra.gmra.mxu3 %v9794_v42 }
 0x14b   : > { %v2056_v55 = vpop.f32.mrf.mxu2  ;;  %v1212_v22 = vpop.f32.mrf.mxu0 }
 0x14c   : > { %v2084_v18 = vpop.f32.mrf.mxu3  ;;  %v2057_v21 = vadd.f32 %v2056_v55, %v2028_v39  ;;  %v2030_v35 = vpop.f32.mrf.mxu1  ;;  %v1213_v60 = vadd.f32 %v1212_v22, %v1185_v40  ;;  %v1134_v39 = vadd.f32 %v14394_v9, %v1106_v61  ;;  %v1165_v22 = vadd.f32 %v14420_v45, %v1137_v43  ;;  %v13343_v61 = vld [vmem:[%s14086_s21 + $0x500] sm:$0xff] }
 0x14e   : > { %v14490_v27 = vadd.f32 %v2084_v18, %v2057_v21  ;;  %1230 = vst [vmem:[%s14477_s27 + $0x8] sm:$0xff] %v1213_v60  ;;  %v1162_v7 = vadd.f32 %v14408_v23, %v1134_v39  ;;  %v13344_v18 = vld [vmem:[%s14086_s21 + $0x508] sm:$0xff]  ;;  %v13367_v60 = vld [vmem:[%s14086_s21 + $0x5c0] sm:$0xff]  ;;  %v1193_v45 = vadd.f32 %v14422_v46, %v1165_v22 }
 0x14f   : > { %v13352_v21 = vld [vmem:[%s14086_s21 + $0x548] sm:$0xff]  ;;  %3124 = vmatpush.bf16.msrb.mxu0 %v13344_v18  ;;  %3209 = vmatpush.bf16.msrb.mxu3 %v13367_v60 }
 0x150   : > { %v1190_v9 = vadd.f32 %v14410_v24, %v1162_v7  ;;  %v13359_v24 = vld [vmem:[%s14086_s21 + $0x580] sm:$0xff]  ;;  %3152 = vmatpush.bf16.msrb.mxu1 %v13352_v21  ;;  %v13396_v60 = vld [vmem:[%s14086_s21 + $0x6a8] sm:$0xff] }
 0x151   : > { %3181 = vmatpush.bf16.msrb.mxu2 %v13359_v24 }
 0x153   : > { %v2058_v54 = vpop.f32.mrf.mxu2  ;;  %v1215_v62 = vpop.f32.mrf.mxu0  ;;  %3125 = vmatpush.bf16.msrb.mxu0 %v13343_v61  ;;  %v13395_v61 = vld [vmem:[%s14086_s21 + $0x6a0] sm:$0xff] }
 0x154   : > { %v2086_v28 = vpop.f32.mrf.mxu3  ;;  %v2059_v59 = vadd.f32 %v2058_v54, %v2030_v35  ;;  %v2033_v30 = vpop.f32.mrf.mxu1  ;;  %v1216_v0 = vadd.f32 %v1215_v62, %v1188_v6  ;;  %v13222_v35 = vld [vmem:[%s14126_s23 + $0x1a8] sm:$0xf]  ;;  %v1139_v54 = vadd.f32 %v14426_v48, %v1111_v56  ;;  %3153 = vmatpush.bf16.msrb.mxu1 %v13351_v51  ;;  %v1114_v48 = vadd.f32 %v14442_v4, %v14334_v10 }
 0x155   : > { %v9308_v44 = vor.u32 %v13222_v35, %v9305_v5  ;;  %v13381_v5 = vld [vmem:[%s14086_s21 + $0x630] sm:$0xff]  ;;  %v9799_v51 = vld [vmem:[%s14126_s23 + $0x224] sm:$0xf0] }
 0x156   : > { %v14510_v42 = vadd.f32 %v2086_v28, %v2059_v59  ;;  %1231 = vst [vmem:[%s14477_s27 + $0x10] sm:$0xff] %v1216_v0  ;;  %2228 = vmatmul.bf16.gmra.mxu0 %v9272_v37  ;;  %v1167_v37 = vadd.f32 %v14438_v1, %v1139_v54  ;;  %v13433_v59 = vld [vmem:[%s14086_s21 + $0x6f8] sm:$0xff]  ;;  %v9060_v0 = vld [vmem:[%s14126_s23 + $0x1f4] sm:$0x1]  ;;  %v1142_v7 = vadd.f32 %v14444_v11, %v1114_v48 }
 0x157   : > { %2256 = vmatmul.bf16.gmra.mxu1 %v9276_v57  ;;  %v13398_v57 = vld [vmem:[%s14086_s21 + $0x6b8] sm:$0xff]  ;;  %4105 = vmatpush.bf16.msra.mxu3 %v13433_v59  ;;  %v1514_v4 = vunpack.c.l.b16 %v9060_v0 }
 0x158   : > { %3075 = vmatmul.bf16.gmra.mxu2 %v9826_v8  ;;  %v1195_v62 = vadd.f32 %v14440_v2, %v1167_v37  ;;  %v1170_v10 = vadd.f32 %v14452_v19, %v1142_v7  ;;  %v1513_v2 = vunpack.c.h.b16 %v14430_v50  ;;  %3230 = vmatpush.bf16.msra.mxu0 %v13382_v13  ;;  %v13378_v13 = vld [vmem:[%s14086_s21 + $0x618] sm:$0xff] }
 0x159   : > { %3103 = vmatmul.bf16.gmra.mxu3 %v9830_v58  ;;  %3286 = vmatpush.bf16.msra.mxu2 %v13398_v57  ;;  %v1550_v50 = vpack.c.b16 %v1514_v4, %v1514_v4  ;;  %v13310_v4 = vld [vmem:[%s14126_s23 + $0x24c] sm:$0xf] }
 0x15a   : > { %3258 = vmatpush.bf16.msra.mxu1 %v13390_v14  ;;  %v1198_v11 = vadd.f32 %v14454_v20, %v1170_v10  ;;  %v13389_v20 = vld [vmem:[%s14086_s21 + $0x670] sm:$0xff]  ;;  %v9833_v10 = vld [vmem:[%s14126_s23 + $0x248] sm:$0xf]  ;;  %v13386_v14 = vld [vmem:[%s14086_s21 + $0x658] sm:$0xff] }
 0x15b   : > { %v2061_v23 = vpop.f32.mrf.mxu2  ;;  %v1217_v17 = vpop.f32.mrf.mxu0 }
 0x15c   : > { %v2089_v15 = vpop.f32.mrf.mxu3  ;;  %v2062_v16 = vadd.f32 %v2061_v23, %v2033_v30  ;;  %v2035_v40 = vpop.f32.mrf.mxu1  ;;  %v1218_v32 = vadd.f32 %v1217_v17, %v1190_v9  ;;  %v13397_v9 = vld [vmem:[%s14086_s21 + $0x6b0] sm:$0xff]  ;;  %v2549_v23 = vunpack.c.l.b16 %v9638_v3  ;;  %3231 = vmatpush.bf16.msra.mxu0 %v13381_v5 }
 0x15d   : > { %3287 = vmatpush.bf16.msra.mxu2 %v13397_v9  ;;  %v13393_v9 = vld [vmem:[%s14086_s21 + $0x690] sm:$0xff] }
 0x15e   : > { %v14522_v55 = vadd.f32 %v2089_v15, %v2062_v16  ;;  %1232 = vst [vmem:[%s14477_s27 + $0x18] sm:$0xff] %v1218_v32  ;;  %v2550_v15 = vunpack.c.h.b16 %v9638_v3  ;;  %v13432_v16 = vld [vmem:[%s14086_s21 + $0x6f0] sm:$0xff]  ;;  %v2585_v21 = vpack.c.b16 %v2549_v23, %v2549_v23  ;;  %3259 = vmatpush.bf16.msra.mxu1 %v13389_v20 }
 0x15f   : > { %4106 = vmatpush.bf16.msra.mxu3 %v13432_v16  ;;  %v9835_v23 = vld [vmem:[%s14126_s23 + $0x26c] sm:$0xf0] }
 0x160   : > { %v2586_v24 = vpack.c.b16 %v2550_v15, %v2550_v15  ;;  %v9841_v15 = vld [vmem:[%s14126_s23 + $0x250] sm:$0xf] }
 0x161   : > { %3288 = vmatpush.bf16.msra.mxu2 %v13396_v60  ;;  %v13428_v16 = vld [vmem:[%s14086_s21 + $0x6d0] sm:$0xff]  ;;  %v13392_v60 = vld [vmem:[%s14086_s21 + $0x688] sm:$0xff] }
 0x162   : > { %v13377_v5 = vld [vmem:[%s14086_s21 + $0x610] sm:$0xff] }
 0x163   : > { %v2063_v36 = vpop.f32.mrf.mxu2  ;;  %v1220_v53 = vpop.f32.mrf.mxu0  ;;  %4107 = vmatpush.bf16.msra.mxu3 %v13431_v25  ;;  %v13385_v20 = vld [vmem:[%s14086_s21 + $0x650] sm:$0xff]  ;;  %v13427_v25 = vld [vmem:[%s14086_s21 + $0x6c8] sm:$0xff] }
 0x164   : > { %v2091_v41 = vpop.f32.mrf.mxu3  ;;  %v2064_v52 = vadd.f32 %v2063_v36, %v2035_v40  ;;  %v2038_v6 = vpop.f32.mrf.mxu1  ;;  %v1221_v28 = vadd.f32 %v1220_v53, %v1193_v45  ;;  %v1549_v40 = vpack.c.b16 %v1513_v2, %v1513_v2  ;;  %v9797_v45 = vld [vmem:[%s14126_s23 + $0x200] sm:$0xf]  ;;  %v13305_v36 = vld [vmem:[%s14126_s23 + $0x220] sm:$0xf0]  ;;  %v13314_v2 = vld [vmem:[%s14126_s23 + $0x268] sm:$0xf0] }
 0x165   : > { %v13430_v53 = vld [vmem:[%s14086_s21 + $0x6e0] sm:$0xff]  ;;  %3289 = vmatpush.bf16.msra.mxu2 %v13395_v61  ;;  %v9798_v37 = vor.u32 %v13305_v36, %v9797_v45  ;;  %v13384_v45 = vld [vmem:[%s14086_s21 + $0x648] sm:$0xff]  ;;  %v13319_v61 = vld [vmem:[%s14126_s23 + $0x294] sm:$0xf] }
 0x166   : > { %v14544_v46 = vadd.f32 %v2091_v41, %v2064_v52  ;;  %1233 = vst [vmem:[%s14477_s27 + $0x20] sm:$0xff] %v1221_v28  ;;  %2233 = vmatmul.bf16.gmra.mxu0 %v9308_v44  ;;  %v13301_v41 = vld [vmem:[%s14126_s23 + $0x204] sm:$0xf]  ;;  %v13380_v44 = vld [vmem:[%s14086_s21 + $0x628] sm:$0xff] }
 0x167   : > { %2261 = vmatmul.bf16.gmra.mxu1 %v9312_v49  ;;  %v13388_v49 = vld [vmem:[%s14086_s21 + $0x668] sm:$0xff]  ;;  %3232 = vmatpush.bf16.msra.mxu0 %v13380_v44  ;;  %v9802_v57 = vor.u32 %v13301_v41, %v9799_v51  ;;  %v13391_v36 = vld [vmem:[%s14086_s21 + $0x680] sm:$0xff]  ;;  %v9869_v41 = vld [vmem:[%s14126_s23 + $0x290] sm:$0xf] }
 0x168   : > { %3080 = vmatmul.bf16.gmra.mxu2 %v9862_v63  ;;  %v9805_v52 = vld [vmem:[%s14126_s23 + $0x208] sm:$0xf]  ;;  %v13302_v63 = vld [vmem:[%s14126_s23 + $0x20c] sm:$0xf]  ;;  %3260 = vmatpush.bf16.msra.mxu1 %v13388_v49  ;;  %v13323_v44 = vld [vmem:[%s14126_s23 + $0x2b0] sm:$0xf0] }
 0x169   : > { %3108 = vmatmul.bf16.gmra.mxu3 %v9866_v47  ;;  %v9807_v47 = vld [vmem:[%s14126_s23 + $0x22c] sm:$0xf0]  ;;  %v13426_v49 = vld [vmem:[%s14086_s21 + $0x6c0] sm:$0xff]  ;;  %v9871_v51 = vld [vmem:[%s14126_s23 + $0x2b4] sm:$0xf0] }
 0x16a   : > { %4108 = vmatpush.bf16.msra.mxu3 %v13430_v53  ;;  %v13324_v53 = vld [vmem:[%s14126_s23 + $0x2b8] sm:$0xf0] }
 0x16b   : > { %v2066_v1 = vpop.f32.mrf.mxu2  ;;  %v1222_v58 = vpop.f32.mrf.mxu0 }
 0x16c   : > { %v2094_v30 = vpop.f32.mrf.mxu3  ;;  %v2067_v8 = vadd.f32 %v2066_v1, %v2038_v6  ;;  %v2040_v39 = vpop.f32.mrf.mxu1  ;;  %v1223_v38 = vadd.f32 %v1222_v58, %v1195_v62  ;;  %v13306_v6 = vld [vmem:[%s14126_s23 + $0x228] sm:$0xf0]  ;;  %v9810_v1 = vor.u32 %v13302_v63, %v9807_v47  ;;  %v13394_v58 = vld [vmem:[%s14086_s21 + $0x698] sm:$0xff]  ;;  %v9879_v63 = vld [vmem:[%s14126_s23 + $0x2bc] sm:$0xf0] }
 0x16d   : > { %v9806_v62 = vor.u32 %v13306_v6, %v9805_v52  ;;  %3290 = vmatpush.bf16.msra.mxu2 %v13394_v58  ;;  %v9877_v52 = vld [vmem:[%s14126_s23 + $0x298] sm:$0xf]  ;;  %v13320_v6 = vld [vmem:[%s14126_s23 + $0x29c] sm:$0xf] }
 0x16e   : > { %v14556_v12 = vadd.f32 %v2094_v30, %v2067_v8  ;;  %1234 = vst [vmem:[%s14477_s27 + $0x28] sm:$0xff] %v1223_v38  ;;  %v13379_v30 = vld [vmem:[%s14086_s21 + $0x620] sm:$0xff]  ;;  %v9882_v58 = vor.u32 %v13320_v6, %v9879_v63  ;;  %v9813_v63 = vld [vmem:[%s14126_s23 + $0x210] sm:$0xf] }
 0x16f   : > { %v13387_v8 = vld [vmem:[%s14086_s21 + $0x660] sm:$0xff]  ;;  %3233 = vmatpush.bf16.msra.mxu0 %v13379_v30 }
 0x170   : > { %3261 = vmatpush.bf16.msra.mxu1 %v13387_v8  ;;  %v9878_v8 = vor.u32 %v13324_v53, %v9877_v52 }
 0x171   : > { %3291 = vmatpush.bf16.msra.mxu2 %v13393_v9  ;;  %v9639_v9 = vld [vmem:[%s14126_s23 + $0x2d8] sm:$0x11] }
 0x173   : > { %v2068_v19 = vpop.f32.mrf.mxu2  ;;  %v1225_v32 = vpop.f32.mrf.mxu0  ;;  %3234 = vmatpush.bf16.msra.mxu0 %v13378_v13 }
 0x174   : > { %v2096_v17 = vpop.f32.mrf.mxu3  ;;  %v2069_v43 = vadd.f32 %v2068_v19, %v2040_v39  ;;  %v2043_v18 = vpop.f32.mrf.mxu1  ;;  %v1226_v22 = vadd.f32 %v1225_v32, %v1198_v11  ;;  %v13429_v39 = vld [vmem:[%s14086_s21 + $0x6d8] sm:$0xff]  ;;  %v13315_v11 = vld [vmem:[%s14126_s23 + $0x270] sm:$0xf0]  ;;  %3262 = vmatpush.bf16.msra.mxu1 %v13386_v14  ;;  %v9838_v32 = vor.u32 %v13310_v4, %v9835_v23  ;;  %v9640_v23 = vld [vmem:[%s14126_s23 + $0x2e0] sm:$0x11] }
 0x175   : > { %4109 = vmatpush.bf16.msra.mxu3 %v13429_v39  ;;  %v13311_v19 = vld [vmem:[%s14126_s23 + $0x254] sm:$0xf]  ;;  %3292 = vmatpush.bf16.msra.mxu2 %v13392_v60  ;;  %v13457_v39 = vld [vmem:[%s14086_s21 + $0x7b8] sm:$0xff] }
 0x176   : > { %v14566_v35 = vadd.f32 %v2096_v17, %v2069_v43  ;;  %1235 = vst [vmem:[%s14477_s27 + $0x30] sm:$0x1] %v1226_v22  ;;  %2238 = vmatmul.bf16.gmra.mxu0 %v1549_v40  ;;  %v9843_v17 = vld [vmem:[%s14126_s23 + $0x274] sm:$0xf0]  ;;  %v9834_v43 = vor.u32 %v13314_v2, %v9833_v10 }
 0x177   : > { %2266 = vmatmul.bf16.gmra.mxu1 %v1550_v50  ;;  %v9846_v22 = vor.u32 %v13311_v19, %v9843_v17  ;;  %3235 = vmatpush.bf16.msra.mxu0 %v13377_v5  ;;  %v13465_v10 = vld [vmem:[%s14086_s21 + $0x7f8] sm:$0xff]  ;;  %v2554_v19 = vunpack.c.h.b16 %v9640_v23 }
 0x178   : > { %3085 = vmatmul.bf16.gmra.mxu2 %v2585_v21  ;;  %3263 = vmatpush.bf16.msra.mxu1 %v13385_v20  ;;  %v13441_v17 = vld [vmem:[%s14086_s21 + $0x738] sm:$0xff] }
 0x179   : > { %3113 = vmatmul.bf16.gmra.mxu3 %v2586_v24  ;;  %v9842_v24 = vor.u32 %v13315_v11, %v9841_v15  ;;  %3293 = vmatpush.bf16.msra.mxu2 %v13391_v36  ;;  %v2551_v15 = vunpack.c.l.b16 %v9639_v9  ;;  %v2553_v11 = vunpack.c.l.b16 %v9640_v23  ;;  %v2590_v36 = vpack.c.b16 %v2554_v19, %v2554_v19  ;;  %v13439_v23 = vld [vmem:[%s14086_s21 + $0x728] sm:$0xff] }
 0x17a   : > { %4110 = vmatpush.bf16.msra.mxu3 %v13428_v16  ;;  %v2552_v16 = vunpack.c.h.b16 %v9639_v9 }
 0x17b   : > { %v2071_v26 = vpop.f32.mrf.mxu2  ;;  %v1227_v29 = vpop.f32.mrf.mxu0  ;;  %v2587_v20 = vpack.c.b16 %v2551_v15, %v2551_v15  ;;  %v13447_v15 = vld [vmem:[%s14086_s21 + $0x768] sm:$0xff] }
 0x17c   : > { %v2099_v33 = vpop.f32.mrf.mxu3  ;;  %v2072_v56 = vadd.f32 %v2071_v26, %v2043_v18  ;;  %v2045_v31 = vpop.f32.mrf.mxu1  ;;  %3264 = vmatpush.bf16.msra.mxu1 %v13384_v45  ;;  %v2588_v60 = vpack.c.b16 %v2552_v16, %v2552_v16  ;;  %v2589_v45 = vpack.c.b16 %v2553_v11, %v2553_v11  ;;  %v13454_v16 = vld [vmem:[%s14086_s21 + $0x7a0] sm:$0xff] }
 0x17d   : > { %v13376_v31 = vld [vmem:[%s14086_s21 + $0x608] sm:$0xff]  ;;  %v13462_v11 = vld [vmem:[%s14086_s21 + $0x7e0] sm:$0xff] }
 0x17e   : > { %v14573_v34 = vadd.f32 %v2099_v33, %v2072_v56  ;;  %4111 = vmatpush.bf16.msra.mxu3 %v13427_v25  ;;  %3236 = vmatpush.bf16.msra.mxu0 %v13376_v31 }
 0x182   : > { %4112 = vmatpush.bf16.msra.mxu3 %v13426_v49  ;;  %v13448_v49 = vld [vmem:[%s14086_s21 + $0x770] sm:$0xff] }
 0x183   : > { %v2073_v54 = vpop.f32.mrf.mxu2  ;;  %v14587_v59 = vpop.f32.mrf.mxu0 }
 0x184   : > { %v2101_v28 = vpop.f32.mrf.mxu3  ;;  %v14589_v48 = vpop.f32.mrf.mxu1 }
 0x185   : > { %v9870_v28 = vor.u32 %v13323_v44, %v9869_v41  ;;  %v2113_v41 = vadd.f32 %v14587_v59, %v14490_v27  ;;  %v13440_v44 = vld [vmem:[%s14086_s21 + $0x730] sm:$0xff] }
 0x186   : > { %3126 = vmatmul.bf16.vlgmr.msrb.gmra.mxu0 %v9798_v37  ;;  %v9874_v37 = vor.u32 %v13319_v61, %v9871_v51  ;;  %v13455_v61 = vld [vmem:[%s14086_s21 + $0x7a8] sm:$0xff] }
 0x187   : > { %3154 = vmatmul.bf16.vlgmr.msrb.gmra.mxu1 %v9802_v57  ;;  %v13375_v57 = vld [vmem:[%s14086_s21 + $0x600] sm:$0xff]  ;;  %v13463_v51 = vld [vmem:[%s14086_s21 + $0x7e8] sm:$0xff]  ;;  %v2141_v59 = vadd.f32 %v14589_v48, %v2113_v41 }
 0x188   : > { %3182 = vmatmul.bf16.vlgmr.msrb.gmra.mxu2 %v9806_v62  ;;  %v13383_v62 = vld [vmem:[%s14086_s21 + $0x640] sm:$0xff]  ;;  %3237 = vmatpush.bf16.msra.mxu0 %v13375_v57  ;;  %v13303_v57 = vld [vmem:[%s14126_s23 + $0x214] sm:$0xf] }
 0x189   : > { %3210 = vmatmul.bf16.vlgmr.msrb.gmra.mxu3 %v9810_v1  ;;  %3265 = vmatpush.bf16.msra.mxu1 %v13383_v62  ;;  %v9815_v62 = vld [vmem:[%s14126_s23 + $0x234] sm:$0xf0]  ;;  %v13438_v41 = vld [vmem:[%s14086_s21 + $0x720] sm:$0xff] }
 0x18a   : > { %4189 = vmatpush.bf16.msrb.mxu2 %v13457_v39  ;;  %4217 = vmatpush.bf16.msrb.mxu3 %v13465_v10  ;;  %v10371_v39 = vld [vmem:[%s14126_s23 + $0x2f4] sm:$0xf]  ;;  %v13403_v10 = vld [vmem:[%s14126_s23 + $0x314] sm:$0xf0] }
 0x18b   : > { %v14595_v0 = vpop.f32.mrf.mxu2  ;;  %v14599_v38 = vpop.f32.mrf.mxu0 }
 0x18c   : > { %v14597_v7 = vpop.f32.mrf.mxu3  ;;  %v14601_v3 = vpop.f32.mrf.mxu1  ;;  %4133 = vmatpush.bf16.msrb.mxu0 %v13441_v17  ;;  %v2115_v9 = vadd.f32 %v14599_v38, %v14510_v42  ;;  %v10372_v42 = vor.u32 %v13403_v10, %v10371_v39  ;;  %v10407_v39 = vld [vmem:[%s14126_s23 + $0x33c] sm:$0xf]  ;;  %v13412_v10 = vld [vmem:[%s14126_s23 + $0x35c] sm:$0xf0] }
 0x18e   : > { %v2143_v38 = vadd.f32 %v14601_v3, %v2115_v9 }
 0x190   : > { %4134 = vmatpush.bf16.msrb.mxu0 %v13440_v44  ;;  %v13446_v44 = vld [vmem:[%s14086_s21 + $0x760] sm:$0xff] }
 0x193   : > { %v14615_v40 = vpop.f32.mrf.mxu2  ;;  %v14619_v18 = vpop.f32.mrf.mxu0 }
 0x194   : > { %v14617_v50 = vpop.f32.mrf.mxu3  ;;  %v14621_v21 = vpop.f32.mrf.mxu1  ;;  %4135 = vmatpush.bf16.msrb.mxu0 %v13439_v23  ;;  %v13437_v23 = vld [vmem:[%s14086_s21 + $0x718] sm:$0xff] }
 0x196   : > { %3131 = vmatmul.bf16.gmra.mxu0 %v9834_v43  ;;  %v13449_v43 = vld [vmem:[%s14086_s21 + $0x778] sm:$0xff] }
 0x197   : > { %3159 = vmatmul.bf16.gmra.mxu1 %v9838_v32  ;;  %v13456_v32 = vld [vmem:[%s14086_s21 + $0x7b0] sm:$0xff] }
 0x198   : > { %3187 = vmatmul.bf16.gmra.mxu2 %v9842_v24  ;;  %v13464_v24 = vld [vmem:[%s14086_s21 + $0x7f0] sm:$0xff]  ;;  %4161 = vmatpush.bf16.msrb.mxu1 %v13449_v43 }
 0x199   : > { %3215 = vmatmul.bf16.gmra.mxu3 %v9846_v22  ;;  %4190 = vmatpush.bf16.msrb.mxu2 %v13456_v32  ;;  %v9818_v32 = vor.u32 %v13303_v57, %v9815_v62  ;;  %v13312_v57 = vld [vmem:[%s14126_s23 + $0x25c] sm:$0xf]  ;;  %v9851_v62 = vld [vmem:[%s14126_s23 + $0x27c] sm:$0xf0] }
 0x19a   : > { %4218 = vmatpush.bf16.msrb.mxu3 %v13464_v24  ;;  %4136 = vmatpush.bf16.msrb.mxu0 %v13438_v41 }
 0x19b   : > { %v14627_v26 = vpop.f32.mrf.mxu2  ;;  %v14631_v56 = vpop.f32.mrf.mxu0 }
 0x19c   : > { %v14629_v33 = vpop.f32.mrf.mxu3  ;;  %v14633_v29 = vpop.f32.mrf.mxu1  ;;  %4162 = vmatpush.bf16.msrb.mxu1 %v13448_v49  ;;  %v13453_v49 = vld [vmem:[%s14086_s21 + $0x798] sm:$0xff]  ;;  %v2120_v9 = vadd.f32 %v14631_v56, %v14544_v46  ;;  %v10408_v56 = vor.u32 %v13412_v10, %v10407_v39 }
 0x19d   : > { %4191 = vmatpush.bf16.msrb.mxu2 %v13455_v61  ;;  %v13461_v61 = vld [vmem:[%s14086_s21 + $0x7d8] sm:$0xff] }
 0x19e   : > { %4219 = vmatpush.bf16.msrb.mxu3 %v13463_v51  ;;  %4137 = vmatpush.bf16.msrb.mxu0 %v13437_v23  ;;  %v13442_v23 = vld [vmem:[%s14086_s21 + $0x740] sm:$0xff] }
 0x1a0   : > { %4163 = vmatpush.bf16.msrb.mxu1 %v13447_v15  ;;  %v13452_v15 = vld [vmem:[%s14086_s21 + $0x790] sm:$0xff] }
 0x1a1   : > { %4192 = vmatpush.bf16.msrb.mxu2 %v13454_v16  ;;  %v13460_v16 = vld [vmem:[%s14086_s21 + $0x7d0] sm:$0xff] }
 0x1a2   : > { %4220 = vmatpush.bf16.msrb.mxu3 %v13462_v11 }
 0x1a3   : > { %v14647_v47 = vpop.f32.mrf.mxu2  ;;  %v14653_v1 = vpop.f32.mrf.mxu0 }
 0x1a4   : > { %v14649_v54 = vpop.f32.mrf.mxu3  ;;  %v14655_v30 = vpop.f32.mrf.mxu1  ;;  %4164 = vmatpush.bf16.msrb.mxu1 %v13446_v44 }
 0x1a5   : > { %4193 = vmatpush.bf16.msrb.mxu2 %v13453_v49  ;;  %v13435_v49 = vld [vmem:[%s14086_s21 + $0x708] sm:$0xff] }
 0x1a6   : > { %3136 = vmatmul.bf16.gmra.mxu0 %v9870_v28  ;;  %v13307_v28 = vld [vmem:[%s14126_s23 + $0x230] sm:$0xf0]  ;;  %4221 = vmatpush.bf16.msrb.mxu3 %v13461_v61  ;;  %v13443_v61 = vld [vmem:[%s14086_s21 + $0x748] sm:$0xff] }
 0x1a7   : > { %3164 = vmatmul.bf16.gmra.mxu1 %v9874_v37  ;;  %v2169_v37 = vadd.f32 %v14595_v0, %v2141_v59  ;;  %v9814_v43 = vor.u32 %v13307_v28, %v9813_v63  ;;  %v9849_v59 = vld [vmem:[%s14126_s23 + $0x258] sm:$0xf]  ;;  %v13316_v63 = vld [vmem:[%s14126_s23 + $0x278] sm:$0xf0] }
 0x1a8   : > { %3192 = vmatmul.bf16.gmra.mxu2 %v9878_v8  ;;  %v9821_v8 = vld [vmem:[%s14126_s23 + $0x218] sm:$0xf] }
 0x1a9   : > { %3220 = vmatmul.bf16.gmra.mxu3 %v9882_v58  ;;  %v13308_v58 = vld [vmem:[%s14126_s23 + $0x238] sm:$0xf0]  ;;  %v2197_v19 = vadd.f32 %v14597_v7, %v2169_v37  ;;  %4194 = vmatpush.bf16.msrb.mxu2 %v13452_v15 }
 0x1aa   : > { %4222 = vmatpush.bf16.msrb.mxu3 %v13460_v16 }
 0x1ab   : > { %v14659_v2 = vpop.f32.mrf.mxu2  ;;  %v14663_v13 = vpop.f32.mrf.mxu0 }
 0x1ac   : > { %v14661_v4 = vpop.f32.mrf.mxu3  ;;  %v14665_v14 = vpop.f32.mrf.mxu1 }
 0x1b3   : > { %v14673_v22 = vpop.f32.mrf.mxu2  ;;  %v14677_v25 = vpop.f32.mrf.mxu0 }
 0x1b4   : > { %v14675_v5 = vpop.f32.mrf.mxu3  ;;  %v14679_v31 = vpop.f32.mrf.mxu1 }
 0x1b6   : > { %3141 = vmatmul.bf16.gmra.mxu0 %v2587_v20  ;;  %v9822_v20 = vor.u32 %v13308_v58, %v9821_v8  ;;  %v9857_v8 = vld [vmem:[%s14126_s23 + $0x260] sm:$0xf]  ;;  %v13317_v58 = vld [vmem:[%s14126_s23 + $0x280] sm:$0xf0] }
 0x1b7   : > { %3169 = vmatmul.bf16.gmra.mxu1 %v2588_v60  ;;  %v2171_v60 = vadd.f32 %v14615_v40, %v2143_v38  ;;  %v9858_v46 = vor.u32 %v13317_v58, %v9857_v8  ;;  %v2123_v38 = vadd.f32 %v14653_v1, %v14556_v12 }
 0x1b8   : > { %3197 = vmatmul.bf16.gmra.mxu2 %v2589_v45 }
 0x1b9   : > { %3225 = vmatmul.bf16.gmra.mxu3 %v2590_v36  ;;  %v2118_v36 = vadd.f32 %v14619_v18, %v14522_v55  ;;  %v2199_v3 = vadd.f32 %v14617_v50, %v2171_v60  ;;  %v13444_v60 = vld [vmem:[%s14086_s21 + $0x750] sm:$0xff] }
 0x1bb   : > { %v14687_v52 = vpop.f32.mrf.mxu2  ;;  %v2129_v6 = vpop.f32.mrf.mxu0  ;;  %v2146_v50 = vadd.f32 %v14621_v21, %v2118_v36  ;;  %v13445_v21 = vld [vmem:[%s14086_s21 + $0x758] sm:$0xff]  ;;  %v13459_v36 = vld [vmem:[%s14086_s21 + $0x7c8] sm:$0xff] }
 0x1bc   : > { %v14689_v53 = vpop.f32.mrf.mxu3  ;;  %v2157_v27 = vpop.f32.mrf.mxu1  ;;  %4165 = vmatpush.bf16.msrb.mxu1 %v13445_v21  ;;  %4223 = vmatpush.bf16.msrb.mxu3 %v13459_v36  ;;  %v13481_v36 = vld [vmem:[%s14086_s21 + $0x878] sm:$0xff] }
 0x1bd   : > { %v2174_v28 = vadd.f32 %v14627_v26, %v2146_v50  ;;  %v9850_v26 = vor.u32 %v13316_v63, %v9849_v59  ;;  %v9885_v50 = vld [vmem:[%s14126_s23 + $0x2a0] sm:$0xf]  ;;  %v13321_v59 = vld [vmem:[%s14126_s23 + $0x2a4] sm:$0xf]  ;;  %v9887_v63 = vld [vmem:[%s14126_s23 + $0x2c4] sm:$0xf0] }
 0x1be   : > { %v9890_v10 = vor.u32 %v13321_v59, %v9887_v63  ;;  %v13487_v59 = vld [vmem:[%s14086_s21 + $0x8a8] sm:$0xff] }
 0x1bf   : > { %v2202_v11 = vadd.f32 %v14629_v33, %v2174_v28  ;;  %v2148_v33 = vadd.f32 %v14633_v29, %v2120_v9  ;;  %v9893_v28 = vld [vmem:[%s14126_s23 + $0x2a8] sm:$0xf]  ;;  %v13434_v9 = vld [vmem:[%s14086_s21 + $0x700] sm:$0xff] }
 0x1c0   : > { %4166 = vmatpush.bf16.msrb.mxu1 %v13444_v60  ;;  %v13495_v63 = vld [vmem:[%s14086_s21 + $0x8e8] sm:$0xff] }
 0x1c3   : > { %v2185_v48 = vpop.f32.mrf.mxu2  ;;  %v2224_v0 = vpop.f32.mrf.mxu0 }
 0x1c4   : > { %v2213_v17 = vpop.f32.mrf.mxu3  ;;  %v2252_v24 = vpop.f32.mrf.mxu1  ;;  %v2225_v7 = vadd.f32 %v2224_v0, %v2197_v19  ;;  %4167 = vmatpush.bf16.msrb.mxu1 %v13443_v61 }
 0x1c5   : > { %v9854_v17 = vor.u32 %v13312_v57, %v9851_v62  ;;  %v10443_v57 = vld [vmem:[%s14126_s23 + $0x384] sm:$0xf]  ;;  %v13421_v62 = vld [vmem:[%s14126_s23 + $0x3a4] sm:$0xf0] }
 0x1c6   : > { %v2253_v45 = vadd.f32 %v2252_v24, %v2225_v7  ;;  %3238 = vmatmul.bf16.vlgmr.msra.gmra.mxu0 %v9814_v43  ;;  %v13436_v7 = vld [vmem:[%s14086_s21 + $0x710] sm:$0xff] }
 0x1c7   : > { %3266 = vmatmul.bf16.vlgmr.msra.gmra.mxu1 %v9818_v32  ;;  %4138 = vmatpush.bf16.msrb.mxu0 %v13436_v7 }
 0x1c8   : > { %3294 = vmatmul.bf16.vlgmr.msra.gmra.mxu2 %v9822_v20  ;;  %9601 = vst [vmem:[%s14477_s27 + $0x38] sm:$0xff] %v2253_v45  ;;  %v2176_v20 = vadd.f32 %v14647_v47, %v2148_v33  ;;  %v13451_v45 = vld [vmem:[%s14086_s21 + $0x788] sm:$0xff]  ;;  %4168 = vmatpush.bf16.msrb.mxu1 %v13442_v23  ;;  %v13404_v23 = vld [vmem:[%s14126_s23 + $0x31c] sm:$0xf0] }
 0x1c9   : > { %4113 = vmatmul.bf16.vlgmr.msra.gmra.mxu3 %v10372_v42  ;;  %4195 = vmatpush.bf16.msrb.mxu2 %v13451_v45  ;;  %v13473_v45 = vld [vmem:[%s14086_s21 + $0x838] sm:$0xff] }
 0x1ca   : > { %v2204_v29 = vadd.f32 %v14649_v54, %v2176_v20  ;;  %v2151_v54 = vadd.f32 %v14655_v30, %v2123_v38  ;;  %v2125_v30 = vadd.f32 %v14663_v13, %v14566_v35  ;;  %v10444_v35 = vor.u32 %v13421_v62, %v10443_v57 }
 0x1cb   : > { %v3071_v51 = vpop.f32.mrf.mxu2  ;;  %v2226_v55 = vpop.f32.mrf.mxu0  ;;  %4139 = vmatpush.bf16.msrb.mxu0 %v13435_v49 }
 0x1cc   : > { %v3099_v40 = vpop.f32.mrf.mxu3  ;;  %v2254_v18 = vpop.f32.mrf.mxu1  ;;  %v2227_v27 = vadd.f32 %v2226_v55, %v2199_v3  ;;  %v13450_v3 = vld [vmem:[%s14086_s21 + $0x780] sm:$0xff]  ;;  %v2179_v55 = vadd.f32 %v14659_v2, %v2151_v54  ;;  %v2153_v13 = vadd.f32 %v14665_v14, %v2125_v30  ;;  %4273 = vmatpush.bf16.msra.mxu1 %v13481_v36  ;;  %v13477_v36 = vld [vmem:[%s14086_s21 + $0x858] sm:$0xff] }
 0x1cd   : > { %v14718_v6 = vadd.f32 %v3099_v40, %v3071_v51  ;;  %v13458_v40 = vld [vmem:[%s14086_s21 + $0x7c0] sm:$0xff]  ;;  %4196 = vmatpush.bf16.msrb.mxu2 %v13450_v3 }
 0x1ce   : > { %v2255_v37 = vadd.f32 %v2254_v18, %v2227_v27  ;;  %v13325_v27 = vld [vmem:[%s14126_s23 + $0x2c0] sm:$0xf0]  ;;  %4224 = vmatpush.bf16.msrb.mxu3 %v13458_v40  ;;  %v2207_v2 = vadd.f32 %v14661_v4, %v2179_v55  ;;  %v2181_v4 = vadd.f32 %v14673_v22, %v2153_v13  ;;  %v13405_v13 = vld [vmem:[%s14126_s23 + $0x324] sm:$0xf0] }
 0x1cf   : > { %v9886_v39 = vor.u32 %v13325_v27, %v9885_v50  ;;  %4140 = vmatpush.bf16.msrb.mxu0 %v13434_v9  ;;  %v13472_v27 = vld [vmem:[%s14086_s21 + $0x830] sm:$0xff]  ;;  %v13486_v9 = vld [vmem:[%s14086_s21 + $0x8a0] sm:$0xff] }
 0x1d0   : > { %9602 = vst [vmem:[%s14477_s27 + $0x40] sm:$0xff] %v2255_v37  ;;  %v13326_v37 = vld [vmem:[%s14126_s23 + $0x2c8] sm:$0xf0]  ;;  %v2209_v14 = vadd.f32 %v14675_v5, %v2181_v4 }
 0x1d3   : > { %v3073_v19 = vpop.f32.mrf.mxu2  ;;  %v2229_v32 = vpop.f32.mrf.mxu0  ;;  %4245 = vmatpush.bf16.msra.mxu0 %v13473_v45  ;;  %v13469_v45 = vld [vmem:[%s14086_s21 + $0x818] sm:$0xff] }
 0x1d4   : > { %v3101_v48 = vpop.f32.mrf.mxu3  ;;  %v2257_v0 = vpop.f32.mrf.mxu1  ;;  %v2230_v24 = vadd.f32 %v2229_v32, %v2202_v11  ;;  %v9894_v11 = vor.u32 %v13326_v37, %v9893_v28  ;;  %v2128_v32 = vadd.f32 %v14677_v25, %v14573_v34  ;;  %v9642_v25 = vld [vmem:[%s14126_s23 + $0x2f0] sm:$0x1] }
 0x1d5   : > { %v14738_v43 = vadd.f32 %v3101_v48, %v3073_v19 }
 0x1d6   : > { %v2258_v42 = vadd.f32 %v2257_v0, %v2230_v24  ;;  %3243 = vmatmul.bf16.gmra.mxu0 %v9850_v26  ;;  %v13489_v26 = vld [vmem:[%s14086_s21 + $0x8b8] sm:$0xff]  ;;  %v9641_v24 = vld [vmem:[%s14126_s23 + $0x2e8] sm:$0x11]  ;;  %v2156_v20 = vadd.f32 %v14679_v31, %v2128_v32 }
 0x1d7   : > { %3271 = vmatmul.bf16.gmra.mxu1 %v9854_v17  ;;  %v13497_v17 = vld [vmem:[%s14086_s21 + $0x8f8] sm:$0xff]  ;;  %4301 = vmatpush.bf16.msra.mxu2 %v13489_v26  ;;  %v2555_v7 = vunpack.c.l.b16 %v9641_v24  ;;  %v2556_v60 = vunpack.c.h.b16 %v9641_v24 }
 0x1d8   : > { %3299 = vmatmul.bf16.gmra.mxu2 %v9858_v46  ;;  %9603 = vst [vmem:[%s14477_s27 + $0x48] sm:$0xff] %v2258_v42  ;;  %4329 = vmatpush.bf16.msra.mxu3 %v13497_v17  ;;  %v14788_v42 = vld [vmem:[%s14126_s23 + $0x3cc] sm:$0x11]  ;;  %v2184_v38 = vadd.f32 %v14687_v52, %v2156_v20  ;;  %v13493_v24 = vld [vmem:[%s14086_s21 + $0x8d8] sm:$0xff] }
 0x1d9   : > { %4118 = vmatmul.bf16.gmra.mxu3 %v10408_v56  ;;  %v2591_v49 = vpack.c.b16 %v2555_v7, %v2555_v7  ;;  %v2592_v61 = vpack.c.b16 %v2556_v60, %v2556_v60  ;;  %4246 = vmatpush.bf16.msra.mxu0 %v13472_v27  ;;  %v10409_v7 = vld [vmem:[%s14126_s23 + $0x360] sm:$0xf0]  ;;  %v13468_v27 = vld [vmem:[%s14086_s21 + $0x810] sm:$0xff] }
 0x1da   : > { %v2212_v31 = vadd.f32 %v14689_v53, %v2184_v38  ;;  %v13480_v53 = vld [vmem:[%s14086_s21 + $0x870] sm:$0xff]  ;;  %v10415_v60 = vld [vmem:[%s14126_s23 + $0x344] sm:$0xf] }
 0x1db   : > { %v3076_v47 = vpop.f32.mrf.mxu2  ;;  %v2231_v12 = vpop.f32.mrf.mxu0  ;;  %4274 = vmatpush.bf16.msra.mxu1 %v13480_v53  ;;  %v13476_v53 = vld [vmem:[%s14086_s21 + $0x850] sm:$0xff] }
 0x1dc   : > { %v3104_v41 = vpop.f32.mrf.mxu3  ;;  %v2259_v1 = vpop.f32.mrf.mxu1  ;;  %v2232_v51 = vadd.f32 %v2231_v12, %v2204_v29  ;;  %v13488_v29 = vld [vmem:[%s14086_s21 + $0x8b0] sm:$0xff] }
 0x1dd   : > { %v14750_v44 = vadd.f32 %v3104_v41, %v3076_v47  ;;  %v2557_v47 = vunpack.c.l.b16 %v9642_v25  ;;  %v3592_v41 = vunpack.c.l.b16 %v14788_v42  ;;  %v13496_v12 = vld [vmem:[%s14086_s21 + $0x8f0] sm:$0xff]  ;;  %4302 = vmatpush.bf16.msra.mxu2 %v13488_v29 }
 0x1de   : > { %v2260_v18 = vadd.f32 %v2259_v1, %v2232_v51  ;;  %4330 = vmatpush.bf16.msra.mxu3 %v13496_v12  ;;  %v13484_v29 = vld [vmem:[%s14086_s21 + $0x890] sm:$0xff] }
 0x1df   : > { %v2593_v40 = vpack.c.b16 %v2557_v47, %v2557_v47  ;;  %v3628_v55 = vpack.c.b16 %v3592_v41, %v3592_v41  ;;  %v13413_v47 = vld [vmem:[%s14126_s23 + $0x364] sm:$0xf0]  ;;  %v13492_v12 = vld [vmem:[%s14086_s21 + $0x8d0] sm:$0xff] }
 0x1e0   : > { %9604 = vst [vmem:[%s14477_s27 + $0x50] sm:$0xff] %v2260_v18  ;;  %v13409_v41 = vld [vmem:[%s14126_s23 + $0x348] sm:$0xf] }
 0x1e1   : > { %4303 = vmatpush.bf16.msra.mxu2 %v13487_v59  ;;  %v13483_v59 = vld [vmem:[%s14086_s21 + $0x888] sm:$0xff] }
 0x1e2   : > { %4331 = vmatpush.bf16.msra.mxu3 %v13495_v63  ;;  %v13491_v63 = vld [vmem:[%s14086_s21 + $0x8c8] sm:$0xff] }
 0x1e3   : > { %v3078_v8 = vpop.f32.mrf.mxu2  ;;  %v2234_v15 = vpop.f32.mrf.mxu0 }
 0x1e4   : > { %v3106_v58 = vpop.f32.mrf.mxu3  ;;  %v2262_v16 = vpop.f32.mrf.mxu1  ;;  %v2235_v19 = vadd.f32 %v2234_v15, %v2207_v2  ;;  %v13399_v2 = vld [vmem:[%s14126_s23 + $0x2f8] sm:$0xf]  ;;  %v13400_v15 = vld [vmem:[%s14126_s23 + $0x300] sm:$0xf] }
 0x1e5   : > { %v14772_v21 = vadd.f32 %v3106_v58, %v3078_v8  ;;  %v10373_v8 = vld [vmem:[%s14126_s23 + $0x318] sm:$0xf0]  ;;  %4304 = vmatpush.bf16.msra.mxu2 %v13486_v9  ;;  %v13490_v9 = vld [vmem:[%s14086_s21 + $0x8c0] sm:$0xff] }
 0x1e6   : > { %v2263_v48 = vadd.f32 %v2262_v16, %v2235_v19  ;;  %3248 = vmatmul.bf16.gmra.mxu0 %v9886_v39  ;;  %v10379_v58 = vld [vmem:[%s14126_s23 + $0x2fc] sm:$0xf]  ;;  %v13471_v39 = vld [vmem:[%s14086_s21 + $0x828] sm:$0xff]  ;;  %v13494_v16 = vld [vmem:[%s14086_s21 + $0x8e0] sm:$0xff] }
 0x1e7   : > { %3276 = vmatmul.bf16.gmra.mxu1 %v9890_v10  ;;  %v13479_v10 = vld [vmem:[%s14086_s21 + $0x868] sm:$0xff]  ;;  %4247 = vmatpush.bf16.msra.mxu0 %v13471_v39  ;;  %v10380_v26 = vor.u32 %v13404_v23, %v10379_v58  ;;  %v13482_v58 = vld [vmem:[%s14086_s21 + $0x880] sm:$0xff] }
 0x1e8   : > { %3304 = vmatmul.bf16.gmra.mxu2 %v9894_v11  ;;  %9605 = vst [vmem:[%s14477_s27 + $0x58] sm:$0xff] %v2263_v48  ;;  %v10381_v11 = vld [vmem:[%s14126_s23 + $0x320] sm:$0xf0]  ;;  %4275 = vmatpush.bf16.msra.mxu1 %v13479_v10  ;;  %v10376_v48 = vor.u32 %v13399_v2, %v10373_v8  ;;  %v13467_v2 = vld [vmem:[%s14086_s21 + $0x808] sm:$0xff] }
 0x1e9   : > { %4123 = vmatmul.bf16.gmra.mxu3 %v10444_v35  ;;  %v10387_v35 = vld [vmem:[%s14126_s23 + $0x304] sm:$0xf]  ;;  %v13475_v8 = vld [vmem:[%s14086_s21 + $0x848] sm:$0xff] }
 0x1ea   : > { %4332 = vmatpush.bf16.msra.mxu3 %v13494_v16  ;;  %v13417_v39 = vld [vmem:[%s14126_s23 + $0x388] sm:$0xf]  ;;  %v10445_v10 = vld [vmem:[%s14126_s23 + $0x3a8] sm:$0xf0]  ;;  %v13418_v16 = vld [vmem:[%s14126_s23 + $0x390] sm:$0xf] }
 0x1eb   : > { %v3081_v22 = vpop.f32.mrf.mxu2  ;;  %v2236_v56 = vpop.f32.mrf.mxu0  ;;  %v10451_v23 = vld [vmem:[%s14126_s23 + $0x38c] sm:$0xf] }
 0x1ec   : > { %v3109_v0 = vpop.f32.mrf.mxu3  ;;  %v2264_v33 = vpop.f32.mrf.mxu1  ;;  %v2237_v34 = vadd.f32 %v2236_v56, %v2209_v14  ;;  %v10384_v14 = vor.u32 %v13400_v15, %v10381_v11  ;;  %v13478_v56 = vld [vmem:[%s14086_s21 + $0x860] sm:$0xff]  ;;  %v13422_v15 = vld [vmem:[%s14126_s23 + $0x3ac] sm:$0xf0]  ;;  %v10453_v11 = vld [vmem:[%s14126_s23 + $0x3b0] sm:$0xf0] }
 0x1ed   : > { %v14782_v46 = vadd.f32 %v3109_v0, %v3081_v22  ;;  %v10388_v22 = vor.u32 %v13405_v13, %v10387_v35  ;;  %v13470_v0 = vld [vmem:[%s14086_s21 + $0x820] sm:$0xff]  ;;  %4276 = vmatpush.bf16.msra.mxu1 %v13478_v56  ;;  %v10459_v35 = vld [vmem:[%s14126_s23 + $0x394] sm:$0xf]  ;;  %v13423_v13 = vld [vmem:[%s14126_s23 + $0x3b4] sm:$0xf0] }
 0x1ee   : > { %v2265_v5 = vadd.f32 %v2264_v33, %v2237_v34  ;;  %v13485_v33 = vld [vmem:[%s14086_s21 + $0x898] sm:$0xff]  ;;  %4248 = vmatpush.bf16.msra.mxu0 %v13470_v0  ;;  %4333 = vmatpush.bf16.msra.mxu3 %v13493_v24  ;;  %v10460_v24 = vor.u32 %v13423_v13, %v10459_v35 }
 0x1ef   : > { %4305 = vmatpush.bf16.msra.mxu2 %v13485_v33  ;;  %v10456_v33 = vor.u32 %v13418_v16, %v10453_v11 }
 0x1f0   : > { %9606 = vst [vmem:[%s14477_s27 + $0x60] sm:$0xff] %v2265_v5  ;;  %v13408_v5 = vld [vmem:[%s14126_s23 + $0x340] sm:$0xf] }
 0x1f1   : > { %4277 = vmatpush.bf16.msra.mxu1 %v13477_v36 }
 0x1f2   : > { %4249 = vmatpush.bf16.msra.mxu0 %v13469_v45  ;;  %4334 = vmatpush.bf16.msra.mxu3 %v13492_v12  ;;  %v3593_v12 = vunpack.c.h.b16 %v14788_v42 }
 0x1f3   : > { %v3083_v52 = vpop.f32.mrf.mxu2  ;;  %v2239_v54 = vpop.f32.mrf.mxu0  ;;  %4306 = vmatpush.bf16.msra.mxu2 %v13484_v29 }
 0x1f4   : > { %v3111_v1 = vpop.f32.mrf.mxu3  ;;  %v2267_v51 = vpop.f32.mrf.mxu1  ;;  %v2240_v18 = vadd.f32 %v2239_v54, %v2212_v31  ;;  %v10417_v31 = vld [vmem:[%s14126_s23 + $0x368] sm:$0xf0]  ;;  %v10412_v54 = vor.u32 %v13408_v5, %v10409_v7  ;;  %v13548_v5 = vld [vmem:[%s14086_s21 + $0x9b8] sm:$0xff]  ;;  %v3629_v42 = vpack.c.b16 %v3593_v12, %v3593_v12  ;;  %v10397_v12 = vld [vmem:[%s14126_s23 + $0x330] sm:$0xf0] }
 0x1f5   : > { %v14798_v3 = vadd.f32 %v3111_v1, %v3083_v52  ;;  %v10423_v52 = vld [vmem:[%s14126_s23 + $0x34c] sm:$0xf]  ;;  %v13414_v1 = vld [vmem:[%s14126_s23 + $0x36c] sm:$0xf0]  ;;  %4278 = vmatpush.bf16.msra.mxu1 %v13476_v53  ;;  %v13556_v7 = vld [vmem:[%s14086_s21 + $0x9f8] sm:$0xff] }
 0x1f6   : > { %v2268_v50 = vadd.f32 %v2267_v51, %v2240_v18  ;;  %3253 = vmatmul.bf16.gmra.mxu0 %v2591_v49  ;;  %v10416_v51 = vor.u32 %v13413_v47, %v10415_v60  ;;  %v10420_v18 = vor.u32 %v13409_v41, %v10417_v31  ;;  %4335 = vmatpush.bf16.msra.mxu3 %v13491_v63  ;;  %v10221_v47 = vld [vmem:[%s14126_s23 + $0x3d4] sm:$0x11]  ;;  %v14901_v41 = vld [vmem:[%s14126_s23 + $0x3dc] sm:$0x11] }
 0x1f7   : > { %3281 = vmatmul.bf16.gmra.mxu1 %v2592_v61  ;;  %4250 = vmatpush.bf16.msra.mxu0 %v13468_v27  ;;  %v3594_v31 = vunpack.c.l.b16 %v10221_v47 }
 0x1f8   : > { %3309 = vmatmul.bf16.gmra.mxu2 %v2593_v40  ;;  %9607 = vst [vmem:[%s14477_s27 + $0x68] sm:$0x1] %v2268_v50  ;;  %v10424_v50 = vor.u32 %v13414_v1, %v10423_v52  ;;  %v13532_v52 = vld [vmem:[%s14086_s21 + $0x938] sm:$0xff] }
 0x1f9   : > { %4128 = vmatmul.bf16.gmra.mxu3 %v3628_v55  ;;  %4307 = vmatpush.bf16.msra.mxu2 %v13483_v59  ;;  %v13540_v1 = vld [vmem:[%s14086_s21 + $0x978] sm:$0xff]  ;;  %v3630_v59 = vpack.c.b16 %v3594_v31, %v3594_v31  ;;  %v10403_v31 = vld [vmem:[%s14126_s23 + $0x314] sm:$0xf] }
 0x1fa   : > { %4279 = vmatpush.bf16.msra.mxu1 %v13475_v8  ;;  %4336 = vmatpush.bf16.msra.mxu3 %v13490_v9  ;;  %v13546_v9 = vld [vmem:[%s14086_s21 + $0x9a8] sm:$0xff] }
 0x1fb   : > { %v3086_v28 = vpop.f32.mrf.mxu2  ;;  %v2241_v57 = vpop.f32.mrf.mxu0  ;;  %4251 = vmatpush.bf16.msra.mxu0 %v13467_v2 }
 0x1fc   : > { %v3114_v37 = vpop.f32.mrf.mxu3  ;;  %v2269_v62 = vpop.f32.mrf.mxu1 }
 0x1fd   : > { %v14805_v30 = vadd.f32 %v3114_v37, %v3086_v28  ;;  %4308 = vmatpush.bf16.msra.mxu2 %v13482_v58 }
 0x203   : > { %v3088_v19 = vpop.f32.mrf.mxu2  ;;  %v14819_v17 = vpop.f32.mrf.mxu0 }
 0x204   : > { %v3116_v4 = vpop.f32.mrf.mxu3  ;;  %v14821_v32 = vpop.f32.mrf.mxu1 }
 0x206   : > { %4141 = vmatmul.bf16.vlgmr.msrb.gmra.mxu0 %v10376_v48  ;;  %v10448_v48 = vor.u32 %v13417_v39, %v10445_v10  ;;  %v13531_v39 = vld [vmem:[%s14086_s21 + $0x930] sm:$0xff] }
 0x207   : > { %4169 = vmatmul.bf16.vlgmr.msrb.gmra.mxu1 %v10380_v26  ;;  %v10452_v26 = vor.u32 %v13422_v15, %v10451_v23  ;;  %v13539_v10 = vld [vmem:[%s14086_s21 + $0x970] sm:$0xff]  ;;  %v13554_v23 = vld [vmem:[%s14086_s21 + $0x9e8] sm:$0xff]  ;;  %v3128_v15 = vadd.f32 %v14819_v17, %v14718_v6  ;;  %v13545_v17 = vld [vmem:[%s14086_s21 + $0x9a0] sm:$0xff] }
 0x208   : > { %4197 = vmatmul.bf16.vlgmr.msrb.gmra.mxu2 %v10384_v14  ;;  %v13466_v14 = vld [vmem:[%s14086_s21 + $0x800] sm:$0xff]  ;;  %v13538_v6 = vld [vmem:[%s14086_s21 + $0x968] sm:$0xff] }
 0x209   : > { %4225 = vmatmul.bf16.vlgmr.msrb.gmra.mxu3 %v10388_v22  ;;  %v13474_v22 = vld [vmem:[%s14086_s21 + $0x840] sm:$0xff]  ;;  %4252 = vmatpush.bf16.msra.mxu0 %v13466_v14  ;;  %v10389_v14 = vld [vmem:[%s14126_s23 + $0x328] sm:$0xf0] }
 0x20a   : > { %4280 = vmatpush.bf16.msra.mxu1 %v13474_v22  ;;  %5204 = vmatpush.bf16.msrb.mxu2 %v13548_v5  ;;  %v10395_v22 = vld [vmem:[%s14126_s23 + $0x30c] sm:$0xf]  ;;  %v13406_v5 = vld [vmem:[%s14126_s23 + $0x32c] sm:$0xf0] }
 0x20b   : > { %v14827_v20 = vpop.f32.mrf.mxu2  ;;  %v14831_v25 = vpop.f32.mrf.mxu0  ;;  %5232 = vmatpush.bf16.msrb.mxu3 %v13556_v7  ;;  %v13402_v7 = vld [vmem:[%s14126_s23 + $0x310] sm:$0xf] }
 0x20c   : > { %v14829_v34 = vpop.f32.mrf.mxu3  ;;  %v14833_v38 = vpop.f32.mrf.mxu1 }
 0x20d   : > { %5148 = vmatpush.bf16.msrb.mxu0 %v13532_v52  ;;  %v13407_v52 = vld [vmem:[%s14126_s23 + $0x334] sm:$0xf0] }
 0x20e   : > { %5176 = vmatpush.bf16.msrb.mxu1 %v13540_v1  ;;  %v3130_v1 = vadd.f32 %v14831_v25, %v14738_v43  ;;  %v13529_v43 = vld [vmem:[%s14086_s21 + $0x920] sm:$0xff] }
 0x20f   : > { %v13537_v25 = vld [vmem:[%s14086_s21 + $0x960] sm:$0xff] }
 0x211   : > { %5149 = vmatpush.bf16.msrb.mxu0 %v13531_v39 }
 0x212   : > { %5177 = vmatpush.bf16.msrb.mxu1 %v13539_v10 }
 0x213   : > { %v14847_v49 = vpop.f32.mrf.mxu2  ;;  %v14851_v40 = vpop.f32.mrf.mxu0 }
 0x214   : > { %v14849_v61 = vpop.f32.mrf.mxu3  ;;  %v14853_v55 = vpop.f32.mrf.mxu1 }
 0x216   : > { %4146 = vmatmul.bf16.gmra.mxu0 %v10412_v54  ;;  %v13547_v54 = vld [vmem:[%s14086_s21 + $0x9b0] sm:$0xff]  ;;  %5178 = vmatpush.bf16.msrb.mxu1 %v13538_v6  ;;  %v13528_v6 = vld [vmem:[%s14086_s21 + $0x918] sm:$0xff] }
 0x217   : > { %4174 = vmatmul.bf16.gmra.mxu1 %v10416_v51  ;;  %v3595_v51 = vunpack.c.h.b16 %v10221_v47  ;;  %5205 = vmatpush.bf16.msrb.mxu2 %v13547_v54  ;;  %v13553_v47 = vld [vmem:[%s14086_s21 + $0x9e0] sm:$0xff] }
 0x218   : > { %4202 = vmatmul.bf16.gmra.mxu2 %v10420_v18  ;;  %v3596_v18 = vunpack.c.l.b16 %v14901_v41 }
 0x219   : > { %4230 = vmatmul.bf16.gmra.mxu3 %v10424_v50  ;;  %v13555_v50 = vld [vmem:[%s14086_s21 + $0x9f0] sm:$0xff]  ;;  %v3631_v8 = vpack.c.b16 %v3595_v51, %v3595_v51 }
 0x21a   : > { %5233 = vmatpush.bf16.msrb.mxu3 %v13555_v50  ;;  %v3632_v58 = vpack.c.b16 %v3596_v18, %v3596_v18  ;;  %5179 = vmatpush.bf16.msrb.mxu1 %v13537_v25  ;;  %v13550_v25 = vld [vmem:[%s14086_s21 + $0x9c8] sm:$0xff] }
 0x21b   : > { %v14859_v28 = vpop.f32.mrf.mxu2  ;;  %v14863_v57 = vpop.f32.mrf.mxu0  ;;  %5206 = vmatpush.bf16.msrb.mxu2 %v13546_v9  ;;  %v13544_v9 = vld [vmem:[%s14086_s21 + $0x998] sm:$0xff] }
 0x21c   : > { %v14861_v37 = vpop.f32.mrf.mxu3  ;;  %v14865_v62 = vpop.f32.mrf.mxu1 }
 0x21e   : > { %5234 = vmatpush.bf16.msrb.mxu3 %v13554_v23  ;;  %v13552_v23 = vld [vmem:[%s14086_s21 + $0x9d8] sm:$0xff] }
 0x21f   : > { %5207 = vmatpush.bf16.msrb.mxu2 %v13545_v17  ;;  %v13536_v17 = vld [vmem:[%s14086_s21 + $0x958] sm:$0xff] }
 0x220   : > { %5180 = vmatpush.bf16.msrb.mxu1 %v13536_v17  ;;  %v13425_v17 = vld [vmem:[%s14126_s23 + $0x3c4] sm:$0xf0] }
 0x222   : > { %5235 = vmatpush.bf16.msrb.mxu3 %v13553_v47  ;;  %v13551_v47 = vld [vmem:[%s14086_s21 + $0x9d0] sm:$0xff] }
 0x223   : > { %v14879_v19 = vpop.f32.mrf.mxu2  ;;  %v14885_v0 = vpop.f32.mrf.mxu0  ;;  %5208 = vmatpush.bf16.msrb.mxu2 %v13544_v9 }
 0x224   : > { %v14881_v4 = vpop.f32.mrf.mxu3  ;;  %v14887_v56 = vpop.f32.mrf.mxu1 }
 0x226   : > { %4151 = vmatmul.bf16.gmra.mxu0 %v10448_v48  ;;  %v3156_v48 = vadd.f32 %v14821_v32, %v3128_v15  ;;  %5236 = vmatpush.bf16.msrb.mxu3 %v13552_v23 }
 0x227   : > { %4179 = vmatmul.bf16.gmra.mxu1 %v10452_v26  ;;  %v13401_v26 = vld [vmem:[%s14126_s23 + $0x308] sm:$0xf] }
 0x228   : > { %4207 = vmatmul.bf16.gmra.mxu2 %v10456_v33  ;;  %v13530_v33 = vld [vmem:[%s14086_s21 + $0x928] sm:$0xff]  ;;  %v10392_v51 = vor.u32 %v13401_v26, %v10389_v14  ;;  %v13410_v14 = vld [vmem:[%s14126_s23 + $0x350] sm:$0xf] }
 0x229   : > { %4235 = vmatmul.bf16.gmra.mxu3 %v10460_v24  ;;  %v3184_v24 = vadd.f32 %v14827_v20, %v3156_v48  ;;  %5150 = vmatpush.bf16.msrb.mxu0 %v13530_v33  ;;  %v10396_v20 = vor.u32 %v13406_v5, %v10395_v22  ;;  %v10425_v22 = vld [vmem:[%s14126_s23 + $0x370] sm:$0xf0] }
 0x22a   : > { %v10431_v33 = vld [vmem:[%s14126_s23 + $0x354] sm:$0xf]  ;;  %5237 = vmatpush.bf16.msrb.mxu3 %v13551_v47 }
 0x22b   : > { %v14891_v60 = vpop.f32.mrf.mxu2  ;;  %v14895_v36 = vpop.f32.mrf.mxu0  ;;  %v3212_v18 = vadd.f32 %v14829_v34, %v3184_v24  ;;  %v3133_v34 = vadd.f32 %v14851_v40, %v14750_v44  ;;  %v13543_v24 = vld [vmem:[%s14086_s21 + $0x990] sm:$0xff] }
 0x22c   : > { %v14893_v45 = vpop.f32.mrf.mxu3  ;;  %v14897_v29 = vpop.f32.mrf.mxu1  ;;  %5209 = vmatpush.bf16.msrb.mxu2 %v13543_v24  ;;  %v3140_v24 = vadd.f32 %v14895_v36, %v14798_v3 }
 0x22d   : > { %5151 = vmatpush.bf16.msrb.mxu0 %v13529_v43  ;;  %v3161_v44 = vadd.f32 %v14853_v55, %v3133_v34  ;;  %v3135_v55 = vadd.f32 %v14863_v57, %v14772_v21 }
 0x22e   : > { %5238 = vmatpush.bf16.msrb.mxu3 %v13550_v25  ;;  %v3168_v3 = vadd.f32 %v14897_v29, %v3140_v24  ;;  %v13564_v25 = vld [vmem:[%s14086_s21 + $0xa38] sm:$0xff] }
 0x22f   : > { %v3189_v5 = vadd.f32 %v14859_v28, %v3161_v44  ;;  %v10428_v28 = vor.u32 %v13410_v14, %v10425_v22  ;;  %v3163_v21 = vadd.f32 %v14865_v62, %v3135_v55  ;;  %v3138_v62 = vadd.f32 %v14885_v0, %v14782_v46  ;;  %v10461_v44 = vld [vmem:[%s14126_s23 + $0x3b8] sm:$0xf0]  ;;  %v13424_v22 = vld [vmem:[%s14126_s23 + $0x3bc] sm:$0xf0] }
 0x231   : > { %5152 = vmatpush.bf16.msrb.mxu0 %v13528_v6  ;;  %v3191_v43 = vadd.f32 %v14879_v19, %v3163_v21  ;;  %v3166_v46 = vadd.f32 %v14887_v56, %v3138_v62  ;;  %v10469_v56 = vld [vmem:[%s14126_s23 + $0x3c0] sm:$0xf0]  ;;  %v13572_v62 = vld [vmem:[%s14086_s21 + $0xa78] sm:$0xff] }
 0x232   : > { %v10475_v6 = vld [vmem:[%s14126_s23 + $0x3a4] sm:$0xf] }
 0x233   : > { %v14909_v27 = vpop.f32.mrf.mxu2  ;;  %v14913_v63 = vpop.f32.mrf.mxu0  ;;  %v3219_v23 = vadd.f32 %v14881_v4, %v3191_v43  ;;  %v3194_v14 = vadd.f32 %v14891_v60, %v3166_v46  ;;  %v10467_v4 = vld [vmem:[%s14126_s23 + $0x39c] sm:$0xf] }
 0x234   : > { %v14911_v53 = vpop.f32.mrf.mxu3  ;;  %v14915_v2 = vpop.f32.mrf.mxu1  ;;  %v10468_v47 = vor.u32 %v13424_v22, %v10467_v4  ;;  %v13578_v4 = vld [vmem:[%s14086_s21 + $0xaa8] sm:$0xff] }
 0x236   : > { %4156 = vmatmul.bf16.gmra.mxu0 %v3629_v42 }
 0x237   : > { %4184 = vmatmul.bf16.gmra.mxu1 %v3630_v59  ;;  %v10400_v59 = vor.u32 %v13402_v7, %v10397_v12  ;;  %v13411_v7 = vld [vmem:[%s14126_s23 + $0x358] sm:$0xf]  ;;  %v10433_v12 = vld [vmem:[%s14126_s23 + $0x378] sm:$0xf0] }
 0x238   : > { %4212 = vmatmul.bf16.gmra.mxu2 %v3631_v8  ;;  %v10404_v8 = vor.u32 %v13407_v52, %v10403_v31  ;;  %v10439_v31 = vld [vmem:[%s14126_s23 + $0x35c] sm:$0xf]  ;;  %v13416_v52 = vld [vmem:[%s14126_s23 + $0x37c] sm:$0xf0] }
 0x239   : > { %4240 = vmatmul.bf16.gmra.mxu3 %v3632_v58  ;;  %v3158_v58 = vadd.f32 %v14833_v38, %v3130_v1 }
 0x23b   : > { %v14923_v16 = vpop.f32.mrf.mxu2  ;;  %v3144_v35 = vpop.f32.mrf.mxu0  ;;  %v3186_v10 = vadd.f32 %v14847_v49, %v3158_v58  ;;  %v13527_v58 = vld [vmem:[%s14086_s21 + $0x910] sm:$0xff] }
 0x23c   : > { %v14925_v11 = vpop.f32.mrf.mxu3  ;;  %v3172_v13 = vpop.f32.mrf.mxu1  ;;  %5153 = vmatpush.bf16.msrb.mxu0 %v13527_v58  ;;  %v10223_v58 = vld [vmem:[%s14126_s23 + $0x3e4] sm:$0x11] }
 0x23d   : > { %v3214_v35 = vadd.f32 %v14849_v61, %v3186_v10  ;;  %v13415_v61 = vld [vmem:[%s14126_s23 + $0x374] sm:$0xf0] }
 0x243   : > { %v3200_v32 = vpop.f32.mrf.mxu2  ;;  %v3239_v50 = vpop.f32.mrf.mxu0 }
 0x244   : > { %v3228_v54 = vpop.f32.mrf.mxu3  ;;  %v3267_v42 = vpop.f32.mrf.mxu1  ;;  %v3240_v39 = vadd.f32 %v3239_v50, %v3212_v18 }
 0x246   : > { %4253 = vmatmul.bf16.vlgmr.msra.gmra.mxu0 %v10392_v51  ;;  %v3268_v38 = vadd.f32 %v3267_v42, %v3240_v39  ;;  %v10432_v51 = vor.u32 %v13415_v61, %v10431_v33  ;;  %v13535_v39 = vld [vmem:[%s14086_s21 + $0x950] sm:$0xff]  ;;  %v13420_v33 = vld [vmem:[%s14126_s23 + $0x3a0] sm:$0xf] }
 0x247   : > { %4281 = vmatmul.bf16.vlgmr.msra.gmra.mxu1 %v10396_v20  ;;  %v3217_v20 = vadd.f32 %v14861_v37, %v3189_v5  ;;  %v13542_v37 = vld [vmem:[%s14086_s21 + $0x988] sm:$0xff] }
 0x248   : > { %4309 = vmatmul.bf16.vlgmr.msra.gmra.mxu2 %v10400_v59  ;;  %v10436_v59 = vor.u32 %v13411_v7, %v10433_v12  ;;  %5181 = vmatpush.bf16.msrb.mxu1 %v13535_v39  ;;  %v13525_v12 = vld [vmem:[%s14086_s21 + $0x900] sm:$0xff]  ;;  %v10224_v39 = vld [vmem:[%s14126_s23 + $0x3ec] sm:$0x1] }
 0x249   : > { %4337 = vmatmul.bf16.vlgmr.msra.gmra.mxu3 %v10404_v8  ;;  %v10440_v8 = vor.u32 %v13416_v52, %v10439_v31  ;;  %5210 = vmatpush.bf16.msrb.mxu2 %v13542_v37  ;;  %v13533_v31 = vld [vmem:[%s14086_s21 + $0x940] sm:$0xff]  ;;  %v3222_v52 = vadd.f32 %v14893_v45, %v3194_v14  ;;  %v13580_v45 = vld [vmem:[%s14086_s21 + $0xab8] sm:$0xff]  ;;  %v3598_v37 = vunpack.c.l.b16 %v10223_v58  ;;  %v13571_v14 = vld [vmem:[%s14086_s21 + $0xa70] sm:$0xff] }
 0x24b   : > { %v3295_v49 = vpop.f32.mrf.mxu2  ;;  %v3241_v48 = vpop.f32.mrf.mxu0  ;;  %v3634_v46 = vpack.c.b16 %v3598_v37, %v3598_v37  ;;  %v13511_v37 = vld [vmem:[%s14126_s23 + $0x458] sm:$0xf0] }
 0x24c   : > { %v14952_v15 = vpop.f32.mrf.mxu3  ;;  %v3296_v13 = vadd.f32 %v3295_v49, %v3268_v38  ;;  %v3269_v26 = vpop.f32.mrf.mxu1  ;;  %v3242_v40 = vadd.f32 %v3241_v48, %v3214_v35  ;;  %v13526_v35 = vld [vmem:[%s14086_s21 + $0x908] sm:$0xff]  ;;  %v13541_v48 = vld [vmem:[%s14086_s21 + $0x980] sm:$0xff] }
 0x24d   : > { %5154 = vmatpush.bf16.msrb.mxu0 %v13526_v35  ;;  %5211 = vmatpush.bf16.msrb.mxu2 %v13541_v48 }
 0x24e   : > { %10183 = vst [vmem:[%s14477_s27 + $0x70] sm:$0xff] %v3296_v13  ;;  %v3270_v1 = vadd.f32 %v3269_v26, %v3242_v40  ;;  %v13534_v13 = vld [vmem:[%s14086_s21 + $0x948] sm:$0xff]  ;;  %v13419_v26 = vld [vmem:[%s14126_s23 + $0x398] sm:$0xf]  ;;  %v13549_v40 = vld [vmem:[%s14086_s21 + $0x9c0] sm:$0xff] }
 0x24f   : > { %5182 = vmatpush.bf16.msrb.mxu1 %v13534_v13  ;;  %5239 = vmatpush.bf16.msrb.mxu3 %v13549_v40  ;;  %v10464_v60 = vor.u32 %v13419_v26, %v10461_v44  ;;  %v13563_v40 = vld [vmem:[%s14086_s21 + $0xa30] sm:$0xff] }
 0x251   : > { %5155 = vmatpush.bf16.msrb.mxu0 %v13525_v12  ;;  %5316 = vmatpush.bf16.msra.mxu2 %v13580_v45  ;;  %v13570_v12 = vld [vmem:[%s14086_s21 + $0xa68] sm:$0xff] }
 0x253   : > { %v3297_v32 = vpop.f32.mrf.mxu2  ;;  %v3244_v50 = vpop.f32.mrf.mxu0  ;;  %5183 = vmatpush.bf16.msrb.mxu1 %v13533_v31  ;;  %v13577_v31 = vld [vmem:[%s14086_s21 + $0xaa0] sm:$0xff] }
 0x254   : > { %v14972_v54 = vpop.f32.mrf.mxu3  ;;  %v3298_v18 = vadd.f32 %v3297_v32, %v3270_v1  ;;  %v3272_v42 = vpop.f32.mrf.mxu1  ;;  %v3245_v57 = vadd.f32 %v3244_v50, %v3217_v20  ;;  %v3196_v20 = vadd.f32 %v14909_v27, %v3168_v3  ;;  %v3143_v50 = vadd.f32 %v14913_v63, %v14805_v30 }
 0x255   : > { %v3597_v63 = vunpack.c.h.b16 %v14901_v41  ;;  %5260 = vmatpush.bf16.msra.mxu0 %v13564_v25  ;;  %v13507_v25 = vld [vmem:[%s14126_s23 + $0x43c] sm:$0xf] }
 0x256   : > { %10184 = vst [vmem:[%s14477_s27 + $0x78] sm:$0xff] %v3298_v18  ;;  %4258 = vmatmul.bf16.gmra.mxu0 %v10428_v28  ;;  %v3273_v10 = vadd.f32 %v3272_v42, %v3245_v57  ;;  %v10472_v28 = vor.u32 %v13420_v33, %v10469_v56  ;;  %v13588_v18 = vld [vmem:[%s14086_s21 + $0xaf8] sm:$0xff]  ;;  %v3224_v27 = vadd.f32 %v14911_v53, %v3196_v20  ;;  %v3600_v53 = vunpack.c.l.b16 %v10224_v39 }
 0x257   : > { %4286 = vmatmul.bf16.gmra.mxu1 %v10432_v51  ;;  %v10476_v51 = vor.u32 %v13425_v17, %v10475_v6  ;;  %5344 = vmatpush.bf16.msra.mxu3 %v13588_v18  ;;  %v3171_v43 = vadd.f32 %v14915_v2, %v3143_v50  ;;  %v3633_v41 = vpack.c.b16 %v3597_v63, %v3597_v63  ;;  %v10989_v63 = vld [vmem:[%s14126_s23 + $0x438] sm:$0xf] }
 0x258   : > { %4314 = vmatmul.bf16.gmra.mxu2 %v10436_v59  ;;  %5288 = vmatpush.bf16.msra.mxu1 %v13572_v62  ;;  %v3636_v26 = vpack.c.b16 %v3600_v53, %v3600_v53  ;;  %v13560_v62 = vld [vmem:[%s14086_s21 + $0xa18] sm:$0xff]  ;;  %v10997_v53 = vld [vmem:[%s14126_s23 + $0x440] sm:$0xf] }
 0x259   : > { %4342 = vmatmul.bf16.gmra.mxu3 %v10440_v8  ;;  %5261 = vmatpush.bf16.msra.mxu0 %v13563_v40  ;;  %v13559_v40 = vld [vmem:[%s14086_s21 + $0xa10] sm:$0xff] }
 0x25b   : > { %v3300_v19 = vpop.f32.mrf.mxu2  ;;  %v3246_v38 = vpop.f32.mrf.mxu0 }
 0x25c   : > { %v14984_v9 = vpop.f32.mrf.mxu3  ;;  %v3301_v34 = vadd.f32 %v3300_v19, %v3273_v10  ;;  %v3274_v49 = vpop.f32.mrf.mxu1  ;;  %v3247_v0 = vadd.f32 %v3246_v38, %v3219_v23  ;;  %v13579_v10 = vld [vmem:[%s14086_s21 + $0xab0] sm:$0xff]  ;;  %v3199_v19 = vadd.f32 %v14923_v16, %v3171_v43  ;;  %v3599_v23 = vunpack.c.h.b16 %v10223_v58  ;;  %5289 = vmatpush.bf16.msra.mxu1 %v13571_v14 }
 0x25d   : > { %5317 = vmatpush.bf16.msra.mxu2 %v13579_v10  ;;  %v13568_v10 = vld [vmem:[%s14086_s21 + $0xa58] sm:$0xff]  ;;  %v13567_v14 = vld [vmem:[%s14086_s21 + $0xa50] sm:$0xff] }
 0x25e   : > { %10185 = vst [vmem:[%s14477_s27 + $0x80] sm:$0xff] %v3301_v34  ;;  %v3275_v5 = vadd.f32 %v3274_v49, %v3247_v0  ;;  %v13587_v34 = vld [vmem:[%s14086_s21 + $0xaf0] sm:$0xff]  ;;  %v3227_v0 = vadd.f32 %v14925_v11, %v3199_v19  ;;  %v3635_v48 = vpack.c.b16 %v3599_v23, %v3599_v23  ;;  %v13586_v11 = vld [vmem:[%s14086_s21 + $0xae8] sm:$0xff]  ;;  %v10991_v23 = vld [vmem:[%s14126_s23 + $0x45c] sm:$0xf0] }
 0x25f   : > { %5345 = vmatpush.bf16.msra.mxu3 %v13587_v34  ;;  %v13575_v19 = vld [vmem:[%s14086_s21 + $0xa90] sm:$0xff] }
 0x260   : > { %5290 = vmatpush.bf16.msra.mxu1 %v13570_v12  ;;  %v13583_v34 = vld [vmem:[%s14086_s21 + $0xad0] sm:$0xff]  ;;  %v13581_v12 = vld [vmem:[%s14086_s21 + $0xac0] sm:$0xff] }
 0x261   : > { %5318 = vmatpush.bf16.msra.mxu2 %v13578_v4  ;;  %v13574_v4 = vld [vmem:[%s14086_s21 + $0xa88] sm:$0xff] }
 0x263   : > { %v3302_v61 = vpop.f32.mrf.mxu2  ;;  %v3249_v1 = vpop.f32.mrf.mxu0  ;;  %5346 = vmatpush.bf16.msra.mxu3 %v13586_v11  ;;  %v13582_v11 = vld [vmem:[%s14086_s21 + $0xac8] sm:$0xff] }
 0x264   : > { %v15004_v7 = vpop.f32.mrf.mxu3  ;;  %v3303_v55 = vadd.f32 %v3302_v61, %v3275_v5  ;;  %v3277_v32 = vpop.f32.mrf.mxu1  ;;  %v3250_v36 = vadd.f32 %v3249_v1, %v3222_v52  ;;  %v10953_v5 = vld [vmem:[%s14126_s23 + $0x3f0] sm:$0xf]  ;;  %v13502_v61 = vld [vmem:[%s14126_s23 + $0x410] sm:$0xf0]  ;;  %v10955_v52 = vld [vmem:[%s14126_s23 + $0x414] sm:$0xf0] }
 0x265   : > { %v13585_v1 = vld [vmem:[%s14086_s21 + $0xae0] sm:$0xff]  ;;  %5319 = vmatpush.bf16.msra.mxu2 %v13577_v31  ;;  %v10954_v20 = vor.u32 %v13502_v61, %v10953_v5  ;;  %v13566_v5 = vld [vmem:[%s14086_s21 + $0xa48] sm:$0xff] }
 0x266   : > { %10186 = vst [vmem:[%s14477_s27 + $0x88] sm:$0xff] %v3303_v55  ;;  %4263 = vmatmul.bf16.gmra.mxu0 %v10464_v60  ;;  %v3278_v42 = vadd.f32 %v3277_v32, %v3250_v36  ;;  %v13498_v60 = vld [vmem:[%s14126_s23 + $0x3f4] sm:$0xf]  ;;  %v10961_v55 = vld [vmem:[%s14126_s23 + $0x3f8] sm:$0xf]  ;;  %v13573_v61 = vld [vmem:[%s14086_s21 + $0xa80] sm:$0xff] }
 0x267   : > { %4291 = vmatmul.bf16.gmra.mxu1 %v10468_v47  ;;  %v13562_v47 = vld [vmem:[%s14086_s21 + $0xa28] sm:$0xff]  ;;  %v13503_v32 = vld [vmem:[%s14126_s23 + $0x418] sm:$0xf0]  ;;  %5347 = vmatpush.bf16.msra.mxu3 %v13585_v1  ;;  %v10958_v45 = vor.u32 %v13498_v60, %v10955_v52  ;;  %v11025_v60 = vld [vmem:[%s14126_s23 + $0x480] sm:$0xf] }
 0x268   : > { %4319 = vmatmul.bf16.gmra.mxu2 %v10472_v28  ;;  %v13499_v28 = vld [vmem:[%s14126_s23 + $0x3fc] sm:$0xf]  ;;  %5262 = vmatpush.bf16.msra.mxu0 %v13562_v47  ;;  %v13520_v47 = vld [vmem:[%s14126_s23 + $0x4a0] sm:$0xf0]  ;;  %v11027_v52 = vld [vmem:[%s14126_s23 + $0x4a4] sm:$0xf0] }
 0x269   : > { %4347 = vmatmul.bf16.gmra.mxu3 %v10476_v51  ;;  %v10963_v51 = vld [vmem:[%s14126_s23 + $0x41c] sm:$0xf0]  ;;  %v13516_v31 = vld [vmem:[%s14126_s23 + $0x484] sm:$0xf]  ;;  %v13521_v1 = vld [vmem:[%s14126_s23 + $0x4a8] sm:$0xf0] }
 0x26b   : > { %v3305_v29 = vpop.f32.mrf.mxu2  ;;  %v3251_v21 = vpop.f32.mrf.mxu0 }
 0x26c   : > { %v15016_v59 = vpop.f32.mrf.mxu3  ;;  %v3306_v8 = vadd.f32 %v3305_v29, %v3278_v42  ;;  %v3279_v57 = vpop.f32.mrf.mxu1  ;;  %v3252_v30 = vadd.f32 %v3251_v21, %v3224_v27  ;;  %v10962_v42 = vor.u32 %v13503_v32, %v10961_v55  ;;  %v10966_v29 = vor.u32 %v13499_v28, %v10963_v51  ;;  %v13561_v27 = vld [vmem:[%s14086_s21 + $0xa20] sm:$0xff]  ;;  %v13576_v21 = vld [vmem:[%s14086_s21 + $0xa98] sm:$0xff]  ;;  %v11033_v55 = vld [vmem:[%s14126_s23 + $0x488] sm:$0xf] }
 0x26d   : > { %5263 = vmatpush.bf16.msra.mxu0 %v13561_v27  ;;  %5320 = vmatpush.bf16.msra.mxu2 %v13576_v21  ;;  %v13517_v32 = vld [vmem:[%s14126_s23 + $0x48c] sm:$0xf]  ;;  %v11035_v28 = vld [vmem:[%s14126_s23 + $0x4ac] sm:$0xf0] }
 0x26e   : > { %10187 = vst [vmem:[%s14477_s27 + $0x90] sm:$0xff] %v3306_v8  ;;  %v3280_v38 = vadd.f32 %v3279_v57, %v3252_v30  ;;  %v13569_v8 = vld [vmem:[%s14086_s21 + $0xa60] sm:$0xff]  ;;  %v13584_v57 = vld [vmem:[%s14086_s21 + $0xad8] sm:$0xff]  ;;  %v11038_v21 = vor.u32 %v13517_v32, %v11035_v28 }
 0x26f   : > { %5291 = vmatpush.bf16.msra.mxu1 %v13569_v8  ;;  %5348 = vmatpush.bf16.msra.mxu3 %v13584_v57  ;;  %v11034_v8 = vor.u32 %v13521_v1, %v11033_v55  ;;  %v13639_v57 = vld [vmem:[%s14086_s21 + $0xbb8] sm:$0xff] }
 0x271   : > { %5264 = vmatpush.bf16.msra.mxu0 %v13560_v62  ;;  %5321 = vmatpush.bf16.msra.mxu2 %v13575_v19  ;;  %v10802_v19 = vld [vmem:[%s14126_s23 + $0x4c8] sm:$0x11] }
 0x273   : > { %v3307_v2 = vpop.f32.mrf.mxu2  ;;  %v3254_v35 = vpop.f32.mrf.mxu0  ;;  %5292 = vmatpush.bf16.msra.mxu1 %v13568_v10  ;;  %5349 = vmatpush.bf16.msra.mxu3 %v13583_v34  ;;  %v4636_v34 = vunpack.c.h.b16 %v10802_v19 }
 0x274   : > { %v15029_v49 = vpop.f32.mrf.mxu3  ;;  %v3308_v16 = vadd.f32 %v3307_v2, %v3280_v38  ;;  %v3282_v13 = vpop.f32.mrf.mxu1  ;;  %v3255_v44 = vadd.f32 %v3254_v35, %v3227_v0  ;;  %v13512_v38 = vld [vmem:[%s14126_s23 + $0x460] sm:$0xf0]  ;;  %v10994_v35 = vor.u32 %v13507_v25, %v10991_v23  ;;  %v10803_v23 = vld [vmem:[%s14126_s23 + $0x4d0] sm:$0x11] }
 0x275   : > { %v13508_v2 = vld [vmem:[%s14126_s23 + $0x444] sm:$0xf]  ;;  %5265 = vmatpush.bf16.msra.mxu0 %v13559_v40  ;;  %5322 = vmatpush.bf16.msra.mxu2 %v13574_v4  ;;  %v4672_v4 = vpack.c.b16 %v4636_v34, %v4636_v34 }
 0x276   : > { %10188 = vst [vmem:[%s14477_s27 + $0x98] sm:$0xff] %v3308_v16  ;;  %4268 = vmatmul.bf16.gmra.mxu0 %v3633_v41  ;;  %v3283_v22 = vadd.f32 %v3282_v13, %v3255_v44  ;;  %v10999_v41 = vld [vmem:[%s14126_s23 + $0x464] sm:$0xf0]  ;;  %v10990_v16 = vor.u32 %v13511_v37, %v10989_v63  ;;  %v13647_v63 = vld [vmem:[%s14086_s21 + $0xbf8] sm:$0xff]  ;;  %v13644_v34 = vld [vmem:[%s14086_s21 + $0xbe0] sm:$0xff] }
 0x277   : > { %4296 = vmatmul.bf16.gmra.mxu1 %v3634_v46  ;;  %v11002_v44 = vor.u32 %v13508_v2, %v10999_v41  ;;  %5350 = vmatpush.bf16.msra.mxu3 %v13582_v11  ;;  %v4638_v2 = vunpack.c.h.b16 %v10803_v23  ;;  %v13596_v41 = vld [vmem:[%s14086_s21 + $0xb38] sm:$0xff] }
 0x278   : > { %4324 = vmatmul.bf16.gmra.mxu2 %v3635_v48  ;;  %5293 = vmatpush.bf16.msra.mxu1 %v13567_v14 }
 0x279   : > { %4352 = vmatmul.bf16.gmra.mxu3 %v3636_v26  ;;  %v10998_v26 = vor.u32 %v13512_v38, %v10997_v53  ;;  %5323 = vmatpush.bf16.msra.mxu2 %v13573_v61  ;;  %v4635_v53 = vunpack.c.l.b16 %v10802_v19  ;;  %v4637_v38 = vunpack.c.l.b16 %v10803_v23  ;;  %v4674_v61 = vpack.c.b16 %v4638_v2, %v4638_v2  ;;  %v13636_v19 = vld [vmem:[%s14086_s21 + $0xba0] sm:$0xff]  ;;  %v13501_v23 = vld [vmem:[%s14126_s23 + $0x40c] sm:$0xf] }
 0x27b   : > { %v3310_v33 = vpop.f32.mrf.mxu2  ;;  %v3256_v17 = vpop.f32.mrf.mxu0  ;;  %5351 = vmatpush.bf16.msra.mxu3 %v13581_v12  ;;  %v4671_v14 = vpack.c.b16 %v4635_v53, %v4635_v53  ;;  %v13637_v12 = vld [vmem:[%s14086_s21 + $0xba8] sm:$0xff]  ;;  %v10979_v53 = vld [vmem:[%s14126_s23 + $0x42c] sm:$0xf0] }
 0x27c   : > { %v15037_v56 = vpop.f32.mrf.mxu3  ;;  %v3311_v6 = vadd.f32 %v3310_v33, %v3283_v22  ;;  %v3284_v24 = vpop.f32.mrf.mxu1  ;;  %5294 = vmatpush.bf16.msra.mxu1 %v13566_v5  ;;  %v4673_v5 = vpack.c.b16 %v4637_v38, %v4637_v38 }
 0x27d   : > { %v13558_v24 = vld [vmem:[%s14086_s21 + $0xa08] sm:$0xff] }
 0x27e   : > { %10189 = vst [vmem:[%s14477_s27 + $0xa0] sm:$0x1] %v3311_v6  ;;  %5266 = vmatpush.bf16.msra.mxu0 %v13558_v24 }
 0x283   : > { %v3312_v3 = vpop.f32.mrf.mxu2  ;;  %v15052_v18 = vpop.f32.mrf.mxu0 }
 0x284   : > { %v4131_v36 = vpop.f32.mrf.mxu3  ;;  %v15054_v50 = vpop.f32.mrf.mxu1 }
 0x285   : > { %v11026_v36 = vor.u32 %v13520_v47, %v11025_v60  ;;  %v13595_v60 = vld [vmem:[%s14086_s21 + $0xb30] sm:$0xff] }
 0x286   : > { %5156 = vmatmul.bf16.vlgmr.msrb.gmra.mxu0 %v10954_v20  ;;  %v11030_v20 = vor.u32 %v13516_v31, %v11027_v52  ;;  %v13630_v47 = vld [vmem:[%s14086_s21 + $0xb70] sm:$0xff]  ;;  %v13645_v31 = vld [vmem:[%s14086_s21 + $0xbe8] sm:$0xff]  ;;  %v4143_v52 = vadd.f32 %v15052_v18, %v14952_v15  ;;  %v13504_v15 = vld [vmem:[%s14126_s23 + $0x420] sm:$0xf0] }
 0x287   : > { %5184 = vmatmul.bf16.vlgmr.msrb.gmra.mxu1 %v10958_v45  ;;  %v13557_v45 = vld [vmem:[%s14086_s21 + $0xa00] sm:$0xff] }
 0x288   : > { %5212 = vmatmul.bf16.vlgmr.msrb.gmra.mxu2 %v10962_v42  ;;  %v13565_v42 = vld [vmem:[%s14086_s21 + $0xa40] sm:$0xff]  ;;  %5267 = vmatpush.bf16.msra.mxu0 %v13557_v45  ;;  %v10971_v45 = vld [vmem:[%s14126_s23 + $0x424] sm:$0xf0] }
 0x289   : > { %5240 = vmatmul.bf16.vlgmr.msrb.gmra.mxu3 %v10966_v29  ;;  %5295 = vmatpush.bf16.msra.mxu1 %v13565_v42  ;;  %v13500_v18 = vld [vmem:[%s14126_s23 + $0x404] sm:$0xf]  ;;  %v10977_v42 = vld [vmem:[%s14126_s23 + $0x408] sm:$0xf] }
 0x28a   : > { %6219 = vmatpush.bf16.msrb.mxu2 %v13639_v57  ;;  %6247 = vmatpush.bf16.msrb.mxu3 %v13647_v63  ;;  %v13594_v57 = vld [vmem:[%s14086_s21 + $0xb28] sm:$0xff] }
 0x28b   : > { %v15060_v58 = vpop.f32.mrf.mxu2  ;;  %v15064_v43 = vpop.f32.mrf.mxu0  ;;  %v13629_v63 = vld [vmem:[%s14086_s21 + $0xb68] sm:$0xff] }
 0x28c   : > { %v15062_v39 = vpop.f32.mrf.mxu3  ;;  %v15066_v30 = vpop.f32.mrf.mxu1  ;;  %5372 = vmatpush.bf16.msrb.mxu0 %v13596_v41  ;;  %v4145_v38 = vadd.f32 %v15064_v43, %v14972_v54 }
 0x28e   : > { %v4173_v54 = vadd.f32 %v15066_v30, %v4145_v38 }
 0x290   : > { %5373 = vmatpush.bf16.msrb.mxu0 %v13595_v60  ;;  %v13628_v60 = vld [vmem:[%s14086_s21 + $0xb60] sm:$0xff] }
 0x293   : > { %v15080_v46 = vpop.f32.mrf.mxu2  ;;  %v15084_v13 = vpop.f32.mrf.mxu0 }
 0x294   : > { %v15082_v0 = vpop.f32.mrf.mxu3  ;;  %v15086_v48 = vpop.f32.mrf.mxu1  ;;  %5374 = vmatpush.bf16.msrb.mxu0 %v13594_v57  ;;  %v13592_v57 = vld [vmem:[%s14086_s21 + $0xb18] sm:$0xff] }
 0x296   : > { %5161 = vmatmul.bf16.gmra.mxu0 %v10990_v16  ;;  %v13631_v16 = vld [vmem:[%s14086_s21 + $0xb78] sm:$0xff] }
 0x297   : > { %5189 = vmatmul.bf16.gmra.mxu1 %v10994_v35  ;;  %v13638_v35 = vld [vmem:[%s14086_s21 + $0xbb0] sm:$0xff] }
 0x298   : > { %5217 = vmatmul.bf16.gmra.mxu2 %v10998_v26  ;;  %v13646_v26 = vld [vmem:[%s14086_s21 + $0xbf0] sm:$0xff]  ;;  %6191 = vmatpush.bf16.msrb.mxu1 %v13631_v16  ;;  %v10974_v16 = vor.u32 %v13500_v18, %v10971_v45  ;;  %v13513_v18 = vld [vmem:[%s14126_s23 + $0x468] sm:$0xf0] }
 0x299   : > { %5245 = vmatmul.bf16.gmra.mxu3 %v11002_v44  ;;  %6220 = vmatpush.bf16.msrb.mxu2 %v13638_v35  ;;  %v13509_v45 = vld [vmem:[%s14126_s23 + $0x44c] sm:$0xf] }
 0x29a   : > { %6248 = vmatpush.bf16.msrb.mxu3 %v13646_v26 }
 0x29b   : > { %v15092_v22 = vpop.f32.mrf.mxu2  ;;  %v15096_v6 = vpop.f32.mrf.mxu0 }
 0x29c   : > { %v15094_v33 = vpop.f32.mrf.mxu3  ;;  %v15098_v17 = vpop.f32.mrf.mxu1  ;;  %6192 = vmatpush.bf16.msrb.mxu1 %v13630_v47  ;;  %v13635_v47 = vld [vmem:[%s14086_s21 + $0xb98] sm:$0xff] }
 0x29d   : > { %6221 = vmatpush.bf16.msrb.mxu2 %v13637_v12  ;;  %v13643_v12 = vld [vmem:[%s14086_s21 + $0xbd8] sm:$0xff] }
 0x29e   : > { %6249 = vmatpush.bf16.msrb.mxu3 %v13645_v31 }
 0x2a0   : > { %6193 = vmatpush.bf16.msrb.mxu1 %v13629_v63  ;;  %v13627_v63 = vld [vmem:[%s14086_s21 + $0xb58] sm:$0xff] }
 0x2a1   : > { %6222 = vmatpush.bf16.msrb.mxu2 %v13636_v19  ;;  %v13634_v19 = vld [vmem:[%s14086_s21 + $0xb90] sm:$0xff] }
 0x2a2   : > { %6250 = vmatpush.bf16.msrb.mxu3 %v13644_v34  ;;  %v13642_v34 = vld [vmem:[%s14086_s21 + $0xbd0] sm:$0xff] }
 0x2a3   : > { %v15112_v51 = vpop.f32.mrf.mxu2  ;;  %v15118_v29 = vpop.f32.mrf.mxu0 }
 0x2a4   : > { %v15114_v3 = vpop.f32.mrf.mxu3  ;;  %v15120_v27 = vpop.f32.mrf.mxu1  ;;  %6194 = vmatpush.bf16.msrb.mxu1 %v13628_v60  ;;  %v13641_v60 = vld [vmem:[%s14086_s21 + $0xbc8] sm:$0xff] }
 0x2a5   : > { %6223 = vmatpush.bf16.msrb.mxu2 %v13635_v47  ;;  %v4153_v47 = vadd.f32 %v15118_v29, %v15016_v59 }
 0x2a6   : > { %5166 = vmatmul.bf16.gmra.mxu0 %v11026_v36  ;;  %v4171_v36 = vadd.f32 %v15054_v50, %v4143_v52  ;;  %6251 = vmatpush.bf16.msrb.mxu3 %v13643_v12 }
 0x2a7   : > { %5194 = vmatmul.bf16.gmra.mxu1 %v11030_v20  ;;  %v10969_v20 = vld [vmem:[%s14126_s23 + $0x400] sm:$0xf] }
 0x2a8   : > { %5222 = vmatmul.bf16.gmra.mxu2 %v11034_v8  ;;  %v13505_v8 = vld [vmem:[%s14126_s23 + $0x428] sm:$0xf0]  ;;  %v10970_v41 = vor.u32 %v13504_v15, %v10969_v20  ;;  %v11005_v15 = vld [vmem:[%s14126_s23 + $0x448] sm:$0xf]  ;;  %6195 = vmatpush.bf16.msrb.mxu1 %v13627_v63 }
 0x2a9   : > { %5250 = vmatmul.bf16.gmra.mxu3 %v11038_v21  ;;  %v4199_v21 = vadd.f32 %v15060_v58, %v4171_v36  ;;  %6224 = vmatpush.bf16.msrb.mxu2 %v13634_v19 }
 0x2aa   : > { %6252 = vmatpush.bf16.msrb.mxu3 %v13642_v34 }
 0x2ab   : > { %v15124_v37 = vpop.f32.mrf.mxu2  ;;  %v15128_v62 = vpop.f32.mrf.mxu0  ;;  %v4227_v58 = vadd.f32 %v15062_v39, %v4199_v21  ;;  %v4148_v39 = vadd.f32 %v15084_v13, %v14984_v9  ;;  %v13514_v21 = vld [vmem:[%s14126_s23 + $0x470] sm:$0xf0] }
 0x2ac   : > { %v15126_v25 = vpop.f32.mrf.mxu3  ;;  %v15130_v10 = vpop.f32.mrf.mxu1 }
 0x2ae   : > { %6253 = vmatpush.bf16.msrb.mxu3 %v13641_v60  ;;  %v13670_v60 = vld [vmem:[%s14086_s21 + $0xcb0] sm:$0xff] }
 0x2b3   : > { %v15138_v44 = vpop.f32.mrf.mxu2  ;;  %v15142_v11 = vpop.f32.mrf.mxu0 }
 0x2b4   : > { %v15140_v40 = vpop.f32.mrf.mxu3  ;;  %v15144_v24 = vpop.f32.mrf.mxu1 }
 0x2b6   : > { %5171 = vmatmul.bf16.gmra.mxu0 %v4671_v14  ;;  %v10978_v14 = vor.u32 %v13505_v8, %v10977_v42  ;;  %v11007_v42 = vld [vmem:[%s14126_s23 + $0x46c] sm:$0xf0] }
 0x2b7   : > { %5199 = vmatmul.bf16.gmra.mxu1 %v4672_v4  ;;  %v10982_v4 = vor.u32 %v13501_v23, %v10979_v53  ;;  %v11013_v8 = vld [vmem:[%s14126_s23 + $0x450] sm:$0xf]  ;;  %v13510_v23 = vld [vmem:[%s14126_s23 + $0x454] sm:$0xf]  ;;  %v11015_v53 = vld [vmem:[%s14126_s23 + $0x474] sm:$0xf0] }
 0x2b8   : > { %5227 = vmatmul.bf16.gmra.mxu2 %v4673_v5  ;;  %v4201_v5 = vadd.f32 %v15080_v46, %v4173_v54 }
 0x2b9   : > { %5255 = vmatmul.bf16.gmra.mxu3 %v4674_v61  ;;  %v13593_v61 = vld [vmem:[%s14086_s21 + $0xb20] sm:$0xff] }
 0x2ba   : > { %5375 = vmatpush.bf16.msrb.mxu0 %v13593_v61  ;;  %v4229_v52 = vadd.f32 %v15082_v0, %v4201_v5  ;;  %v13626_v5 = vld [vmem:[%s14086_s21 + $0xb50] sm:$0xff]  ;;  %v13633_v61 = vld [vmem:[%s14086_s21 + $0xb88] sm:$0xff] }
 0x2bb   : > { %v15152_v55 = vpop.f32.mrf.mxu2  ;;  %v4159_v32 = vpop.f32.mrf.mxu0  ;;  %6196 = vmatpush.bf16.msrb.mxu1 %v13626_v5  ;;  %6225 = vmatpush.bf16.msrb.mxu2 %v13633_v61  ;;  %v13663_v61 = vld [vmem:[%s14086_s21 + $0xc78] sm:$0xff] }
 0x2bc   : > { %v15154_v1 = vpop.f32.mrf.mxu3  ;;  %v4187_v28 = vpop.f32.mrf.mxu1 }
 0x2bd   : > { %v4176_v28 = vadd.f32 %v15086_v48, %v4148_v39  ;;  %v4150_v48 = vadd.f32 %v15096_v6, %v15004_v7  ;;  %v11014_v7 = vor.u32 %v13514_v21, %v11013_v8  ;;  %v11018_v6 = vor.u32 %v13510_v23, %v11015_v53  ;;  %v13519_v8 = vld [vmem:[%s14126_s23 + $0x49c] sm:$0xf]  ;;  %v13589_v23 = vld [vmem:[%s14086_s21 + $0xb00] sm:$0xff] }
 0x2be   : > { %5376 = vmatpush.bf16.msrb.mxu0 %v13592_v57  ;;  %v4155_v21 = vadd.f32 %v15128_v62, %v15029_v49  ;;  %v13624_v53 = vld [vmem:[%s14086_s21 + $0xb40] sm:$0xff] }
 0x2bf   : > { %v4204_v0 = vadd.f32 %v15092_v22, %v4176_v28  ;;  %v11043_v28 = vld [vmem:[%s14126_s23 + $0x4b4] sm:$0xf0] }
 0x2c0   : > { %v4183_v49 = vadd.f32 %v15130_v10, %v4155_v21 }
 0x2c1   : > { %v4232_v22 = vadd.f32 %v15094_v33, %v4204_v0  ;;  %v13591_v33 = vld [vmem:[%s14086_s21 + $0xb10] sm:$0xff] }
 0x2c2   : > { %5377 = vmatpush.bf16.msrb.mxu0 %v13591_v33 }
 0x2c3   : > { %v4215_v50 = vpop.f32.mrf.mxu2  ;;  %v4254_v35 = vpop.f32.mrf.mxu0 }
 0x2c4   : > { %v4243_v2 = vpop.f32.mrf.mxu3  ;;  %v4282_v26 = vpop.f32.mrf.mxu1  ;;  %v4255_v43 = vadd.f32 %v4254_v35, %v4227_v58 }
 0x2c6   : > { %5268 = vmatmul.bf16.vlgmr.msra.gmra.mxu0 %v10970_v41  ;;  %v4283_v31 = vadd.f32 %v4282_v26, %v4255_v43  ;;  %v11006_v41 = vor.u32 %v13513_v18, %v11005_v15  ;;  %v11049_v15 = vld [vmem:[%s14126_s23 + $0x498] sm:$0xf]  ;;  %v13632_v18 = vld [vmem:[%s14086_s21 + $0xb80] sm:$0xff] }
 0x2c7   : > { %5296 = vmatmul.bf16.vlgmr.msra.gmra.mxu1 %v10974_v16  ;;  %v11010_v16 = vor.u32 %v13509_v45, %v11007_v42  ;;  %v13640_v45 = vld [vmem:[%s14086_s21 + $0xbc0] sm:$0xff]  ;;  %v13523_v42 = vld [vmem:[%s14126_s23 + $0x4b8] sm:$0xf0]  ;;  %6226 = vmatpush.bf16.msrb.mxu2 %v13632_v18 }
 0x2c8   : > { %5324 = vmatmul.bf16.vlgmr.msra.gmra.mxu2 %v10978_v14  ;;  %v4178_v14 = vadd.f32 %v15098_v17, %v4150_v48  ;;  %6254 = vmatpush.bf16.msrb.mxu3 %v13640_v45 }
 0x2c9   : > { %5352 = vmatmul.bf16.vlgmr.msra.gmra.mxu3 %v10982_v4 }
 0x2ca   : > { %v4206_v43 = vadd.f32 %v15112_v51, %v4178_v14 }
 0x2cb   : > { %v4310_v30 = vpop.f32.mrf.mxu2  ;;  %v4256_v9 = vpop.f32.mrf.mxu0 }
 0x2cc   : > { %v4338_v46 = vpop.f32.mrf.mxu3  ;;  %v4311_v32 = vadd.f32 %v4310_v30, %v4283_v31  ;;  %v4284_v13 = vpop.f32.mrf.mxu1  ;;  %v4257_v20 = vadd.f32 %v4256_v9, %v4229_v52  ;;  %v4234_v39 = vadd.f32 %v15114_v3, %v4206_v43  ;;  %v4181_v30 = vadd.f32 %v15120_v27, %v4153_v47  ;;  %v13522_v9 = vld [vmem:[%s14126_s23 + $0x4b0] sm:$0xf0]  ;;  %v11051_v27 = vld [vmem:[%s14126_s23 + $0x4bc] sm:$0xf0] }
 0x2cd   : > { %v10805_v43 = vld [vmem:[%s14126_s23 + $0x4e0] sm:$0x11] }
 0x2ce   : > { %v4339_v36 = vadd.f32 %v4338_v46, %v4311_v32  ;;  %v4285_v38 = vadd.f32 %v4284_v13, %v4257_v20  ;;  %v11041_v32 = vld [vmem:[%s14126_s23 + $0x490] sm:$0xf]  ;;  %v13518_v13 = vld [vmem:[%s14126_s23 + $0x494] sm:$0xf]  ;;  %v13625_v20 = vld [vmem:[%s14086_s21 + $0xb48] sm:$0xff]  ;;  %v4209_v3 = vadd.f32 %v15124_v37, %v4181_v30 }
 0x2cf   : > { %6197 = vmatpush.bf16.msrb.mxu1 %v13625_v20  ;;  %v11042_v37 = vor.u32 %v13522_v9, %v11041_v32  ;;  %v11046_v19 = vor.u32 %v13518_v13, %v11043_v28  ;;  %v13654_v20 = vld [vmem:[%s14086_s21 + $0xc30] sm:$0xff] }
 0x2d0   : > { %10765 = vst [vmem:[%s14477_s27 + $0xa8] sm:$0xff] %v4339_v36  ;;  %v13590_v36 = vld [vmem:[%s14086_s21 + $0xb08] sm:$0xff]  ;;  %v4237_v34 = vadd.f32 %v15126_v25, %v4209_v3  ;;  %v13671_v25 = vld [vmem:[%s14086_s21 + $0xcb8] sm:$0xff]  ;;  %v13662_v3 = vld [vmem:[%s14086_s21 + $0xc70] sm:$0xff] }
 0x2d1   : > { %5378 = vmatpush.bf16.msrb.mxu0 %v13590_v36  ;;  %6331 = vmatpush.bf16.msra.mxu2 %v13671_v25 }
 0x2d3   : > { %v4312_v50 = vpop.f32.mrf.mxu2  ;;  %v4259_v35 = vpop.f32.mrf.mxu0  ;;  %6198 = vmatpush.bf16.msrb.mxu1 %v13624_v53  ;;  %v11535_v53 = vld [vmem:[%s14126_s23 + $0x4ec] sm:$0xf] }
 0x2d4   : > { %v4340_v2 = vpop.f32.mrf.mxu3  ;;  %v4313_v58 = vadd.f32 %v4312_v50, %v4285_v38  ;;  %v4287_v26 = vpop.f32.mrf.mxu1  ;;  %v4260_v54 = vadd.f32 %v4259_v35, %v4232_v22  ;;  %v4211_v22 = vadd.f32 %v15138_v44, %v4183_v49  ;;  %v4158_v35 = vadd.f32 %v15142_v11, %v15037_v56  ;;  %v13655_v11 = vld [vmem:[%s14086_s21 + $0xc38] sm:$0xff] }
 0x2d5   : > { %5379 = vmatpush.bf16.msrb.mxu0 %v13589_v23  ;;  %6332 = vmatpush.bf16.msra.mxu2 %v13670_v60  ;;  %v13506_v23 = vld [vmem:[%s14126_s23 + $0x430] sm:$0xf0]  ;;  %v13659_v60 = vld [vmem:[%s14086_s21 + $0xc58] sm:$0xff] }
 0x2d6   : > { %v4341_v4 = vadd.f32 %v4340_v2, %v4313_v58  ;;  %5273 = vmatmul.bf16.gmra.mxu0 %v11006_v41  ;;  %v4288_v12 = vadd.f32 %v4287_v26, %v4260_v54  ;;  %v11050_v2 = vor.u32 %v13523_v42, %v11049_v15  ;;  %v11054_v41 = vor.u32 %v13519_v8, %v11051_v27  ;;  %v13679_v58 = vld [vmem:[%s14086_s21 + $0xcf8] sm:$0xff]  ;;  %v13669_v15 = vld [vmem:[%s14086_s21 + $0xca8] sm:$0xff] }
 0x2d7   : > { %5301 = vmatmul.bf16.gmra.mxu1 %v11010_v16  ;;  %6359 = vmatpush.bf16.msra.mxu3 %v13679_v58  ;;  %v4239_v44 = vadd.f32 %v15140_v40, %v4211_v22  ;;  %v10804_v54 = vld [vmem:[%s14126_s23 + $0x4d8] sm:$0x11]  ;;  %v4186_v33 = vadd.f32 %v15144_v24, %v4158_v35  ;;  %v4641_v40 = vunpack.c.l.b16 %v10805_v43 }
 0x2d8   : > { %10766 = vst [vmem:[%s14477_s27 + $0xb0] sm:$0xff] %v4341_v4  ;;  %5329 = vmatmul.bf16.gmra.mxu2 %v11014_v7  ;;  %v4639_v47 = vunpack.c.l.b16 %v10804_v54  ;;  %6303 = vmatpush.bf16.msra.mxu1 %v13663_v61  ;;  %v13651_v61 = vld [vmem:[%s14086_s21 + $0xc18] sm:$0xff] }
 0x2d9   : > { %5357 = vmatmul.bf16.gmra.mxu3 %v11018_v6  ;;  %6275 = vmatpush.bf16.msra.mxu0 %v13655_v11  ;;  %v4677_v9 = vpack.c.b16 %v4641_v40, %v4641_v40  ;;  %v11571_v40 = vld [vmem:[%s14126_s23 + $0x534] sm:$0xf] }
 0x2da   : > { %6333 = vmatpush.bf16.msra.mxu2 %v13669_v15  ;;  %v13650_v15 = vld [vmem:[%s14086_s21 + $0xc10] sm:$0xff] }
 0x2db   : > { %v4315_v17 = vpop.f32.mrf.mxu2  ;;  %v4261_v59 = vpop.f32.mrf.mxu0 }
 0x2dc   : > { %v4343_v51 = vpop.f32.mrf.mxu3  ;;  %v4316_v31 = vadd.f32 %v4315_v17, %v4288_v12  ;;  %v4289_v29 = vpop.f32.mrf.mxu1  ;;  %v4262_v52 = vadd.f32 %v4261_v59, %v4234_v39  ;;  %v4640_v12 = vunpack.c.h.b16 %v10804_v54  ;;  %v13678_v17 = vld [vmem:[%s14086_s21 + $0xcf0] sm:$0xff]  ;;  %v4642_v39 = vunpack.c.h.b16 %v10805_v43  ;;  %6304 = vmatpush.bf16.msra.mxu1 %v13662_v3 }
 0x2dd   : > { %6360 = vmatpush.bf16.msra.mxu3 %v13678_v17  ;;  %6276 = vmatpush.bf16.msra.mxu0 %v13654_v20  ;;  %v13515_v17 = vld [vmem:[%s14126_s23 + $0x478] sm:$0xf0] }
 0x2de   : > { %v4344_v46 = vadd.f32 %v4343_v51, %v4316_v31  ;;  %v4290_v0 = vadd.f32 %v4289_v29, %v4262_v52  ;;  %v4214_v51 = vadd.f32 %v15152_v55, %v4186_v33  ;;  %v4675_v29 = vpack.c.b16 %v4639_v47, %v4639_v47  ;;  %v13666_v47 = vld [vmem:[%s14086_s21 + $0xc90] sm:$0xff] }
 0x2df   : > { %v4676_v30 = vpack.c.b16 %v4640_v12, %v4640_v12  ;;  %v4678_v13 = vpack.c.b16 %v4642_v39, %v4642_v39  ;;  %v11021_v12 = vld [vmem:[%s14126_s23 + $0x458] sm:$0xf] }
 0x2e0   : > { %10767 = vst [vmem:[%s14477_s27 + $0xb8] sm:$0xff] %v4344_v46  ;;  %v4242_v46 = vadd.f32 %v15154_v1, %v4214_v51  ;;  %v13677_v1 = vld [vmem:[%s14086_s21 + $0xce8] sm:$0xff]  ;;  %v13674_v51 = vld [vmem:[%s14086_s21 + $0xcd0] sm:$0xff]  ;;  %v13610_v39 = vld [vmem:[%s14126_s23 + $0x554] sm:$0xf0] }
 0x2e1   : > { %6361 = vmatpush.bf16.msra.mxu3 %v13677_v1  ;;  %v13658_v1 = vld [vmem:[%s14086_s21 + $0xc50] sm:$0xff] }
 0x2e3   : > { %v4317_v57 = vpop.f32.mrf.mxu2  ;;  %v4264_v38 = vpop.f32.mrf.mxu0 }
 0x2e4   : > { %v4345_v63 = vpop.f32.mrf.mxu3  ;;  %v4318_v48 = vadd.f32 %v4317_v57, %v4290_v0  ;;  %v4292_v50 = vpop.f32.mrf.mxu1  ;;  %v4265_v16 = vadd.f32 %v4264_v38, %v4237_v34  ;;  %v10985_v57 = vld [vmem:[%s14126_s23 + $0x410] sm:$0xf]  ;;  %v13676_v34 = vld [vmem:[%s14086_s21 + $0xce0] sm:$0xff] }
 0x2e5   : > { %v13597_v38 = vld [vmem:[%s14126_s23 + $0x4f0] sm:$0xf]  ;;  %6362 = vmatpush.bf16.msra.mxu3 %v13676_v34  ;;  %v13524_v34 = vld [vmem:[%s14126_s23 + $0x4c0] sm:$0xf0] }
 0x2e6   : > { %v4346_v62 = vadd.f32 %v4345_v63, %v4318_v48  ;;  %5278 = vmatmul.bf16.gmra.mxu0 %v11042_v37  ;;  %v4293_v26 = vadd.f32 %v4292_v50, %v4265_v16  ;;  %v13653_v63 = vld [vmem:[%s14086_s21 + $0xc28] sm:$0xff]  ;;  %v13601_v48 = vld [vmem:[%s14126_s23 + $0x50c] sm:$0xf0]  ;;  %v11537_v50 = vld [vmem:[%s14126_s23 + $0x510] sm:$0xf0]  ;;  %v10986_v16 = vor.u32 %v13506_v23, %v10985_v57 }
 0x2e7   : > { %5306 = vmatmul.bf16.gmra.mxu1 %v11046_v19  ;;  %v13661_v37 = vld [vmem:[%s14086_s21 + $0xc68] sm:$0xff]  ;;  %v13668_v19 = vld [vmem:[%s14086_s21 + $0xca0] sm:$0xff]  ;;  %6277 = vmatpush.bf16.msra.mxu0 %v13653_v63  ;;  %v11536_v22 = vor.u32 %v13601_v48, %v11535_v53  ;;  %v11540_v35 = vor.u32 %v13597_v38, %v11537_v50  ;;  %v11607_v38 = vld [vmem:[%s14126_s23 + $0x57c] sm:$0xf] }
 0x2e8   : > { %10768 = vst [vmem:[%s14477_s27 + $0xc0] sm:$0xff] %v4346_v62  ;;  %5334 = vmatmul.bf16.gmra.mxu2 %v11050_v2  ;;  %6305 = vmatpush.bf16.msra.mxu1 %v13661_v37  ;;  %v11543_v2 = vld [vmem:[%s14126_s23 + $0x4f4] sm:$0xf]  ;;  %v13649_v37 = vld [vmem:[%s14086_s21 + $0xc08] sm:$0xff]  ;;  %v13664_v23 = vld [vmem:[%s14086_s21 + $0xc80] sm:$0xff] }
 0x2e9   : > { %5362 = vmatmul.bf16.gmra.mxu3 %v11054_v41  ;;  %v13602_v41 = vld [vmem:[%s14126_s23 + $0x514] sm:$0xf0]  ;;  %6334 = vmatpush.bf16.msra.mxu2 %v13668_v19  ;;  %v13657_v19 = vld [vmem:[%s14086_s21 + $0xc48] sm:$0xff]  ;;  %v11057_v53 = vld [vmem:[%s14126_s23 + $0x4a0] sm:$0xf] }
 0x2ea   : > { %v13672_v48 = vld [vmem:[%s14086_s21 + $0xcc0] sm:$0xff] }
 0x2eb   : > { %v4320_v10 = vpop.f32.mrf.mxu2  ;;  %v4266_v14 = vpop.f32.mrf.mxu0  ;;  %v13619_v50 = vld [vmem:[%s14126_s23 + $0x59c] sm:$0xf0] }
 0x2ec   : > { %v4348_v7 = vpop.f32.mrf.mxu3  ;;  %v4321_v6 = vadd.f32 %v4320_v10, %v4293_v26  ;;  %v4294_v4 = vpop.f32.mrf.mxu1  ;;  %v4267_v56 = vadd.f32 %v4266_v14, %v4239_v44  ;;  %v11544_v26 = vor.u32 %v13602_v41, %v11543_v2  ;;  %v13660_v44 = vld [vmem:[%s14086_s21 + $0xc60] sm:$0xff]  ;;  %v13675_v14 = vld [vmem:[%s14086_s21 + $0xcd8] sm:$0xff] }
 0x2ed   : > { %6306 = vmatpush.bf16.msra.mxu1 %v13660_v44  ;;  %6363 = vmatpush.bf16.msra.mxu3 %v13675_v14  ;;  %v13615_v2 = vld [vmem:[%s14126_s23 + $0x580] sm:$0xf]  ;;  %v11609_v41 = vld [vmem:[%s14126_s23 + $0x5a0] sm:$0xf0] }
 0x2ee   : > { %v4349_v5 = vadd.f32 %v4348_v7, %v4321_v6  ;;  %v4295_v24 = vadd.f32 %v4294_v4, %v4267_v56  ;;  %v13652_v7 = vld [vmem:[%s14086_s21 + $0xc20] sm:$0xff]  ;;  %v13667_v6 = vld [vmem:[%s14086_s21 + $0xc98] sm:$0xff] }
 0x2ef   : > { %6278 = vmatpush.bf16.msra.mxu0 %v13652_v7  ;;  %6335 = vmatpush.bf16.msra.mxu2 %v13667_v6  ;;  %v11612_v6 = vor.u32 %v13615_v2, %v11609_v41  ;;  %v13685_v2 = vld [vmem:[%s14086_s21 + $0xd28] sm:$0xff] }
 0x2f0   : > { %10769 = vst [vmem:[%s14477_s27 + $0xc8] sm:$0xff] %v4349_v5  ;;  %v13693_v41 = vld [vmem:[%s14086_s21 + $0xd68] sm:$0xff] }
 0x2f1   : > { %6307 = vmatpush.bf16.msra.mxu1 %v13659_v60  ;;  %6364 = vmatpush.bf16.msra.mxu3 %v13674_v51 }
 0x2f3   : > { %v4322_v31 = vpop.f32.mrf.mxu2  ;;  %v4269_v52 = vpop.f32.mrf.mxu0  ;;  %6279 = vmatpush.bf16.msra.mxu0 %v13651_v61  ;;  %6336 = vmatpush.bf16.msra.mxu2 %v13666_v47 }
 0x2f4   : > { %v4350_v59 = vpop.f32.mrf.mxu3  ;;  %v4323_v55 = vadd.f32 %v4322_v31, %v4295_v24  ;;  %v4297_v32 = vpop.f32.mrf.mxu1  ;;  %v4270_v36 = vadd.f32 %v4269_v52, %v4242_v46  ;;  %v13606_v24 = vld [vmem:[%s14126_s23 + $0x538] sm:$0xf]  ;;  %v11573_v31 = vld [vmem:[%s14126_s23 + $0x558] sm:$0xf0]  ;;  %v11572_v52 = vor.u32 %v13610_v39, %v11571_v40  ;;  %v15313_v40 = vld [vmem:[%s14126_s23 + $0x5cc] sm:$0x11] }
 0x2f5   : > { %6308 = vmatpush.bf16.msra.mxu1 %v13658_v1 }
 0x2f6   : > { %v4351_v28 = vadd.f32 %v4350_v59, %v4323_v55  ;;  %5283 = vmatmul.bf16.gmra.mxu0 %v4675_v29  ;;  %v4298_v18 = vadd.f32 %v4297_v32, %v4270_v36  ;;  %v11579_v59 = vld [vmem:[%s14126_s23 + $0x53c] sm:$0xf]  ;;  %v13611_v29 = vld [vmem:[%s14126_s23 + $0x55c] sm:$0xf0]  ;;  %v11022_v55 = vor.u32 %v13515_v17, %v11021_v12  ;;  %v10806_v12 = vld [vmem:[%s14126_s23 + $0x4e8] sm:$0x1] }
 0x2f7   : > { %5311 = vmatmul.bf16.gmra.mxu1 %v4676_v30  ;;  %v11580_v36 = vor.u32 %v13611_v29, %v11579_v59  ;;  %6280 = vmatpush.bf16.msra.mxu0 %v13650_v15  ;;  %v11384_v17 = vld [vmem:[%s14126_s23 + $0x5c4] sm:$0x11]  ;;  %v13687_v59 = vld [vmem:[%s14086_s21 + $0xd38] sm:$0xff] }
 0x2f8   : > { %10770 = vst [vmem:[%s14477_s27 + $0xd0] sm:$0xff] %v4351_v28  ;;  %5339 = vmatmul.bf16.gmra.mxu2 %v4677_v9  ;;  %v11576_v28 = vor.u32 %v13606_v24, %v11573_v31  ;;  %v4643_v24 = vunpack.c.l.b16 %v10806_v12  ;;  %v5678_v31 = vunpack.c.l.b16 %v11384_v17  ;;  %v13695_v29 = vld [vmem:[%s14086_s21 + $0xd78] sm:$0xff] }
 0x2f9   : > { %5367 = vmatmul.bf16.gmra.mxu3 %v4678_v13  ;;  %6309 = vmatpush.bf16.msra.mxu1 %v13657_v19 }
 0x2fb   : > { %v4325_v45 = vpop.f32.mrf.mxu2  ;;  %v4271_v27 = vpop.f32.mrf.mxu0  ;;  %6281 = vmatpush.bf16.msra.mxu0 %v13649_v37 }
 0x2fc   : > { %v4353_v42 = vpop.f32.mrf.mxu3  ;;  %v4326_v8 = vadd.f32 %v4325_v45, %v4298_v18  ;;  %v4299_v21 = vpop.f32.mrf.mxu1  ;;  %v13665_v18 = vld [vmem:[%s14086_s21 + $0xc88] sm:$0xff] }
 0x2fd   : > { %v13673_v45 = vld [vmem:[%s14086_s21 + $0xcc8] sm:$0xff]  ;;  %6337 = vmatpush.bf16.msra.mxu2 %v13665_v18 }
 0x2fe   : > { %v4354_v0 = vadd.f32 %v4353_v42, %v4326_v8  ;;  %6365 = vmatpush.bf16.msra.mxu3 %v13673_v45 }
 0x300   : > { %10771 = vst [vmem:[%s14477_s27 + $0xd8] sm:$0x1] %v4354_v0 }
 0x301   : > { %6338 = vmatpush.bf16.msra.mxu2 %v13664_v23 }
 0x302   : > { %6366 = vmatpush.bf16.msra.mxu3 %v13672_v48  ;;  %v13598_v48 = vld [vmem:[%s14126_s23 + $0x4f8] sm:$0xf] }
 0x303   : > { %v4327_v49 = vpop.f32.mrf.mxu2  ;;  %v5157_v25 = vpop.f32.mrf.mxu0 }
 0x304   : > { %v4355_v62 = vpop.f32.mrf.mxu3  ;;  %v5185_v58 = vpop.f32.mrf.mxu1  ;;  %v11615_v49 = vld [vmem:[%s14126_s23 + $0x584] sm:$0xf] }
 0x305   : > { %v5186_v10 = vadd.f32 %v5185_v58, %v5157_v25  ;;  %v13620_v62 = vld [vmem:[%s14126_s23 + $0x5a4] sm:$0xf0]  ;;  %v11058_v25 = vor.u32 %v13524_v34, %v11057_v53  ;;  %v11608_v58 = vor.u32 %v13619_v50, %v11607_v38  ;;  %v11545_v38 = vld [vmem:[%s14126_s23 + $0x518] sm:$0xf0] }
 0x306   : > { %5380 = vmatmul.bf16.vlgmr.msrb.gmra.mxu0 %v10986_v16  ;;  %v11616_v14 = vor.u32 %v13620_v62, %v11615_v49  ;;  %v11551_v50 = vld [vmem:[%s14126_s23 + $0x4fc] sm:$0xf]  ;;  %v13727_v49 = vld [vmem:[%s14086_s21 + $0xda0] sm:$0xff] }
 0x307   : > { %6199 = vmatmul.bf16.vlgmr.msrb.gmra.mxu1 %v11536_v22  ;;  %v13603_v62 = vld [vmem:[%s14126_s23 + $0x51c] sm:$0xf0] }
 0x308   : > { %6227 = vmatmul.bf16.vlgmr.msrb.gmra.mxu2 %v11540_v35  ;;  %v13648_v35 = vld [vmem:[%s14086_s21 + $0xc00] sm:$0xff] }
 0x309   : > { %6255 = vmatmul.bf16.vlgmr.msrb.gmra.mxu3 %v11544_v26  ;;  %v13656_v26 = vld [vmem:[%s14086_s21 + $0xc40] sm:$0xff]  ;;  %6282 = vmatpush.bf16.msra.mxu0 %v13648_v35  ;;  %v13604_v35 = vld [vmem:[%s14126_s23 + $0x524] sm:$0xf0] }
 0x30a   : > { %6310 = vmatpush.bf16.msra.mxu1 %v13656_v26 }
 0x30b   : > { %v5213_v4 = vpop.f32.mrf.mxu2  ;;  %v5159_v33 = vpop.f32.mrf.mxu0 }
 0x30c   : > { %v5241_v54 = vpop.f32.mrf.mxu3  ;;  %v5214_v43 = vadd.f32 %v5213_v4, %v5186_v10  ;;  %v5187_v5 = vpop.f32.mrf.mxu1 }
 0x30d   : > { %v5188_v56 = vadd.f32 %v5187_v5, %v5159_v33  ;;  %v13738_v33 = vld [vmem:[%s14086_s21 + $0xdf8] sm:$0xff]  ;;  %6387 = vmatpush.bf16.msrb.mxu0 %v13687_v59 }
 0x30e   : > { %v15270_v11 = vadd.f32 %v5241_v54, %v5214_v43  ;;  %v13730_v43 = vld [vmem:[%s14086_s21 + $0xdb8] sm:$0xff]  ;;  %7262 = vmatpush.bf16.msrb.mxu3 %v13738_v33  ;;  %6415 = vmatpush.bf16.msrb.mxu1 %v13695_v29  ;;  %v13684_v33 = vld [vmem:[%s14086_s21 + $0xd20] sm:$0xff] }
 0x30f   : > { %7234 = vmatpush.bf16.msrb.mxu2 %v13730_v43  ;;  %v13683_v59 = vld [vmem:[%s14086_s21 + $0xd18] sm:$0xff] }
 0x310   : > { %v13691_v29 = vld [vmem:[%s14086_s21 + $0xd58] sm:$0xff] }
 0x313   : > { %v5215_v30 = vpop.f32.mrf.mxu2  ;;  %v5162_v9 = vpop.f32.mrf.mxu0 }
 0x314   : > { %v5243_v46 = vpop.f32.mrf.mxu3  ;;  %v5216_v32 = vadd.f32 %v5215_v30, %v5188_v56  ;;  %v5190_v13 = vpop.f32.mrf.mxu1  ;;  %v13729_v30 = vld [vmem:[%s14086_s21 + $0xdb0] sm:$0xff] }
 0x315   : > { %v5191_v20 = vadd.f32 %v5190_v13, %v5162_v9  ;;  %7235 = vmatpush.bf16.msrb.mxu2 %v13729_v30  ;;  %v4679_v13 = vpack.c.b16 %v4643_v24, %v4643_v24  ;;  %v11581_v24 = vld [vmem:[%s14126_s23 + $0x560] sm:$0xf0]  ;;  %v13725_v30 = vld [vmem:[%s14086_s21 + $0xd90] sm:$0xff] }
 0x316   : > { %v15284_v3 = vadd.f32 %v5243_v46, %v5216_v32  ;;  %5385 = vmatmul.bf16.gmra.mxu0 %v11022_v55  ;;  %v5679_v46 = vunpack.c.h.b16 %v11384_v17  ;;  %v5680_v55 = vunpack.c.l.b16 %v15313_v40 }
 0x317   : > { %6204 = vmatmul.bf16.gmra.mxu1 %v11572_v52  ;;  %v13737_v52 = vld [vmem:[%s14086_s21 + $0xdf0] sm:$0xff] }
 0x318   : > { %6232 = vmatmul.bf16.gmra.mxu2 %v11576_v28  ;;  %7263 = vmatpush.bf16.msrb.mxu3 %v13737_v52  ;;  %v5714_v28 = vpack.c.b16 %v5678_v31, %v5678_v31  ;;  %v5715_v1 = vpack.c.b16 %v5679_v46, %v5679_v46  ;;  %v5716_v18 = vpack.c.b16 %v5680_v55, %v5680_v55  ;;  %v11587_v31 = vld [vmem:[%s14126_s23 + $0x544] sm:$0xf]  ;;  %v13612_v46 = vld [vmem:[%s14126_s23 + $0x564] sm:$0xf0]  ;;  %v13733_v52 = vld [vmem:[%s14086_s21 + $0xdd0] sm:$0xff] }
 0x319   : > { %6260 = vmatmul.bf16.gmra.mxu3 %v11580_v36  ;;  %v13608_v55 = vld [vmem:[%s14126_s23 + $0x548] sm:$0xf] }
 0x31b   : > { %v5218_v42 = vpop.f32.mrf.mxu2  ;;  %v5164_v21 = vpop.f32.mrf.mxu0 }
 0x31c   : > { %v5246_v8 = vpop.f32.mrf.mxu3  ;;  %v5219_v27 = vadd.f32 %v5218_v42, %v5191_v20  ;;  %v5192_v0 = vpop.f32.mrf.mxu1 }
 0x31d   : > { %v5193_v57 = vadd.f32 %v5192_v0, %v5164_v21  ;;  %v13728_v21 = vld [vmem:[%s14086_s21 + $0xda8] sm:$0xff] }
 0x31e   : > { %v15290_v63 = vadd.f32 %v5246_v8, %v5219_v27  ;;  %v13686_v8 = vld [vmem:[%s14086_s21 + $0xd30] sm:$0xff]  ;;  %v13736_v0 = vld [vmem:[%s14086_s21 + $0xde8] sm:$0xff]  ;;  %7236 = vmatpush.bf16.msrb.mxu2 %v13728_v21 }
 0x31f   : > { %v13694_v27 = vld [vmem:[%s14086_s21 + $0xd70] sm:$0xff]  ;;  %6388 = vmatpush.bf16.msrb.mxu0 %v13686_v8  ;;  %7264 = vmatpush.bf16.msrb.mxu3 %v13736_v0  ;;  %v13724_v0 = vld [vmem:[%s14086_s21 + $0xd88] sm:$0xff] }
 0x320   : > { %6416 = vmatpush.bf16.msrb.mxu1 %v13694_v27  ;;  %v13682_v27 = vld [vmem:[%s14086_s21 + $0xd10] sm:$0xff] }
 0x321   : > { %v13690_v21 = vld [vmem:[%s14086_s21 + $0xd50] sm:$0xff] }
 0x322   : > { %7237 = vmatpush.bf16.msrb.mxu2 %v13727_v49  ;;  %v13731_v49 = vld [vmem:[%s14086_s21 + $0xdc0] sm:$0xff] }
 0x323   : > { %v5220_v16 = vpop.f32.mrf.mxu2  ;;  %v5167_v7 = vpop.f32.mrf.mxu0  ;;  %6389 = vmatpush.bf16.msrb.mxu0 %v13685_v2  ;;  %v13616_v2 = vld [vmem:[%s14126_s23 + $0x588] sm:$0xf] }
 0x324   : > { %v5248_v22 = vpop.f32.mrf.mxu3  ;;  %v5221_v10 = vadd.f32 %v5220_v16, %v5193_v57  ;;  %v5195_v44 = vpop.f32.mrf.mxu1  ;;  %v13599_v16 = vld [vmem:[%s14126_s23 + $0x500] sm:$0xf]  ;;  %6417 = vmatpush.bf16.msrb.mxu1 %v13693_v41  ;;  %v11617_v41 = vld [vmem:[%s14126_s23 + $0x5a8] sm:$0xf0] }
 0x325   : > { %v5196_v4 = vadd.f32 %v5195_v44, %v5167_v7  ;;  %v11548_v7 = vor.u32 %v13598_v48, %v11545_v38  ;;  %v11552_v44 = vor.u32 %v13603_v62, %v11551_v50  ;;  %v13681_v48 = vld [vmem:[%s14086_s21 + $0xd08] sm:$0xff]  ;;  %v13723_v50 = vld [vmem:[%s14086_s21 + $0xd80] sm:$0xff] }
 0x326   : > { %v15306_v54 = vadd.f32 %v5248_v22, %v5221_v10  ;;  %5390 = vmatmul.bf16.gmra.mxu0 %v11058_v25  ;;  %v13735_v22 = vld [vmem:[%s14086_s21 + $0xde0] sm:$0xff]  ;;  %v13689_v38 = vld [vmem:[%s14086_s21 + $0xd48] sm:$0xff] }
 0x327   : > { %6209 = vmatmul.bf16.gmra.mxu1 %v11608_v58  ;;  %v11553_v25 = vld [vmem:[%s14126_s23 + $0x520] sm:$0xf0]  ;;  %7265 = vmatpush.bf16.msrb.mxu3 %v13735_v22  ;;  %v11623_v62 = vld [vmem:[%s14126_s23 + $0x58c] sm:$0xf]  ;;  %v13617_v22 = vld [vmem:[%s14126_s23 + $0x590] sm:$0xf] }
 0x328   : > { %6237 = vmatmul.bf16.gmra.mxu2 %v11612_v6  ;;  %v11559_v58 = vld [vmem:[%s14126_s23 + $0x504] sm:$0xf]  ;;  %6390 = vmatpush.bf16.msrb.mxu0 %v13684_v33 }
 0x329   : > { %6265 = vmatmul.bf16.gmra.mxu3 %v11616_v14  ;;  %v11560_v43 = vor.u32 %v13604_v35, %v11559_v58  ;;  %v11631_v58 = vld [vmem:[%s14126_s23 + $0x594] sm:$0xf]  ;;  %v13622_v35 = vld [vmem:[%s14126_s23 + $0x5b4] sm:$0xf0] }
 0x32b   : > { %v5223_v5 = vpop.f32.mrf.mxu2  ;;  %v5169_v60 = vpop.f32.mrf.mxu0 }
 0x32c   : > { %v5251_v56 = vpop.f32.mrf.mxu3  ;;  %v5224_v61 = vadd.f32 %v5223_v5, %v5196_v4  ;;  %v5197_v47 = vpop.f32.mrf.mxu1  ;;  %v11556_v4 = vor.u32 %v13599_v16, %v11553_v25  ;;  %v13692_v5 = vld [vmem:[%s14086_s21 + $0xd60] sm:$0xff]  ;;  %6391 = vmatpush.bf16.msrb.mxu0 %v13683_v59  ;;  %v13621_v16 = vld [vmem:[%s14126_s23 + $0x5ac] sm:$0xf0]  ;;  %v11625_v25 = vld [vmem:[%s14126_s23 + $0x5b0] sm:$0xf0] }
 0x32d   : > { %v5198_v51 = vadd.f32 %v5197_v47, %v5169_v60  ;;  %6418 = vmatpush.bf16.msrb.mxu1 %v13692_v5 }
 0x32e   : > { %v15315_v39 = vadd.f32 %v5251_v56, %v5224_v61  ;;  %v13726_v56 = vld [vmem:[%s14086_s21 + $0xd98] sm:$0xff] }
 0x32f   : > { %v13734_v61 = vld [vmem:[%s14086_s21 + $0xdd8] sm:$0xff]  ;;  %7238 = vmatpush.bf16.msrb.mxu2 %v13726_v56  ;;  %v11628_v56 = vor.u32 %v13617_v22, %v11625_v25 }
 0x330   : > { %7266 = vmatpush.bf16.msrb.mxu3 %v13734_v61  ;;  %6392 = vmatpush.bf16.msrb.mxu0 %v13682_v27  ;;  %v11632_v61 = vor.u32 %v13622_v35, %v11631_v58 }
 0x331   : > { %6419 = vmatpush.bf16.msrb.mxu1 %v13691_v29 }
 0x333   : > { %v5225_v32 = vpop.f32.mrf.mxu2  ;;  %v5172_v20 = vpop.f32.mrf.mxu0  ;;  %7239 = vmatpush.bf16.msrb.mxu2 %v13725_v30 }
 0x334   : > { %v5253_v9 = vpop.f32.mrf.mxu3  ;;  %v5226_v36 = vadd.f32 %v5225_v32, %v5198_v51  ;;  %v5200_v15 = vpop.f32.mrf.mxu1  ;;  %v13607_v51 = vld [vmem:[%s14126_s23 + $0x540] sm:$0xf]  ;;  %v11589_v32 = vld [vmem:[%s14126_s23 + $0x568] sm:$0xf0]  ;;  %7267 = vmatpush.bf16.msrb.mxu3 %v13733_v52  ;;  %6393 = vmatpush.bf16.msrb.mxu0 %v13681_v48  ;;  %v5681_v52 = vunpack.c.h.b16 %v15313_v40 }
 0x335   : > { %v5201_v45 = vadd.f32 %v5200_v15, %v5172_v20  ;;  %v11584_v20 = vor.u32 %v13607_v51, %v11581_v24  ;;  %v11588_v15 = vor.u32 %v13612_v46, %v11587_v31  ;;  %6420 = vmatpush.bf16.msrb.mxu1 %v13690_v21  ;;  %v13762_v51 = vld [vmem:[%s14086_s21 + $0xeb8] sm:$0xff] }
 0x336   : > { %v15322_v42 = vadd.f32 %v5253_v9, %v5226_v36  ;;  %5395 = vmatmul.bf16.gmra.mxu0 %v4679_v13  ;;  %v11595_v9 = vld [vmem:[%s14126_s23 + $0x54c] sm:$0xf]  ;;  %v13613_v13 = vld [vmem:[%s14126_s23 + $0x56c] sm:$0xf0]  ;;  %v13770_v24 = vld [vmem:[%s14086_s21 + $0xef8] sm:$0xff]  ;;  %v5717_v40 = vpack.c.b16 %v5681_v52, %v5681_v52 }
 0x337   : > { %6214 = vmatmul.bf16.gmra.mxu1 %v5714_v28  ;;  %v11596_v8 = vor.u32 %v13613_v13, %v11595_v9  ;;  %7240 = vmatpush.bf16.msrb.mxu2 %v13724_v0  ;;  %v11386_v46 = vld [vmem:[%s14126_s23 + $0x5d4] sm:$0x11] }
 0x338   : > { %6242 = vmatmul.bf16.gmra.mxu2 %v5715_v1  ;;  %v13746_v9 = vld [vmem:[%s14086_s21 + $0xe38] sm:$0xff] }
 0x339   : > { %6270 = vmatmul.bf16.gmra.mxu3 %v5716_v18  ;;  %6421 = vmatpush.bf16.msrb.mxu1 %v13689_v38  ;;  %v13754_v13 = vld [vmem:[%s14086_s21 + $0xe78] sm:$0xff] }
 0x33b   : > { %v5228_v57 = vpop.f32.mrf.mxu2  ;;  %v5174_v23 = vpop.f32.mrf.mxu0  ;;  %7241 = vmatpush.bf16.msrb.mxu2 %v13723_v50 }
 0x33c   : > { %v5256_v37 = vpop.f32.mrf.mxu3  ;;  %v5229_v19 = vadd.f32 %v5228_v57, %v5201_v45  ;;  %v5202_v53 = vpop.f32.mrf.mxu1  ;;  %v11592_v45 = vor.u32 %v13608_v55, %v11589_v32  ;;  %v13732_v57 = vld [vmem:[%s14086_s21 + $0xdc8] sm:$0xff]  ;;  %v15424_v55 = vld [vmem:[%s14126_s23 + $0x5dc] sm:$0x11]  ;;  %v5682_v32 = vunpack.c.l.b16 %v11386_v46 }
 0x33d   : > { %7268 = vmatpush.bf16.msrb.mxu3 %v13732_v57 }
 0x33e   : > { %v15328_v34 = vadd.f32 %v5256_v37, %v5229_v19  ;;  %v5718_v0 = vpack.c.b16 %v5682_v32, %v5682_v32  ;;  %v13700_v32 = vld [vmem:[%s14126_s23 + $0x608] sm:$0xf0] }
 0x341   : > { %7269 = vmatpush.bf16.msrb.mxu3 %v13731_v49  ;;  %v13760_v49 = vld [vmem:[%s14086_s21 + $0xea8] sm:$0xff] }
 0x343   : > { %v5230_v26 = vpop.f32.mrf.mxu2  ;;  %v15342_v6 = vpop.f32.mrf.mxu0 }
 0x344   : > { %v5258_v10 = vpop.f32.mrf.mxu3  ;;  %v15344_v14 = vpop.f32.mrf.mxu1 }
 0x346   : > { %6283 = vmatmul.bf16.vlgmr.msra.gmra.mxu0 %v11548_v7  ;;  %v11620_v7 = vor.u32 %v13616_v2, %v11617_v41  ;;  %v13745_v2 = vld [vmem:[%s14086_s21 + $0xe30] sm:$0xff] }
 0x347   : > { %6311 = vmatmul.bf16.vlgmr.msra.gmra.mxu1 %v11552_v44  ;;  %v11624_v44 = vor.u32 %v13621_v16, %v11623_v62  ;;  %v13753_v41 = vld [vmem:[%s14086_s21 + $0xe70] sm:$0xff]  ;;  %v13768_v62 = vld [vmem:[%s14086_s21 + $0xee8] sm:$0xff]  ;;  %v5270_v16 = vadd.f32 %v15342_v6, %v15270_v11 }
 0x348   : > { %6339 = vmatmul.bf16.vlgmr.msra.gmra.mxu2 %v11556_v4  ;;  %v13680_v4 = vld [vmem:[%s14086_s21 + $0xd00] sm:$0xff]  ;;  %v13600_v11 = vld [vmem:[%s14126_s23 + $0x508] sm:$0xf]  ;;  %v11561_v6 = vld [vmem:[%s14126_s23 + $0x528] sm:$0xf0] }
 0x349   : > { %6367 = vmatmul.bf16.vlgmr.msra.gmra.mxu3 %v11560_v43  ;;  %v13688_v43 = vld [vmem:[%s14086_s21 + $0xd40] sm:$0xff]  ;;  %6394 = vmatpush.bf16.msrb.mxu0 %v13680_v4 }
 0x34a   : > { %6422 = vmatpush.bf16.msrb.mxu1 %v13688_v43  ;;  %7346 = vmatpush.bf16.msra.mxu2 %v13762_v51  ;;  %v13744_v43 = vld [vmem:[%s14086_s21 + $0xe28] sm:$0xff]  ;;  %v13605_v51 = vld [vmem:[%s14126_s23 + $0x52c] sm:$0xf0] }
 0x34b   : > { %v15350_v60 = vpop.f32.mrf.mxu2  ;;  %v15354_v12 = vpop.f32.mrf.mxu0  ;;  %7374 = vmatpush.bf16.msra.mxu3 %v13770_v24  ;;  %v12117_v24 = vld [vmem:[%s14126_s23 + $0x5e8] sm:$0xf] }
 0x34c   : > { %v15352_v47 = vpop.f32.mrf.mxu3  ;;  %v15356_v17 = vpop.f32.mrf.mxu1  ;;  %v5272_v52 = vadd.f32 %v15354_v12, %v15284_v3  ;;  %v12118_v12 = vor.u32 %v13700_v32, %v12117_v24  ;;  %v12153_v24 = vld [vmem:[%s14126_s23 + $0x630] sm:$0xf]  ;;  %v13705_v32 = vld [vmem:[%s14126_s23 + $0x634] sm:$0xf] }
 0x34d   : > { %7290 = vmatpush.bf16.msra.mxu0 %v13746_v9  ;;  %v13696_v9 = vld [vmem:[%s14126_s23 + $0x5ec] sm:$0xf] }
 0x34e   : > { %7318 = vmatpush.bf16.msra.mxu1 %v13754_v13  ;;  %v12119_v13 = vld [vmem:[%s14126_s23 + $0x60c] sm:$0xf0] }
 0x351   : > { %7291 = vmatpush.bf16.msra.mxu0 %v13745_v2  ;;  %v13751_v2 = vld [vmem:[%s14086_s21 + $0xe60] sm:$0xff] }
 0x352   : > { %7319 = vmatpush.bf16.msra.mxu1 %v13753_v41  ;;  %v13758_v41 = vld [vmem:[%s14086_s21 + $0xe98] sm:$0xff] }
 0x353   : > { %v15370_v28 = vpop.f32.mrf.mxu2  ;;  %v15374_v1 = vpop.f32.mrf.mxu0 }
 0x354   : > { %v15372_v36 = vpop.f32.mrf.mxu3  ;;  %v15376_v18 = vpop.f32.mrf.mxu1 }
 0x355   : > { %7292 = vmatpush.bf16.msra.mxu0 %v13744_v43  ;;  %v13742_v43 = vld [vmem:[%s14086_s21 + $0xe18] sm:$0xff] }
 0x356   : > { %6288 = vmatmul.bf16.gmra.mxu0 %v11584_v20  ;;  %v13761_v20 = vld [vmem:[%s14086_s21 + $0xeb0] sm:$0xff] }
 0x357   : > { %6316 = vmatmul.bf16.gmra.mxu1 %v11588_v15  ;;  %v5683_v15 = vunpack.c.h.b16 %v11386_v46  ;;  %7347 = vmatpush.bf16.msra.mxu2 %v13761_v20  ;;  %v13767_v46 = vld [vmem:[%s14086_s21 + $0xee0] sm:$0xff] }
 0x358   : > { %6344 = vmatmul.bf16.gmra.mxu2 %v11592_v45  ;;  %v5684_v45 = vunpack.c.l.b16 %v15424_v55 }
 0x359   : > { %6372 = vmatmul.bf16.gmra.mxu3 %v11596_v8  ;;  %v13769_v8 = vld [vmem:[%s14086_s21 + $0xef0] sm:$0xff]  ;;  %v5719_v38 = vpack.c.b16 %v5683_v15, %v5683_v15  ;;  %v11564_v15 = vor.u32 %v13600_v11, %v11561_v6 }
 0x35a   : > { %7375 = vmatpush.bf16.msra.mxu3 %v13769_v8  ;;  %v5720_v50 = vpack.c.b16 %v5684_v45, %v5684_v45  ;;  %v13609_v6 = vld [vmem:[%s14126_s23 + $0x550] sm:$0xf] }
 0x35b   : > { %v15382_v37 = vpop.f32.mrf.mxu2  ;;  %v15386_v23 = vpop.f32.mrf.mxu0  ;;  %7348 = vmatpush.bf16.msra.mxu2 %v13760_v49  ;;  %v13766_v49 = vld [vmem:[%s14086_s21 + $0xed8] sm:$0xff] }
 0x35c   : > { %v15384_v19 = vpop.f32.mrf.mxu3  ;;  %v15388_v53 = vpop.f32.mrf.mxu1 }
 0x35e   : > { %7376 = vmatpush.bf16.msra.mxu3 %v13768_v62  ;;  %v5275_v62 = vadd.f32 %v15374_v1, %v15290_v63 }
 0x360   : > { %v5303_v63 = vadd.f32 %v15376_v18, %v5275_v62  ;;  %v5277_v18 = vadd.f32 %v15386_v23, %v15306_v54 }
 0x362   : > { %7377 = vmatpush.bf16.msra.mxu3 %v13767_v46  ;;  %v13765_v46 = vld [vmem:[%s14086_s21 + $0xed0] sm:$0xff] }
 0x363   : > { %v15402_v26 = vpop.f32.mrf.mxu2  ;;  %v15408_v33 = vpop.f32.mrf.mxu0 }
 0x364   : > { %v15404_v10 = vpop.f32.mrf.mxu3  ;;  %v15410_v5 = vpop.f32.mrf.mxu1 }
 0x366   : > { %6293 = vmatmul.bf16.gmra.mxu0 %v11620_v7  ;;  %v5298_v7 = vadd.f32 %v15344_v14, %v5270_v16  ;;  %7378 = vmatpush.bf16.msra.mxu3 %v13766_v49 }
 0x367   : > { %6321 = vmatmul.bf16.gmra.mxu1 %v11624_v44  ;;  %v11567_v44 = vld [vmem:[%s14126_s23 + $0x50c] sm:$0xf] }
 0x368   : > { %6349 = vmatmul.bf16.gmra.mxu2 %v11628_v56  ;;  %v5326_v4 = vadd.f32 %v15350_v60, %v5298_v7  ;;  %v13752_v56 = vld [vmem:[%s14086_s21 + $0xe68] sm:$0xff]  ;;  %v11568_v45 = vor.u32 %v13605_v51, %v11567_v44  ;;  %v11597_v44 = vld [vmem:[%s14126_s23 + $0x570] sm:$0xf0]  ;;  %v13614_v51 = vld [vmem:[%s14126_s23 + $0x574] sm:$0xf0] }
 0x369   : > { %6377 = vmatmul.bf16.gmra.mxu3 %v11632_v61  ;;  %v13759_v61 = vld [vmem:[%s14086_s21 + $0xea0] sm:$0xff]  ;;  %7320 = vmatpush.bf16.msra.mxu1 %v13752_v56  ;;  %v13750_v56 = vld [vmem:[%s14086_s21 + $0xe58] sm:$0xff] }
 0x36a   : > { %7349 = vmatpush.bf16.msra.mxu2 %v13759_v61  ;;  %v5354_v14 = vadd.f32 %v15352_v47, %v5326_v4  ;;  %v13743_v47 = vld [vmem:[%s14086_s21 + $0xe20] sm:$0xff]  ;;  %v5331_v4 = vadd.f32 %v15382_v37, %v5303_v63  ;;  %v13757_v61 = vld [vmem:[%s14086_s21 + $0xe90] sm:$0xff]  ;;  %7379 = vmatpush.bf16.msra.mxu3 %v13765_v46  ;;  %v11633_v63 = vld [vmem:[%s14126_s23 + $0x5b8] sm:$0xf0] }
 0x36b   : > { %v15414_v31 = vpop.f32.mrf.mxu2  ;;  %v15418_v29 = vpop.f32.mrf.mxu0  ;;  %7293 = vmatpush.bf16.msra.mxu0 %v13743_v47  ;;  %v13764_v47 = vld [vmem:[%s14086_s21 + $0xec8] sm:$0xff] }
 0x36c   : > { %v15416_v59 = vpop.f32.mrf.mxu3  ;;  %v15420_v30 = vpop.f32.mrf.mxu1  ;;  %v5359_v37 = vadd.f32 %v15384_v19, %v5331_v4  ;;  %v13718_v4 = vld [vmem:[%s14126_s23 + $0x698] sm:$0xf0] }
 0x36d   : > { %7321 = vmatpush.bf16.msra.mxu1 %v13751_v2  ;;  %v5280_v2 = vadd.f32 %v15408_v33, %v15315_v39 }
 0x36e   : > { %7350 = vmatpush.bf16.msra.mxu2 %v13758_v41  ;;  %7380 = vmatpush.bf16.msra.mxu3 %v13764_v47  ;;  %v13778_v47 = vld [vmem:[%s14086_s21 + $0xf38] sm:$0xff] }
 0x36f   : > { %7294 = vmatpush.bf16.msra.mxu0 %v13742_v43  ;;  %v5308_v39 = vadd.f32 %v15410_v5, %v5280_v2  ;;  %v12189_v5 = vld [vmem:[%s14126_s23 + $0x678] sm:$0xf]  ;;  %v13714_v43 = vld [vmem:[%s14126_s23 + $0x67c] sm:$0xf] }
 0x370   : > { %v13786_v2 = vld [vmem:[%s14086_s21 + $0xf78] sm:$0xff] }
 0x371   : > { %7322 = vmatpush.bf16.msra.mxu1 %v13750_v56  ;;  %v12191_v56 = vld [vmem:[%s14126_s23 + $0x69c] sm:$0xf0] }
 0x372   : > { %7351 = vmatpush.bf16.msra.mxu2 %v13757_v61 }
 0x373   : > { %v15432_v27 = vpop.f32.mrf.mxu2  ;;  %v15436_v57 = vpop.f32.mrf.mxu0 }
 0x374   : > { %v15434_v21 = vpop.f32.mrf.mxu3  ;;  %v15438_v48 = vpop.f32.mrf.mxu1 }
 0x376   : > { %6298 = vmatmul.bf16.gmra.mxu0 %v5717_v40  ;;  %v12122_v40 = vor.u32 %v13696_v9, %v12119_v13  ;;  %v12155_v9 = vld [vmem:[%s14126_s23 + $0x654] sm:$0xf0] }
 0x377   : > { %6326 = vmatmul.bf16.gmra.mxu1 %v5718_v0  ;;  %v5300_v0 = vadd.f32 %v15356_v17, %v5272_v52  ;;  %v13709_v52 = vld [vmem:[%s14126_s23 + $0x650] sm:$0xf0] }
 0x378   : > { %6354 = vmatmul.bf16.gmra.mxu2 %v5719_v38  ;;  %v12154_v23 = vor.u32 %v13709_v52, %v12153_v24  ;;  %v13747_v52 = vld [vmem:[%s14086_s21 + $0xe40] sm:$0xff] }
 0x379   : > { %6382 = vmatmul.bf16.gmra.mxu3 %v5720_v50  ;;  %v5328_v50 = vadd.f32 %v15370_v28, %v5300_v0  ;;  %v13741_v0 = vld [vmem:[%s14086_s21 + $0xe10] sm:$0xff] }
 0x37a   : > { %7295 = vmatpush.bf16.msra.mxu0 %v13741_v0 }
 0x37b   : > { %v15446_v22 = vpop.f32.mrf.mxu2  ;;  %v5286_v58 = vpop.f32.mrf.mxu0  ;;  %v5356_v17 = vadd.f32 %v15372_v36, %v5328_v50  ;;  %v11603_v36 = vld [vmem:[%s14126_s23 + $0x554] sm:$0xf]  ;;  %v13756_v50 = vld [vmem:[%s14086_s21 + $0xe88] sm:$0xff] }
 0x37c   : > { %v15448_v25 = vpop.f32.mrf.mxu3  ;;  %v5314_v35 = vpop.f32.mrf.mxu1  ;;  %7352 = vmatpush.bf16.msra.mxu2 %v13756_v50 }
 0x383   : > { %v5342_v60 = vpop.f32.mrf.mxu2  ;;  %v5381_v8 = vpop.f32.mrf.mxu0 }
 0x384   : > { %v5370_v20 = vpop.f32.mrf.mxu3  ;;  %v6200_v3 = vpop.f32.mrf.mxu1  ;;  %v5382_v38 = vadd.f32 %v5381_v8, %v5354_v14  ;;  %v11600_v60 = vor.u32 %v13609_v6, %v11597_v44  ;;  %v12158_v8 = vor.u32 %v13705_v32, %v12155_v9  ;;  %v11639_v6 = vld [vmem:[%s14126_s23 + $0x59c] sm:$0xf]  ;;  %v13623_v44 = vld [vmem:[%s14126_s23 + $0x5bc] sm:$0xf0] }
 0x385   : > { %v11604_v20 = vor.u32 %v13614_v51, %v11603_v36  ;;  %v5282_v36 = vadd.f32 %v15418_v29, %v15322_v42  ;;  %v11640_v46 = vor.u32 %v13623_v44, %v11639_v6  ;;  %v12190_v42 = vor.u32 %v13718_v4, %v12189_v5  ;;  %v13827_v6 = vld [vmem:[%s14086_s21 + $0xfe8] sm:$0xff] }
 0x386   : > { %11347 = vst [vmem:[%s14477_s27 + $0xe0] sm:$0xff] %v5382_v38  ;;  %6395 = vmatmul.bf16.vlgmr.msrb.gmra.mxu0 %v11564_v15  ;;  %v13749_v38 = vld [vmem:[%s14086_s21 + $0xe50] sm:$0xff]  ;;  %v12194_v29 = vor.u32 %v13714_v43, %v12191_v56 }
 0x387   : > { %6423 = vmatmul.bf16.vlgmr.msrb.gmra.mxu1 %v11568_v45 }
 0x388   : > { %7242 = vmatmul.bf16.vlgmr.msrb.gmra.mxu2 %v12118_v12  ;;  %7323 = vmatpush.bf16.msra.mxu1 %v13749_v38  ;;  %v11966_v38 = vld [vmem:[%s14126_s23 + $0x6c0] sm:$0x11] }
 0x389   : > { %7270 = vmatmul.bf16.vlgmr.msrb.gmra.mxu3 %v12122_v40 }
 0x38b   : > { %v6228_v28 = vpop.f32.mrf.mxu2  ;;  %v5383_v35 = vpop.f32.mrf.mxu0 }
 0x38c   : > { %v6256_v16 = vpop.f32.mrf.mxu3  ;;  %v6229_v58 = vadd.f32 %v6228_v28, %v6200_v3  ;;  %v6202_v7 = vpop.f32.mrf.mxu1  ;;  %v5384_v1 = vadd.f32 %v5383_v35, %v5356_v17  ;;  %v5305_v3 = vadd.f32 %v15388_v53, %v5277_v18  ;;  %v5336_v35 = vadd.f32 %v15414_v31, %v5308_v39  ;;  %v13739_v18 = vld [vmem:[%s14086_s21 + $0xe00] sm:$0xff] }
 0x38e   : > { %v15478_v11 = vadd.f32 %v6256_v16, %v6229_v58  ;;  %11348 = vst [vmem:[%s14477_s27 + $0xe8] sm:$0xff] %v5384_v1  ;;  %v5333_v19 = vadd.f32 %v15402_v26, %v5305_v3  ;;  %v13740_v16 = vld [vmem:[%s14086_s21 + $0xe08] sm:$0xff]  ;;  %v13763_v1 = vld [vmem:[%s14086_s21 + $0xec0] sm:$0xff]  ;;  %v5364_v31 = vadd.f32 %v15416_v59, %v5336_v35 }
 0x38f   : > { %v13748_v58 = vld [vmem:[%s14086_s21 + $0xe48] sm:$0xff]  ;;  %7296 = vmatpush.bf16.msra.mxu0 %v13740_v16  ;;  %7381 = vmatpush.bf16.msra.mxu3 %v13763_v1 }
 0x390   : > { %v5361_v53 = vadd.f32 %v15404_v10, %v5333_v19  ;;  %v13755_v10 = vld [vmem:[%s14086_s21 + $0xe80] sm:$0xff]  ;;  %7324 = vmatpush.bf16.msra.mxu1 %v13748_v58  ;;  %v13792_v1 = vld [vmem:[%s14086_s21 + $0xfa8] sm:$0xff] }
 0x391   : > { %7353 = vmatpush.bf16.msra.mxu2 %v13755_v10 }
 0x393   : > { %v6230_v13 = vpop.f32.mrf.mxu2  ;;  %v5386_v45 = vpop.f32.mrf.mxu0  ;;  %7297 = vmatpush.bf16.msra.mxu0 %v13739_v18  ;;  %v13791_v18 = vld [vmem:[%s14086_s21 + $0xfa0] sm:$0xff] }
 0x394   : > { %v6258_v14 = vpop.f32.mrf.mxu3  ;;  %v6231_v15 = vadd.f32 %v6230_v13, %v6202_v7  ;;  %v6205_v54 = vpop.f32.mrf.mxu1  ;;  %v5387_v12 = vadd.f32 %v5386_v45, %v5359_v37  ;;  %v13618_v7 = vld [vmem:[%s14126_s23 + $0x598] sm:$0xf]  ;;  %v5310_v13 = vadd.f32 %v15420_v30, %v5282_v36  ;;  %7325 = vmatpush.bf16.msra.mxu1 %v13747_v52  ;;  %v5285_v30 = vadd.f32 %v15436_v57, %v15328_v34 }
 0x395   : > { %v11636_v24 = vor.u32 %v13618_v7, %v11633_v63  ;;  %v13777_v63 = vld [vmem:[%s14086_s21 + $0xf30] sm:$0xff]  ;;  %v12127_v52 = vld [vmem:[%s14126_s23 + $0x614] sm:$0xf0] }
 0x396   : > { %v15498_v40 = vadd.f32 %v6258_v14, %v6231_v15  ;;  %11349 = vst [vmem:[%s14477_s27 + $0xf0] sm:$0xff] %v5387_v12  ;;  %6400 = vmatmul.bf16.gmra.mxu0 %v11600_v60  ;;  %v5338_v60 = vadd.f32 %v15432_v27, %v5310_v13  ;;  %v13829_v15 = vld [vmem:[%s14086_s21 + $0xff8] sm:$0xff]  ;;  %v11388_v12 = vld [vmem:[%s14126_s23 + $0x5e4] sm:$0x1]  ;;  %v5313_v19 = vadd.f32 %v15438_v48, %v5285_v30 }
 0x397   : > { %6428 = vmatmul.bf16.gmra.mxu1 %v11604_v20  ;;  %v13794_v20 = vld [vmem:[%s14086_s21 + $0xfb8] sm:$0xff]  ;;  %8277 = vmatpush.bf16.msrb.mxu3 %v13829_v15  ;;  %v5686_v57 = vunpack.c.l.b16 %v11388_v12 }
 0x398   : > { %7247 = vmatmul.bf16.gmra.mxu2 %v12154_v23  ;;  %v5366_v45 = vadd.f32 %v15434_v21, %v5338_v60  ;;  %v5341_v34 = vadd.f32 %v15446_v22, %v5313_v19  ;;  %v5685_v21 = vunpack.c.h.b16 %v15424_v55  ;;  %7402 = vmatpush.bf16.msrb.mxu0 %v13778_v47  ;;  %v13774_v47 = vld [vmem:[%s14086_s21 + $0xf18] sm:$0xff] }
 0x399   : > { %7275 = vmatmul.bf16.gmra.mxu3 %v12158_v8  ;;  %7458 = vmatpush.bf16.msrb.mxu2 %v13794_v20  ;;  %v5722_v55 = vpack.c.b16 %v5686_v57, %v5686_v57  ;;  %v13706_v57 = vld [vmem:[%s14126_s23 + $0x63c] sm:$0xf] }
 0x39a   : > { %7430 = vmatpush.bf16.msrb.mxu1 %v13786_v2  ;;  %v5369_v48 = vadd.f32 %v15448_v25, %v5341_v34  ;;  %v13785_v25 = vld [vmem:[%s14086_s21 + $0xf70] sm:$0xff]  ;;  %v12161_v34 = vld [vmem:[%s14126_s23 + $0x638] sm:$0xf] }
 0x39b   : > { %v6233_v26 = vpop.f32.mrf.mxu2  ;;  %v5388_v62 = vpop.f32.mrf.mxu0  ;;  %v13782_v2 = vld [vmem:[%s14086_s21 + $0xf58] sm:$0xff] }
 0x39c   : > { %v6261_v41 = vpop.f32.mrf.mxu3  ;;  %v6234_v49 = vadd.f32 %v6233_v26, %v6205_v54  ;;  %v6207_v17 = vpop.f32.mrf.mxu1  ;;  %v5389_v33 = vadd.f32 %v5388_v62, %v5361_v53  ;;  %v13793_v53 = vld [vmem:[%s14086_s21 + $0xfb0] sm:$0xff]  ;;  %v6721_v26 = vunpack.c.l.b16 %v11966_v38  ;;  %7403 = vmatpush.bf16.msrb.mxu0 %v13777_v63 }
 0x39d   : > { %7459 = vmatpush.bf16.msrb.mxu2 %v13793_v53  ;;  %v13789_v53 = vld [vmem:[%s14086_s21 + $0xf90] sm:$0xff] }
 0x39e   : > { %v15510_v28 = vadd.f32 %v6261_v41, %v6234_v49  ;;  %11350 = vst [vmem:[%s14477_s27 + $0xf8] sm:$0xff] %v5389_v33  ;;  %v6722_v41 = vunpack.c.h.b16 %v11966_v38  ;;  %v13828_v49 = vld [vmem:[%s14086_s21 + $0xff0] sm:$0xff]  ;;  %v6757_v58 = vpack.c.b16 %v6721_v26, %v6721_v26  ;;  %7431 = vmatpush.bf16.msrb.mxu1 %v13785_v25  ;;  %v12163_v26 = vld [vmem:[%s14126_s23 + $0x65c] sm:$0xf0] }
 0x39f   : > { %8278 = vmatpush.bf16.msrb.mxu3 %v13828_v49  ;;  %v13824_v49 = vld [vmem:[%s14086_s21 + $0xfd0] sm:$0xff] }
 0x3a0   : > { %v6758_v10 = vpack.c.b16 %v6722_v41, %v6722_v41  ;;  %v12169_v41 = vld [vmem:[%s14126_s23 + $0x640] sm:$0xf]  ;;  %v13773_v63 = vld [vmem:[%s14086_s21 + $0xf10] sm:$0xff] }
 0x3a1   : > { %7460 = vmatpush.bf16.msrb.mxu2 %v13792_v1  ;;  %v13781_v25 = vld [vmem:[%s14086_s21 + $0xf50] sm:$0xff]  ;;  %v13788_v1 = vld [vmem:[%s14086_s21 + $0xf88] sm:$0xff] }
 0x3a3   : > { %v6235_v61 = vpop.f32.mrf.mxu2  ;;  %v5391_v9 = vpop.f32.mrf.mxu0  ;;  %8279 = vmatpush.bf16.msrb.mxu3 %v13827_v6  ;;  %v13823_v6 = vld [vmem:[%s14086_s21 + $0xfc8] sm:$0xff] }
 0x3a4   : > { %v6263_v51 = vpop.f32.mrf.mxu3  ;;  %v6236_v32 = vadd.f32 %v6235_v61, %v6207_v17  ;;  %v6210_v37 = vpop.f32.mrf.mxu1  ;;  %v5392_v14 = vadd.f32 %v5391_v9, %v5364_v31  ;;  %v5721_v17 = vpack.c.b16 %v5685_v21, %v5685_v21  ;;  %v12125_v31 = vld [vmem:[%s14126_s23 + $0x5f0] sm:$0xf]  ;;  %v13701_v61 = vld [vmem:[%s14126_s23 + $0x610] sm:$0xf0]  ;;  %v13826_v9 = vld [vmem:[%s14086_s21 + $0xfe0] sm:$0xff] }
 0x3a5   : > { %7461 = vmatpush.bf16.msrb.mxu2 %v13791_v18  ;;  %v12126_v60 = vor.u32 %v13701_v61, %v12125_v31  ;;  %v13710_v21 = vld [vmem:[%s14126_s23 + $0x658] sm:$0xf0]  ;;  %v13780_v31 = vld [vmem:[%s14086_s21 + $0xf48] sm:$0xff]  ;;  %v13787_v61 = vld [vmem:[%s14086_s21 + $0xf80] sm:$0xff] }
 0x3a6   : > { %v15532_v59 = vadd.f32 %v6263_v51, %v6236_v32  ;;  %11351 = vst [vmem:[%s14477_s27 + $0x100] sm:$0xff] %v5392_v14  ;;  %6405 = vmatmul.bf16.gmra.mxu0 %v11636_v24  ;;  %v13697_v51 = vld [vmem:[%s14126_s23 + $0x5f4] sm:$0xf]  ;;  %v13776_v24 = vld [vmem:[%s14086_s21 + $0xf28] sm:$0xff]  ;;  %v12133_v32 = vld [vmem:[%s14126_s23 + $0x5f8] sm:$0xf] }
 0x3a7   : > { %6433 = vmatmul.bf16.gmra.mxu1 %v11640_v46  ;;  %v13784_v46 = vld [vmem:[%s14086_s21 + $0xf68] sm:$0xff]  ;;  %7404 = vmatpush.bf16.msrb.mxu0 %v13776_v24  ;;  %v12130_v20 = vor.u32 %v13697_v51, %v12127_v52  ;;  %v12197_v51 = vld [vmem:[%s14126_s23 + $0x680] sm:$0xf]  ;;  %v13719_v24 = vld [vmem:[%s14126_s23 + $0x6a0] sm:$0xf0] }
 0x3a8   : > { %7252 = vmatmul.bf16.gmra.mxu2 %v12190_v42  ;;  %v13698_v42 = vld [vmem:[%s14126_s23 + $0x5fc] sm:$0xf]  ;;  %7432 = vmatpush.bf16.msrb.mxu1 %v13784_v46  ;;  %v13822_v46 = vld [vmem:[%s14086_s21 + $0xfc0] sm:$0xff]  ;;  %v12199_v52 = vld [vmem:[%s14126_s23 + $0x6a4] sm:$0xf0] }
 0x3a9   : > { %7280 = vmatmul.bf16.gmra.mxu3 %v12194_v29  ;;  %v12135_v29 = vld [vmem:[%s14126_s23 + $0x61c] sm:$0xf0]  ;;  %v13715_v18 = vld [vmem:[%s14126_s23 + $0x684] sm:$0xf] }
 0x3aa   : > { %8280 = vmatpush.bf16.msrb.mxu3 %v13826_v9  ;;  %v13720_v9 = vld [vmem:[%s14126_s23 + $0x6a8] sm:$0xf0] }
 0x3ab   : > { %v6238_v27 = vpop.f32.mrf.mxu2  ;;  %v5393_v8 = vpop.f32.mrf.mxu0 }
 0x3ac   : > { %v6266_v54 = vpop.f32.mrf.mxu3  ;;  %v6239_v23 = vadd.f32 %v6238_v27, %v6210_v37  ;;  %v6212_v3 = vpop.f32.mrf.mxu1  ;;  %v5394_v0 = vadd.f32 %v5393_v8, %v5366_v45  ;;  %v13702_v37 = vld [vmem:[%s14126_s23 + $0x618] sm:$0xf0]  ;;  %v12138_v27 = vor.u32 %v13698_v42, %v12135_v29  ;;  %v12207_v42 = vld [vmem:[%s14126_s23 + $0x6ac] sm:$0xf0] }
 0x3ad   : > { %v12134_v45 = vor.u32 %v13702_v37, %v12133_v32  ;;  %v13790_v8 = vld [vmem:[%s14086_s21 + $0xf98] sm:$0xff]  ;;  %v12205_v32 = vld [vmem:[%s14126_s23 + $0x688] sm:$0xf]  ;;  %v13716_v37 = vld [vmem:[%s14126_s23 + $0x68c] sm:$0xf] }
 0x3ae   : > { %v15544_v50 = vadd.f32 %v6266_v54, %v6239_v23  ;;  %11352 = vst [vmem:[%s14477_s27 + $0x108] sm:$0xff] %v5394_v0  ;;  %v13775_v54 = vld [vmem:[%s14086_s21 + $0xf20] sm:$0xff]  ;;  %7462 = vmatpush.bf16.msrb.mxu2 %v13790_v8  ;;  %v12210_v8 = vor.u32 %v13716_v37, %v12207_v42 }
 0x3af   : > { %v13783_v23 = vld [vmem:[%s14086_s21 + $0xf60] sm:$0xff]  ;;  %7405 = vmatpush.bf16.msrb.mxu0 %v13775_v54 }
 0x3b0   : > { %7433 = vmatpush.bf16.msrb.mxu1 %v13783_v23  ;;  %v12206_v23 = vor.u32 %v13720_v9, %v12205_v32  ;;  %v12141_v42 = vld [vmem:[%s14126_s23 + $0x600] sm:$0xf] }
 0x3b2   : > { %7463 = vmatpush.bf16.msrb.mxu2 %v13789_v53  ;;  %v11967_v53 = vld [vmem:[%s14126_s23 + $0x6c8] sm:$0x11] }
 0x3b3   : > { %v6240_v22 = vpop.f32.mrf.mxu2  ;;  %v5396_v33 = vpop.f32.mrf.mxu0  ;;  %7406 = vmatpush.bf16.msrb.mxu0 %v13774_v47 }
 0x3b4   : > { %v6268_v62 = vpop.f32.mrf.mxu3  ;;  %v6241_v39 = vadd.f32 %v6240_v22, %v6212_v3  ;;  %v6215_v16 = vpop.f32.mrf.mxu1  ;;  %v5397_v35 = vadd.f32 %v5396_v33, %v5369_v48  ;;  %v13825_v3 = vld [vmem:[%s14086_s21 + $0xfd8] sm:$0xff]  ;;  %v13711_v48 = vld [vmem:[%s14126_s23 + $0x660] sm:$0xf0]  ;;  %7434 = vmatpush.bf16.msrb.mxu1 %v13782_v2  ;;  %v12166_v33 = vor.u32 %v13706_v57, %v12163_v26  ;;  %v11968_v26 = vld [vmem:[%s14126_s23 + $0x6d0] sm:$0x11] }
 0x3b5   : > { %8281 = vmatpush.bf16.msrb.mxu3 %v13825_v3  ;;  %v13707_v22 = vld [vmem:[%s14126_s23 + $0x644] sm:$0xf]  ;;  %v13853_v3 = vld [vmem:[%s14086_s21 + $0x10b8] sm:$0xff] }
 0x3b6   : > { %v15554_v7 = vadd.f32 %v6268_v62, %v6241_v39  ;;  %11353 = vst [vmem:[%s14477_s27 + $0x110] sm:$0x1] %v5397_v35  ;;  %6410 = vmatmul.bf16.gmra.mxu0 %v5721_v17  ;;  %v12171_v62 = vld [vmem:[%s14126_s23 + $0x664] sm:$0xf0]  ;;  %v12162_v39 = vor.u32 %v13710_v21, %v12161_v34  ;;  %7464 = vmatpush.bf16.msrb.mxu2 %v13788_v1  ;;  %v13861_v34 = vld [vmem:[%s14086_s21 + $0x10f8] sm:$0xff] }
 0x3b7   : > { %6438 = vmatmul.bf16.gmra.mxu1 %v5722_v55  ;;  %v12174_v35 = vor.u32 %v13707_v22, %v12171_v62  ;;  %7407 = vmatpush.bf16.msrb.mxu0 %v13773_v63  ;;  %v6726_v22 = vunpack.c.h.b16 %v11968_v26  ;;  %v13837_v62 = vld [vmem:[%s14086_s21 + $0x1038] sm:$0xff] }
 0x3b8   : > { %7257 = vmatmul.bf16.gmra.mxu2 %v6757_v58  ;;  %7435 = vmatpush.bf16.msrb.mxu1 %v13781_v25 }
 0x3b9   : > { %7285 = vmatmul.bf16.gmra.mxu3 %v6758_v10  ;;  %v12170_v10 = vor.u32 %v13711_v48, %v12169_v41  ;;  %v6723_v41 = vunpack.c.l.b16 %v11967_v53  ;;  %v6725_v48 = vunpack.c.l.b16 %v11968_v26  ;;  %v13835_v26 = vld [vmem:[%s14086_s21 + $0x1028] sm:$0xff] }
 0x3ba   : > { %8282 = vmatpush.bf16.msrb.mxu3 %v13824_v49  ;;  %7465 = vmatpush.bf16.msrb.mxu2 %v13787_v61  ;;  %v6724_v49 = vunpack.c.h.b16 %v11967_v53  ;;  %v6762_v61 = vpack.c.b16 %v6726_v22, %v6726_v22 }
 0x3bb   : > { %v6243_v44 = vpop.f32.mrf.mxu2  ;;  %v5398_v4 = vpop.f32.mrf.mxu0  ;;  %v6759_v25 = vpack.c.b16 %v6723_v41, %v6723_v41  ;;  %v13843_v41 = vld [vmem:[%s14086_s21 + $0x1068] sm:$0xff] }
 0x3bc   : > { %v6271_v5 = vpop.f32.mrf.mxu3  ;;  %v6244_v36 = vadd.f32 %v6243_v44, %v6215_v16  ;;  %v6217_v43 = vpop.f32.mrf.mxu1  ;;  %7436 = vmatpush.bf16.msrb.mxu1 %v13780_v31  ;;  %v6760_v1 = vpack.c.b16 %v6724_v49, %v6724_v49  ;;  %v6761_v31 = vpack.c.b16 %v6725_v48, %v6725_v48  ;;  %v13850_v49 = vld [vmem:[%s14086_s21 + $0x10a0] sm:$0xff] }
 0x3bd   : > { %v13772_v43 = vld [vmem:[%s14086_s21 + $0xf08] sm:$0xff]  ;;  %v13858_v48 = vld [vmem:[%s14086_s21 + $0x10e0] sm:$0xff] }
 0x3be   : > { %v15561_v56 = vadd.f32 %v6271_v5, %v6244_v36  ;;  %8283 = vmatpush.bf16.msrb.mxu3 %v13823_v6  ;;  %7408 = vmatpush.bf16.msrb.mxu0 %v13772_v43 }
 0x3c2   : > { %8284 = vmatpush.bf16.msrb.mxu3 %v13822_v46  ;;  %v13844_v46 = vld [vmem:[%s14086_s21 + $0x1070] sm:$0xff] }
 0x3c3   : > { %v6245_v13 = vpop.f32.mrf.mxu2  ;;  %v15575_v15 = vpop.f32.mrf.mxu0 }
 0x3c4   : > { %v6273_v14 = vpop.f32.mrf.mxu3  ;;  %v15577_v30 = vpop.f32.mrf.mxu1 }
 0x3c5   : > { %v12198_v14 = vor.u32 %v13719_v24, %v12197_v51  ;;  %v6285_v51 = vadd.f32 %v15575_v15, %v15478_v11  ;;  %v13836_v24 = vld [vmem:[%s14086_s21 + $0x1030] sm:$0xff] }
 0x3c6   : > { %7298 = vmatmul.bf16.vlgmr.msra.gmra.mxu0 %v12126_v60  ;;  %v12202_v60 = vor.u32 %v13715_v18, %v12199_v52  ;;  %v13851_v18 = vld [vmem:[%s14086_s21 + $0x10a8] sm:$0xff] }
 0x3c7   : > { %7326 = vmatmul.bf16.vlgmr.msra.gmra.mxu1 %v12130_v20  ;;  %v13771_v20 = vld [vmem:[%s14086_s21 + $0xf00] sm:$0xff]  ;;  %v13859_v52 = vld [vmem:[%s14086_s21 + $0x10e8] sm:$0xff]  ;;  %v6313_v15 = vadd.f32 %v15577_v30, %v6285_v51 }
 0x3c8   : > { %7354 = vmatmul.bf16.vlgmr.msra.gmra.mxu2 %v12134_v45  ;;  %v13779_v45 = vld [vmem:[%s14086_s21 + $0xf40] sm:$0xff]  ;;  %7409 = vmatpush.bf16.msrb.mxu0 %v13771_v20 }
 0x3c9   : > { %7382 = vmatmul.bf16.vlgmr.msra.gmra.mxu3 %v12138_v27  ;;  %7437 = vmatpush.bf16.msrb.mxu1 %v13779_v45  ;;  %v13699_v20 = vld [vmem:[%s14126_s23 + $0x604] sm:$0xf]  ;;  %v12143_v45 = vld [vmem:[%s14126_s23 + $0x624] sm:$0xf0] }
 0x3ca   : > { %8361 = vmatpush.bf16.msra.mxu2 %v13853_v3  ;;  %8389 = vmatpush.bf16.msra.mxu3 %v13861_v34  ;;  %v12699_v3 = vld [vmem:[%s14126_s23 + $0x6e4] sm:$0xf]  ;;  %v13799_v34 = vld [vmem:[%s14126_s23 + $0x704] sm:$0xf0] }
 0x3cb   : > { %v15583_v12 = vpop.f32.mrf.mxu2  ;;  %v15587_v0 = vpop.f32.mrf.mxu0  ;;  %v13834_v51 = vld [vmem:[%s14086_s21 + $0x1020] sm:$0xff] }
 0x3cc   : > { %v15585_v19 = vpop.f32.mrf.mxu3  ;;  %v15589_v38 = vpop.f32.mrf.mxu1  ;;  %8305 = vmatpush.bf16.msra.mxu0 %v13837_v62  ;;  %v6287_v53 = vadd.f32 %v15587_v0, %v15498_v40  ;;  %v12700_v40 = vor.u32 %v13799_v34, %v12699_v3  ;;  %v12735_v3 = vld [vmem:[%s14126_s23 + $0x72c] sm:$0xf]  ;;  %v13808_v34 = vld [vmem:[%s14126_s23 + $0x74c] sm:$0xf0] }
 0x3ce   : > { %v6315_v0 = vadd.f32 %v15589_v38, %v6287_v53 }
 0x3d0   : > { %8306 = vmatpush.bf16.msra.mxu0 %v13836_v24  ;;  %v13842_v24 = vld [vmem:[%s14086_s21 + $0x1060] sm:$0xff] }
 0x3d3   : > { %v15603_v17 = vpop.f32.mrf.mxu2  ;;  %v15607_v16 = vpop.f32.mrf.mxu0 }
 0x3d4   : > { %v15605_v55 = vpop.f32.mrf.mxu3  ;;  %v15609_v58 = vpop.f32.mrf.mxu1  ;;  %8307 = vmatpush.bf16.msra.mxu0 %v13835_v26  ;;  %v13833_v26 = vld [vmem:[%s14086_s21 + $0x1018] sm:$0xff] }
 0x3d6   : > { %7303 = vmatmul.bf16.gmra.mxu0 %v12162_v39  ;;  %v13845_v39 = vld [vmem:[%s14086_s21 + $0x1078] sm:$0xff] }
 0x3d7   : > { %7331 = vmatmul.bf16.gmra.mxu1 %v12166_v33  ;;  %v13852_v33 = vld [vmem:[%s14086_s21 + $0x10b0] sm:$0xff] }
 0x3d8   : > { %7359 = vmatmul.bf16.gmra.mxu2 %v12170_v10  ;;  %v13860_v10 = vld [vmem:[%s14086_s21 + $0x10f0] sm:$0xff]  ;;  %8333 = vmatpush.bf16.msra.mxu1 %v13845_v39 }
 0x3d9   : > { %7387 = vmatmul.bf16.gmra.mxu3 %v12174_v35  ;;  %8362 = vmatpush.bf16.msra.mxu2 %v13852_v33  ;;  %v12146_v33 = vor.u32 %v13699_v20, %v12143_v45  ;;  %v13708_v20 = vld [vmem:[%s14126_s23 + $0x64c] sm:$0xf]  ;;  %v12179_v45 = vld [vmem:[%s14126_s23 + $0x66c] sm:$0xf0] }
 0x3da   : > { %8390 = vmatpush.bf16.msra.mxu3 %v13860_v10  ;;  %8308 = vmatpush.bf16.msra.mxu0 %v13834_v51 }
 0x3db   : > { %v15615_v44 = vpop.f32.mrf.mxu2  ;;  %v15619_v36 = vpop.f32.mrf.mxu0 }
 0x3dc   : > { %v15617_v5 = vpop.f32.mrf.mxu3  ;;  %v15621_v4 = vpop.f32.mrf.mxu1  ;;  %8334 = vmatpush.bf16.msra.mxu1 %v13844_v46  ;;  %v13849_v46 = vld [vmem:[%s14086_s21 + $0x1098] sm:$0xff]  ;;  %v6292_v53 = vadd.f32 %v15619_v36, %v15532_v59  ;;  %v12736_v36 = vor.u32 %v13808_v34, %v12735_v3 }
 0x3dd   : > { %8363 = vmatpush.bf16.msra.mxu2 %v13851_v18  ;;  %v13857_v18 = vld [vmem:[%s14086_s21 + $0x10d8] sm:$0xff] }
 0x3de   : > { %8391 = vmatpush.bf16.msra.mxu3 %v13859_v52  ;;  %8309 = vmatpush.bf16.msra.mxu0 %v13833_v26  ;;  %v13838_v26 = vld [vmem:[%s14086_s21 + $0x1040] sm:$0xff] }
 0x3e0   : > { %8335 = vmatpush.bf16.msra.mxu1 %v13843_v41  ;;  %v13848_v41 = vld [vmem:[%s14086_s21 + $0x1090] sm:$0xff] }
 0x3e1   : > { %8364 = vmatpush.bf16.msra.mxu2 %v13850_v49  ;;  %v13856_v49 = vld [vmem:[%s14086_s21 + $0x10d0] sm:$0xff] }
 0x3e2   : > { %8392 = vmatpush.bf16.msra.mxu3 %v13858_v48 }
 0x3e3   : > { %v15635_v29 = vpop.f32.mrf.mxu2  ;;  %v15641_v27 = vpop.f32.mrf.mxu0 }
 0x3e4   : > { %v15637_v13 = vpop.f32.mrf.mxu3  ;;  %v15643_v54 = vpop.f32.mrf.mxu1  ;;  %8336 = vmatpush.bf16.msra.mxu1 %v13842_v24 }
 0x3e5   : > { %8365 = vmatpush.bf16.msra.mxu2 %v13849_v46  ;;  %v13831_v46 = vld [vmem:[%s14086_s21 + $0x1008] sm:$0xff] }
 0x3e6   : > { %7308 = vmatmul.bf16.gmra.mxu0 %v12198_v14  ;;  %v13703_v14 = vld [vmem:[%s14126_s23 + $0x620] sm:$0xf0]  ;;  %8393 = vmatpush.bf16.msra.mxu3 %v13857_v18  ;;  %v13839_v18 = vld [vmem:[%s14086_s21 + $0x1048] sm:$0xff] }
 0x3e7   : > { %7336 = vmatmul.bf16.gmra.mxu1 %v12202_v60  ;;  %v6341_v60 = vadd.f32 %v15583_v12, %v6313_v15  ;;  %v12142_v39 = vor.u32 %v13703_v14, %v12141_v42  ;;  %v12177_v15 = vld [vmem:[%s14126_s23 + $0x648] sm:$0xf]  ;;  %v13712_v42 = vld [vmem:[%s14126_s23 + $0x668] sm:$0xf0] }
 0x3e8   : > { %7364 = vmatmul.bf16.gmra.mxu2 %v12206_v23  ;;  %v12149_v23 = vld [vmem:[%s14126_s23 + $0x608] sm:$0xf] }
 0x3e9   : > { %7392 = vmatmul.bf16.gmra.mxu3 %v12210_v8  ;;  %v13704_v8 = vld [vmem:[%s14126_s23 + $0x628] sm:$0xf0]  ;;  %v6369_v22 = vadd.f32 %v15585_v19, %v6341_v60  ;;  %8366 = vmatpush.bf16.msra.mxu2 %v13848_v41 }
 0x3ea   : > { %8394 = vmatpush.bf16.msra.mxu3 %v13856_v49 }
 0x3eb   : > { %v15647_v21 = vpop.f32.mrf.mxu2  ;;  %v15651_v47 = vpop.f32.mrf.mxu0 }
 0x3ec   : > { %v15649_v57 = vpop.f32.mrf.mxu3  ;;  %v15653_v2 = vpop.f32.mrf.mxu1 }
 0x3f3   : > { %v15661_v35 = vpop.f32.mrf.mxu2  ;;  %v15665_v6 = vpop.f32.mrf.mxu0 }
 0x3f4   : > { %v15663_v63 = vpop.f32.mrf.mxu3  ;;  %v15667_v43 = vpop.f32.mrf.mxu1 }
 0x3f6   : > { %7313 = vmatmul.bf16.gmra.mxu0 %v6759_v25  ;;  %v12150_v25 = vor.u32 %v13704_v8, %v12149_v23  ;;  %v12185_v23 = vld [vmem:[%s14126_s23 + $0x650] sm:$0xf]  ;;  %v13713_v8 = vld [vmem:[%s14126_s23 + $0x670] sm:$0xf0] }
 0x3f7   : > { %7341 = vmatmul.bf16.gmra.mxu1 %v6760_v1  ;;  %v6343_v1 = vadd.f32 %v15603_v17, %v6315_v0  ;;  %v12186_v59 = vor.u32 %v13713_v8, %v12185_v23  ;;  %v6295_v0 = vadd.f32 %v15641_v27, %v15544_v50 }
 0x3f8   : > { %7369 = vmatmul.bf16.gmra.mxu2 %v6761_v31 }
 0x3f9   : > { %7397 = vmatmul.bf16.gmra.mxu3 %v6762_v61  ;;  %v6290_v61 = vadd.f32 %v15607_v16, %v15510_v28  ;;  %v6371_v38 = vadd.f32 %v15605_v55, %v6343_v1  ;;  %v13840_v1 = vld [vmem:[%s14086_s21 + $0x1050] sm:$0xff] }
 0x3fb   : > { %v15675_v32 = vpop.f32.mrf.mxu2  ;;  %v6301_v37 = vpop.f32.mrf.mxu0  ;;  %v6318_v55 = vadd.f32 %v15609_v58, %v6290_v61  ;;  %v13841_v58 = vld [vmem:[%s14086_s21 + $0x1058] sm:$0xff]  ;;  %v13855_v61 = vld [vmem:[%s14086_s21 + $0x10c8] sm:$0xff] }
 0x3fc   : > { %v15677_v9 = vpop.f32.mrf.mxu3  ;;  %v6329_v11 = vpop.f32.mrf.mxu1  ;;  %8337 = vmatpush.bf16.msra.mxu1 %v13841_v58  ;;  %8395 = vmatpush.bf16.msra.mxu3 %v13855_v61  ;;  %v13877_v61 = vld [vmem:[%s14086_s21 + $0x1178] sm:$0xff] }
 0x3fd   : > { %v6346_v14 = vadd.f32 %v15615_v44, %v6318_v55  ;;  %v12178_v44 = vor.u32 %v13712_v42, %v12177_v15  ;;  %v12213_v55 = vld [vmem:[%s14126_s23 + $0x690] sm:$0xf]  ;;  %v13717_v15 = vld [vmem:[%s14126_s23 + $0x694] sm:$0xf]  ;;  %v12215_v42 = vld [vmem:[%s14126_s23 + $0x6b4] sm:$0xf0] }
 0x3fe   : > { %v12218_v34 = vor.u32 %v13717_v15, %v12215_v42  ;;  %v13883_v15 = vld [vmem:[%s14086_s21 + $0x11a8] sm:$0xff] }
 0x3ff   : > { %v6374_v48 = vadd.f32 %v15617_v5, %v6346_v14  ;;  %v6320_v5 = vadd.f32 %v15621_v4, %v6292_v53  ;;  %v12221_v14 = vld [vmem:[%s14126_s23 + $0x698] sm:$0xf]  ;;  %v13830_v53 = vld [vmem:[%s14086_s21 + $0x1000] sm:$0xff]  ;;  %v13891_v42 = vld [vmem:[%s14086_s21 + $0x11e8] sm:$0xff] }
 0x400   : > { %8338 = vmatpush.bf16.msra.mxu1 %v13840_v1 }
 0x403   : > { %v6357_v30 = vpop.f32.mrf.mxu2  ;;  %v6396_v12 = vpop.f32.mrf.mxu0 }
 0x404   : > { %v6385_v62 = vpop.f32.mrf.mxu3  ;;  %v6424_v10 = vpop.f32.mrf.mxu1  ;;  %v6397_v19 = vadd.f32 %v6396_v12, %v6369_v22  ;;  %8339 = vmatpush.bf16.msra.mxu1 %v13839_v18 }
 0x405   : > { %v12182_v62 = vor.u32 %v13708_v20, %v12179_v45  ;;  %v12771_v20 = vld [vmem:[%s14126_s23 + $0x774] sm:$0xf]  ;;  %v13817_v45 = vld [vmem:[%s14126_s23 + $0x794] sm:$0xf0] }
 0x406   : > { %v6425_v31 = vadd.f32 %v6424_v10, %v6397_v19  ;;  %7410 = vmatmul.bf16.vlgmr.msrb.gmra.mxu0 %v12142_v39  ;;  %v13832_v19 = vld [vmem:[%s14086_s21 + $0x1010] sm:$0xff] }
 0x407   : > { %7438 = vmatmul.bf16.vlgmr.msrb.gmra.mxu1 %v12146_v33  ;;  %8310 = vmatpush.bf16.msra.mxu0 %v13832_v19 }
 0x408   : > { %7466 = vmatmul.bf16.vlgmr.msrb.gmra.mxu2 %v12150_v25  ;;  %11929 = vst [vmem:[%s14477_s27 + $0x118] sm:$0xff] %v6425_v31  ;;  %v6348_v25 = vadd.f32 %v15635_v29, %v6320_v5  ;;  %v13847_v31 = vld [vmem:[%s14086_s21 + $0x1088] sm:$0xff]  ;;  %8340 = vmatpush.bf16.msra.mxu1 %v13838_v26  ;;  %v13800_v26 = vld [vmem:[%s14126_s23 + $0x70c] sm:$0xf0] }
 0x409   : > { %8285 = vmatmul.bf16.vlgmr.msrb.gmra.mxu3 %v12700_v40  ;;  %8367 = vmatpush.bf16.msra.mxu2 %v13847_v31  ;;  %v13869_v31 = vld [vmem:[%s14086_s21 + $0x1138] sm:$0xff] }
 0x40a   : > { %v6376_v4 = vadd.f32 %v15637_v13, %v6348_v25  ;;  %v6323_v13 = vadd.f32 %v15643_v54, %v6295_v0  ;;  %v6297_v54 = vadd.f32 %v15651_v47, %v15554_v7  ;;  %v12772_v7 = vor.u32 %v13817_v45, %v12771_v20 }
 0x40b   : > { %v7243_v52 = vpop.f32.mrf.mxu2  ;;  %v6398_v28 = vpop.f32.mrf.mxu0  ;;  %8311 = vmatpush.bf16.msra.mxu0 %v13831_v46 }
 0x40c   : > { %v7271_v17 = vpop.f32.mrf.mxu3  ;;  %v6426_v16 = vpop.f32.mrf.mxu1  ;;  %v6399_v11 = vadd.f32 %v6398_v28, %v6371_v38  ;;  %v13846_v38 = vld [vmem:[%s14086_s21 + $0x1080] sm:$0xff]  ;;  %v6351_v28 = vadd.f32 %v15647_v21, %v6323_v13  ;;  %v6325_v47 = vadd.f32 %v15653_v2, %v6297_v54  ;;  %8445 = vmatpush.bf16.msrb.mxu1 %v13877_v61  ;;  %v13873_v61 = vld [vmem:[%s14086_s21 + $0x1158] sm:$0xff] }
 0x40d   : > { %v15706_v37 = vadd.f32 %v7271_v17, %v7243_v52  ;;  %v13854_v17 = vld [vmem:[%s14086_s21 + $0x10c0] sm:$0xff]  ;;  %8368 = vmatpush.bf16.msra.mxu2 %v13846_v38 }
 0x40e   : > { %v6427_v60 = vadd.f32 %v6426_v16, %v6399_v11  ;;  %v13721_v11 = vld [vmem:[%s14126_s23 + $0x6b0] sm:$0xf0]  ;;  %8396 = vmatpush.bf16.msra.mxu3 %v13854_v17  ;;  %v6379_v21 = vadd.f32 %v15649_v57, %v6351_v28  ;;  %v6353_v57 = vadd.f32 %v15661_v35, %v6325_v47  ;;  %v13801_v47 = vld [vmem:[%s14126_s23 + $0x714] sm:$0xf0] }
 0x40f   : > { %v12214_v3 = vor.u32 %v13721_v11, %v12213_v55  ;;  %8312 = vmatpush.bf16.msra.mxu0 %v13830_v53  ;;  %v13868_v11 = vld [vmem:[%s14086_s21 + $0x1130] sm:$0xff]  ;;  %v13882_v53 = vld [vmem:[%s14086_s21 + $0x11a0] sm:$0xff] }
 0x410   : > { %11930 = vst [vmem:[%s14477_s27 + $0x120] sm:$0xff] %v6427_v60  ;;  %v13722_v60 = vld [vmem:[%s14126_s23 + $0x6b8] sm:$0xf0]  ;;  %v6381_v2 = vadd.f32 %v15663_v63, %v6353_v57 }
 0x413   : > { %v7245_v22 = vpop.f32.mrf.mxu2  ;;  %v6401_v33 = vpop.f32.mrf.mxu0  ;;  %8417 = vmatpush.bf16.msrb.mxu0 %v13869_v31  ;;  %v13865_v31 = vld [vmem:[%s14086_s21 + $0x1118] sm:$0xff] }
 0x414   : > { %v7273_v30 = vpop.f32.mrf.mxu3  ;;  %v6429_v12 = vpop.f32.mrf.mxu1  ;;  %v6402_v10 = vadd.f32 %v6401_v33, %v6374_v48  ;;  %v12222_v48 = vor.u32 %v13722_v60, %v12221_v14  ;;  %v6300_v33 = vadd.f32 %v15665_v6, %v15561_v56  ;;  %v11970_v6 = vld [vmem:[%s14126_s23 + $0x6e0] sm:$0x1] }
 0x415   : > { %v15726_v39 = vadd.f32 %v7273_v30, %v7245_v22 }
 0x416   : > { %v6430_v40 = vadd.f32 %v6429_v12, %v6402_v10  ;;  %7415 = vmatmul.bf16.gmra.mxu0 %v12178_v44  ;;  %v13885_v44 = vld [vmem:[%s14086_s21 + $0x11b8] sm:$0xff]  ;;  %v6328_v25 = vadd.f32 %v15667_v43, %v6300_v33 }
 0x417   : > { %7443 = vmatmul.bf16.gmra.mxu1 %v12182_v62  ;;  %v13893_v62 = vld [vmem:[%s14086_s21 + $0x11f8] sm:$0xff]  ;;  %8473 = vmatpush.bf16.msrb.mxu2 %v13885_v44 }
 0x418   : > { %7471 = vmatmul.bf16.gmra.mxu2 %v12186_v59  ;;  %11931 = vst [vmem:[%s14477_s27 + $0x128] sm:$0xff] %v6430_v40  ;;  %8501 = vmatpush.bf16.msrb.mxu3 %v13893_v62  ;;  %v11969_v10 = vld [vmem:[%s14126_s23 + $0x6d8] sm:$0x11]  ;;  %v6356_v0 = vadd.f32 %v15675_v32, %v6328_v25 }
 0x419   : > { %8290 = vmatmul.bf16.gmra.mxu3 %v12736_v36  ;;  %v15776_v40 = vld [vmem:[%s14126_s23 + $0x7bc] sm:$0x11]  ;;  %v6727_v19 = vunpack.c.l.b16 %v11969_v10  ;;  %v6728_v1 = vunpack.c.h.b16 %v11969_v10  ;;  %8418 = vmatpush.bf16.msrb.mxu0 %v13868_v11  ;;  %v13864_v11 = vld [vmem:[%s14086_s21 + $0x1110] sm:$0xff] }
 0x41a   : > { %v6384_v43 = vadd.f32 %v15677_v9, %v6356_v0  ;;  %v13876_v9 = vld [vmem:[%s14086_s21 + $0x1170] sm:$0xff]  ;;  %v13889_v10 = vld [vmem:[%s14086_s21 + $0x11d8] sm:$0xff] }
 0x41b   : > { %v7248_v29 = vpop.f32.mrf.mxu2  ;;  %v6403_v50 = vpop.f32.mrf.mxu0  ;;  %v6763_v46 = vpack.c.b16 %v6727_v19, %v6727_v19  ;;  %v6764_v18 = vpack.c.b16 %v6728_v1, %v6728_v1  ;;  %8446 = vmatpush.bf16.msrb.mxu1 %v13876_v9  ;;  %v12737_v19 = vld [vmem:[%s14126_s23 + $0x750] sm:$0xf0] }
 0x41c   : > { %v7276_v51 = vpop.f32.mrf.mxu3  ;;  %v6431_v27 = vpop.f32.mrf.mxu1  ;;  %v6404_v52 = vadd.f32 %v6403_v50, %v6376_v4  ;;  %v13884_v4 = vld [vmem:[%s14086_s21 + $0x11b0] sm:$0xff] }
 0x41d   : > { %v15738_v24 = vadd.f32 %v7276_v51, %v7248_v29  ;;  %v6729_v29 = vunpack.c.l.b16 %v11970_v6  ;;  %v7764_v51 = vunpack.c.l.b16 %v15776_v40  ;;  %v13892_v50 = vld [vmem:[%s14086_s21 + $0x11f0] sm:$0xff]  ;;  %8474 = vmatpush.bf16.msrb.mxu2 %v13884_v4 }
 0x41e   : > { %v6432_v16 = vadd.f32 %v6431_v27, %v6404_v52  ;;  %8502 = vmatpush.bf16.msrb.mxu3 %v13892_v50  ;;  %v12743_v1 = vld [vmem:[%s14126_s23 + $0x734] sm:$0xf] }
 0x41f   : > { %v6765_v17 = vpack.c.b16 %v6729_v29, %v6729_v29  ;;  %v7800_v28 = vpack.c.b16 %v7764_v51, %v7764_v51  ;;  %v13880_v4 = vld [vmem:[%s14086_s21 + $0x1190] sm:$0xff]  ;;  %v13809_v29 = vld [vmem:[%s14126_s23 + $0x754] sm:$0xf0] }
 0x420   : > { %11932 = vst [vmem:[%s14477_s27 + $0x130] sm:$0xff] %v6432_v16  ;;  %v13805_v51 = vld [vmem:[%s14126_s23 + $0x738] sm:$0xf]  ;;  %v13888_v50 = vld [vmem:[%s14086_s21 + $0x11d0] sm:$0xff] }
 0x421   : > { %8475 = vmatpush.bf16.msrb.mxu2 %v13883_v15  ;;  %v13872_v9 = vld [vmem:[%s14086_s21 + $0x1150] sm:$0xff]  ;;  %v13879_v15 = vld [vmem:[%s14086_s21 + $0x1188] sm:$0xff] }
 0x422   : > { %8503 = vmatpush.bf16.msrb.mxu3 %v13891_v42  ;;  %v13887_v42 = vld [vmem:[%s14086_s21 + $0x11c8] sm:$0xff] }
 0x423   : > { %v7250_v23 = vpop.f32.mrf.mxu2  ;;  %v6406_v41 = vpop.f32.mrf.mxu0 }
 0x424   : > { %v7278_v8 = vpop.f32.mrf.mxu3  ;;  %v6434_v49 = vpop.f32.mrf.mxu1  ;;  %v6407_v22 = vadd.f32 %v6406_v41, %v6379_v21  ;;  %v13795_v21 = vld [vmem:[%s14126_s23 + $0x6e8] sm:$0xf]  ;;  %v13796_v41 = vld [vmem:[%s14126_s23 + $0x6f0] sm:$0xf] }
 0x425   : > { %v15760_v58 = vadd.f32 %v7278_v8, %v7250_v23  ;;  %v12701_v23 = vld [vmem:[%s14126_s23 + $0x708] sm:$0xf0]  ;;  %8476 = vmatpush.bf16.msrb.mxu2 %v13882_v53  ;;  %v13886_v53 = vld [vmem:[%s14086_s21 + $0x11c0] sm:$0xff] }
 0x426   : > { %v6435_v30 = vadd.f32 %v6434_v49, %v6407_v22  ;;  %7420 = vmatmul.bf16.gmra.mxu0 %v12214_v3  ;;  %v12707_v8 = vld [vmem:[%s14126_s23 + $0x6ec] sm:$0xf]  ;;  %v13890_v49 = vld [vmem:[%s14086_s21 + $0x11e0] sm:$0xff] }
 0x427   : > { %7448 = vmatmul.bf16.gmra.mxu1 %v12218_v34  ;;  %v13867_v3 = vld [vmem:[%s14086_s21 + $0x1128] sm:$0xff]  ;;  %8504 = vmatpush.bf16.msrb.mxu3 %v13890_v49  ;;  %v12708_v44 = vor.u32 %v13800_v26, %v12707_v8  ;;  %v13878_v8 = vld [vmem:[%s14086_s21 + $0x1180] sm:$0xff]  ;;  %v12779_v26 = vld [vmem:[%s14126_s23 + $0x77c] sm:$0xf] }
 0x428   : > { %7476 = vmatmul.bf16.gmra.mxu2 %v12222_v48  ;;  %11933 = vst [vmem:[%s14477_s27 + $0x138] sm:$0xff] %v6435_v30  ;;  %v13875_v34 = vld [vmem:[%s14086_s21 + $0x1168] sm:$0xff]  ;;  %v12709_v48 = vld [vmem:[%s14126_s23 + $0x710] sm:$0xf0]  ;;  %8419 = vmatpush.bf16.msrb.mxu0 %v13867_v3  ;;  %v12704_v30 = vor.u32 %v13795_v21, %v12701_v23  ;;  %v13813_v3 = vld [vmem:[%s14126_s23 + $0x778] sm:$0xf] }
 0x429   : > { %8295 = vmatmul.bf16.gmra.mxu3 %v12772_v7  ;;  %v12715_v7 = vld [vmem:[%s14126_s23 + $0x6f4] sm:$0xf]  ;;  %8447 = vmatpush.bf16.msrb.mxu1 %v13875_v34  ;;  %v13863_v21 = vld [vmem:[%s14086_s21 + $0x1108] sm:$0xff]  ;;  %v12773_v34 = vld [vmem:[%s14126_s23 + $0x798] sm:$0xf0] }
 0x42a   : > { %v13871_v23 = vld [vmem:[%s14086_s21 + $0x1148] sm:$0xff]  ;;  %v13814_v49 = vld [vmem:[%s14126_s23 + $0x780] sm:$0xf] }
 0x42b   : > { %v7253_v35 = vpop.f32.mrf.mxu2  ;;  %v6408_v36 = vpop.f32.mrf.mxu0  ;;  %8505 = vmatpush.bf16.msrb.mxu3 %v13889_v10 }
 0x42c   : > { %v7281_v12 = vpop.f32.mrf.mxu3  ;;  %v6436_v5 = vpop.f32.mrf.mxu1  ;;  %v6409_v56 = vadd.f32 %v6408_v36, %v6381_v2  ;;  %v12712_v2 = vor.u32 %v13796_v41, %v12709_v48  ;;  %v13874_v36 = vld [vmem:[%s14086_s21 + $0x1160] sm:$0xff] }
 0x42d   : > { %v15770_v59 = vadd.f32 %v7281_v12, %v7253_v35  ;;  %v12716_v35 = vor.u32 %v13801_v47, %v12715_v7  ;;  %v13866_v12 = vld [vmem:[%s14086_s21 + $0x1120] sm:$0xff]  ;;  %8448 = vmatpush.bf16.msrb.mxu1 %v13874_v36  ;;  %v13819_v47 = vld [vmem:[%s14126_s23 + $0x7a4] sm:$0xf0] }
 0x42e   : > { %v6437_v63 = vadd.f32 %v6436_v5, %v6409_v56  ;;  %v13881_v5 = vld [vmem:[%s14086_s21 + $0x1198] sm:$0xff]  ;;  %8420 = vmatpush.bf16.msrb.mxu0 %v13866_v12  ;;  %v13818_v41 = vld [vmem:[%s14126_s23 + $0x79c] sm:$0xf0]  ;;  %v12781_v48 = vld [vmem:[%s14126_s23 + $0x7a0] sm:$0xf0] }
 0x42f   : > { %8477 = vmatpush.bf16.msrb.mxu2 %v13881_v5  ;;  %8506 = vmatpush.bf16.msrb.mxu3 %v13888_v50  ;;  %v12787_v7 = vld [vmem:[%s14126_s23 + $0x784] sm:$0xf]  ;;  %v12784_v5 = vor.u32 %v13814_v49, %v12781_v48  ;;  %v13798_v49 = vld [vmem:[%s14126_s23 + $0x700] sm:$0xf] }
 0x430   : > { %11934 = vst [vmem:[%s14477_s27 + $0x140] sm:$0xff] %v6437_v63  ;;  %v13804_v63 = vld [vmem:[%s14126_s23 + $0x730] sm:$0xf]  ;;  %v12788_v10 = vor.u32 %v13819_v47, %v12787_v7  ;;  %v12725_v48 = vld [vmem:[%s14126_s23 + $0x720] sm:$0xf0] }
 0x431   : > { %8449 = vmatpush.bf16.msrb.mxu1 %v13873_v61  ;;  %v12549_v61 = vld [vmem:[%s14126_s23 + $0x7c4] sm:$0x11] }
 0x432   : > { %8421 = vmatpush.bf16.msrb.mxu0 %v13865_v31  ;;  %v7767_v50 = vunpack.c.h.b16 %v12549_v61  ;;  %v12731_v7 = vld [vmem:[%s14126_s23 + $0x704] sm:$0xf]  ;;  %v13803_v47 = vld [vmem:[%s14126_s23 + $0x724] sm:$0xf0] }
 0x433   : > { %v7255_v32 = vpop.f32.mrf.mxu2  ;;  %v6411_v13 = vpop.f32.mrf.mxu0  ;;  %8478 = vmatpush.bf16.msrb.mxu2 %v13880_v4  ;;  %8507 = vmatpush.bf16.msrb.mxu3 %v13887_v42  ;;  %v15887_v4 = vld [vmem:[%s14126_s23 + $0x7cc] sm:$0x11] }
 0x434   : > { %v7283_v27 = vpop.f32.mrf.mxu3  ;;  %v6439_v52 = vpop.f32.mrf.mxu1  ;;  %v6412_v16 = vadd.f32 %v6411_v13, %v6384_v43  ;;  %v12745_v43 = vld [vmem:[%s14126_s23 + $0x758] sm:$0xf0]  ;;  %v12740_v13 = vor.u32 %v13804_v63, %v12737_v19 }
 0x435   : > { %v15786_v38 = vadd.f32 %v7283_v27, %v7255_v32  ;;  %v12751_v32 = vld [vmem:[%s14126_s23 + $0x73c] sm:$0xf]  ;;  %v13810_v27 = vld [vmem:[%s14126_s23 + $0x75c] sm:$0xf0]  ;;  %8450 = vmatpush.bf16.msrb.mxu1 %v13872_v9 }
 0x436   : > { %v6440_v55 = vadd.f32 %v6439_v52, %v6412_v16  ;;  %7425 = vmatmul.bf16.gmra.mxu0 %v6763_v46  ;;  %v12744_v52 = vor.u32 %v13809_v29, %v12743_v1  ;;  %v12748_v16 = vor.u32 %v13805_v51, %v12745_v43  ;;  %v7765_v29 = vunpack.c.h.b16 %v15776_v40 }
 0x437   : > { %7453 = vmatmul.bf16.gmra.mxu1 %v6764_v18  ;;  %8422 = vmatpush.bf16.msrb.mxu0 %v13864_v11  ;;  %v7766_v51 = vunpack.c.l.b16 %v12549_v61  ;;  %v7768_v43 = vunpack.c.l.b16 %v15887_v4  ;;  %v7803_v11 = vpack.c.b16 %v7767_v50, %v7767_v50  ;;  %v12732_v61 = vor.u32 %v13803_v47, %v12731_v7 }
 0x438   : > { %7481 = vmatmul.bf16.gmra.mxu2 %v6765_v17  ;;  %11935 = vst [vmem:[%s14477_s27 + $0x148] sm:$0x1] %v6440_v55  ;;  %v12752_v55 = vor.u32 %v13810_v27, %v12751_v32  ;;  %8508 = vmatpush.bf16.msrb.mxu3 %v13886_v53 }
 0x439   : > { %8300 = vmatmul.bf16.gmra.mxu3 %v7800_v28  ;;  %8479 = vmatpush.bf16.msrb.mxu2 %v13879_v15  ;;  %v7804_v40 = vpack.c.b16 %v7768_v43, %v7768_v43 }
 0x43a   : > { %8451 = vmatpush.bf16.msrb.mxu1 %v13871_v23 }
 0x43b   : > { %v7258_v14 = vpop.f32.mrf.mxu2  ;;  %v6413_v20 = vpop.f32.mrf.mxu0  ;;  %8423 = vmatpush.bf16.msrb.mxu0 %v13863_v21 }
 0x43c   : > { %v7286_v60 = vpop.f32.mrf.mxu3  ;;  %v6441_v45 = vpop.f32.mrf.mxu1 }
 0x43d   : > { %v15793_v54 = vadd.f32 %v7286_v60, %v7258_v14  ;;  %8480 = vmatpush.bf16.msrb.mxu2 %v13878_v8 }
 0x443   : > { %v7260_v22 = vpop.f32.mrf.mxu2  ;;  %v15807_v62 = vpop.f32.mrf.mxu0 }
 0x444   : > { %v7288_v57 = vpop.f32.mrf.mxu3  ;;  %v15809_v33 = vpop.f32.mrf.mxu1  ;;  %v7300_v9 = vadd.f32 %v15807_v62, %v15706_v37 }
 0x446   : > { %8313 = vmatmul.bf16.vlgmr.msra.gmra.mxu0 %v12704_v30  ;;  %v12776_v30 = vor.u32 %v13813_v3, %v12773_v34  ;;  %v7328_v8 = vadd.f32 %v15809_v33, %v7300_v9  ;;  %v13797_v3 = vld [vmem:[%s14126_s23 + $0x6f8] sm:$0xf]  ;;  %v12717_v34 = vld [vmem:[%s14126_s23 + $0x718] sm:$0xf0]  ;;  %v12753_v9 = vld [vmem:[%s14126_s23 + $0x760] sm:$0xf0] }
 0x447   : > { %8341 = vmatmul.bf16.vlgmr.msra.gmra.mxu1 %v12708_v44  ;;  %v12780_v44 = vor.u32 %v13818_v41, %v12779_v26  ;;  %v12723_v26 = vld [vmem:[%s14126_s23 + $0x6fc] sm:$0xf]  ;;  %v13802_v41 = vld [vmem:[%s14126_s23 + $0x71c] sm:$0xf0] }
 0x448   : > { %8369 = vmatmul.bf16.vlgmr.msra.gmra.mxu2 %v12712_v2  ;;  %v13862_v2 = vld [vmem:[%s14086_s21 + $0x1100] sm:$0xff] }
 0x449   : > { %8397 = vmatmul.bf16.vlgmr.msra.gmra.mxu3 %v12716_v35  ;;  %v13870_v35 = vld [vmem:[%s14086_s21 + $0x1140] sm:$0xff]  ;;  %8424 = vmatpush.bf16.msrb.mxu0 %v13862_v2  ;;  %v12724_v2 = vor.u32 %v13802_v41, %v12723_v26 }
 0x44a   : > { %8452 = vmatpush.bf16.msrb.mxu1 %v13870_v35 }
 0x44b   : > { %v15815_v25 = vpop.f32.mrf.mxu2  ;;  %v15819_v6 = vpop.f32.mrf.mxu0 }
 0x44c   : > { %v15817_v56 = vpop.f32.mrf.mxu3  ;;  %v15821_v0 = vpop.f32.mrf.mxu1  ;;  %v7356_v53 = vadd.f32 %v15815_v25, %v7328_v8  ;;  %v7302_v37 = vadd.f32 %v15819_v6, %v15726_v39  ;;  %v12761_v8 = vld [vmem:[%s14126_s23 + $0x768] sm:$0xf0] }
 0x44e   : > { %v7384_v35 = vadd.f32 %v15817_v56, %v7356_v53  ;;  %v7330_v25 = vadd.f32 %v15821_v0, %v7302_v37 }
 0x453   : > { %v15835_v46 = vpop.f32.mrf.mxu2  ;;  %v15839_v17 = vpop.f32.mrf.mxu0 }
 0x454   : > { %v15837_v18 = vpop.f32.mrf.mxu3  ;;  %v15841_v28 = vpop.f32.mrf.mxu1  ;;  %v7358_v39 = vadd.f32 %v15835_v46, %v7330_v25  ;;  %v7305_v56 = vadd.f32 %v15839_v17, %v15738_v24  ;;  %v12759_v17 = vld [vmem:[%s14126_s23 + $0x744] sm:$0xf]  ;;  %v13815_v25 = vld [vmem:[%s14126_s23 + $0x788] sm:$0xf] }
 0x456   : > { %8318 = vmatmul.bf16.gmra.mxu0 %v12740_v13  ;;  %v7801_v13 = vpack.c.b16 %v7765_v29, %v7765_v29  ;;  %v7386_v50 = vadd.f32 %v15837_v18, %v7358_v39  ;;  %v13820_v39 = vld [vmem:[%s14126_s23 + $0x7ac] sm:$0xf0] }
 0x457   : > { %8346 = vmatmul.bf16.gmra.mxu1 %v12744_v52  ;;  %v7802_v52 = vpack.c.b16 %v7766_v51, %v7766_v51 }
 0x458   : > { %8374 = vmatmul.bf16.gmra.mxu2 %v12748_v16 }
 0x459   : > { %8402 = vmatmul.bf16.gmra.mxu3 %v12752_v55 }
 0x45b   : > { %v15847_v14 = vpop.f32.mrf.mxu2  ;;  %v15851_v20 = vpop.f32.mrf.mxu0 }
 0x45c   : > { %v15849_v60 = vpop.f32.mrf.mxu3  ;;  %v15853_v45 = vpop.f32.mrf.mxu1  ;;  %v7307_v18 = vadd.f32 %v15851_v20, %v15760_v58 }
 0x463   : > { %v15867_v22 = vpop.f32.mrf.mxu2  ;;  %v15873_v12 = vpop.f32.mrf.mxu0 }
 0x464   : > { %v15869_v57 = vpop.f32.mrf.mxu3  ;;  %v15875_v36 = vpop.f32.mrf.mxu1 }
 0x466   : > { %8323 = vmatmul.bf16.gmra.mxu0 %v12776_v30 }
 0x467   : > { %8351 = vmatmul.bf16.gmra.mxu1 %v12780_v44  ;;  %v12720_v44 = vor.u32 %v13797_v3, %v12717_v34  ;;  %v12767_v3 = vld [vmem:[%s14126_s23 + $0x74c] sm:$0xf]  ;;  %v13812_v34 = vld [vmem:[%s14126_s23 + $0x76c] sm:$0xf0] }
 0x468   : > { %8379 = vmatmul.bf16.gmra.mxu2 %v12784_v5 }
 0x469   : > { %8407 = vmatmul.bf16.gmra.mxu3 %v12788_v10  ;;  %v12728_v10 = vor.u32 %v13798_v49, %v12725_v48 }
 0x46b   : > { %v15877_v63 = vpop.f32.mrf.mxu2  ;;  %v15881_v1 = vpop.f32.mrf.mxu0 }
 0x46c   : > { %v15879_v19 = vpop.f32.mrf.mxu3  ;;  %v15883_v31 = vpop.f32.mrf.mxu1 }
 0x473   : > { %v15891_v32 = vpop.f32.mrf.mxu2  ;;  %v15895_v16 = vpop.f32.mrf.mxu0 }
 0x474   : > { %v15893_v27 = vpop.f32.mrf.mxu3  ;;  %v15897_v55 = vpop.f32.mrf.mxu1 }
 0x476   : > { %8328 = vmatmul.bf16.gmra.mxu0 %v7801_v13 }
 0x477   : > { %8356 = vmatmul.bf16.gmra.mxu1 %v7802_v52  ;;  %v7333_v52 = vadd.f32 %v15841_v28, %v7305_v56  ;;  %v13816_v56 = vld [vmem:[%s14126_s23 + $0x790] sm:$0xf] }
 0x478   : > { %8384 = vmatmul.bf16.gmra.mxu2 %v7803_v11 }
 0x479   : > { %8412 = vmatmul.bf16.gmra.mxu3 %v7804_v40  ;;  %v13806_v40 = vld [vmem:[%s14126_s23 + $0x740] sm:$0xf]  ;;  %v7361_v24 = vadd.f32 %v15847_v14, %v7333_v52 }
 0x47a   : > { %v12756_v28 = vor.u32 %v13806_v40, %v12753_v9 }
 0x47b   : > { %v15901_v15 = vpop.f32.mrf.mxu2  ;;  %v7316_v21 = vpop.f32.mrf.mxu0  ;;  %v7389_v48 = vadd.f32 %v15849_v60, %v7361_v24  ;;  %v7310_v60 = vadd.f32 %v15873_v12, %v15770_v59  ;;  %v12795_v12 = vld [vmem:[%s14126_s23 + $0x78c] sm:$0xf] }
 0x47c   : > { %v15903_v42 = vpop.f32.mrf.mxu3  ;;  %v7344_v23 = vpop.f32.mrf.mxu1  ;;  %v13811_v21 = vld [vmem:[%s14126_s23 + $0x764] sm:$0xf0]  ;;  %v12796_v52 = vor.u32 %v13820_v39, %v12795_v12 }
 0x47d   : > { %v13807_v23 = vld [vmem:[%s14126_s23 + $0x748] sm:$0xf]  ;;  %v12760_v49 = vor.u32 %v13811_v21, %v12759_v17 }
 0x47e   : > { %v12764_v37 = vor.u32 %v13807_v23, %v12761_v8 }
 0x483   : > { %v7372_v62 = vpop.f32.mrf.mxu2  ;;  %v7411_v33 = vpop.f32.mrf.mxu0 }
 0x484   : > { %v7400_v30 = vpop.f32.mrf.mxu3  ;;  %v7439_v5 = vpop.f32.mrf.mxu1  ;;  %v7412_v29 = vadd.f32 %v7411_v33, %v7384_v35  ;;  %v12768_v62 = vor.u32 %v13812_v34, %v12767_v3 }
 0x485   : > { %v7335_v30 = vadd.f32 %v15853_v45, %v7307_v18 }
 0x486   : > { %8425 = vmatmul.bf16.vlgmr.msrb.gmra.mxu0 %v12720_v44  ;;  %v7440_v6 = vadd.f32 %v7439_v5, %v7412_v29  ;;  %v12789_v29 = vld [vmem:[%s14126_s23 + $0x7a8] sm:$0xf0] }
 0x487   : > { %8453 = vmatmul.bf16.vlgmr.msrb.gmra.mxu1 %v12724_v2  ;;  %v7363_v58 = vadd.f32 %v15867_v22, %v7335_v30 }
 0x488   : > { %8481 = vmatmul.bf16.vlgmr.msrb.gmra.mxu2 %v12728_v10  ;;  %v7338_v10 = vadd.f32 %v15875_v36, %v7310_v60  ;;  %v12792_v36 = vor.u32 %v13815_v25, %v12789_v29 }
 0x489   : > { %8509 = vmatmul.bf16.vlgmr.msrb.gmra.mxu3 %v12732_v61  ;;  %v7391_v35 = vadd.f32 %v15869_v57, %v7363_v58  ;;  %v7312_v57 = vadd.f32 %v15881_v1, %v15786_v38 }
 0x48a   : > { %v7366_v59 = vadd.f32 %v15877_v63, %v7338_v10 }
 0x48b   : > { %v7467_v51 = vpop.f32.mrf.mxu2  ;;  %v7413_v13 = vpop.f32.mrf.mxu0  ;;  %v7340_v21 = vadd.f32 %v15883_v31, %v7312_v57 }
 0x48c   : > { %v15922_v0 = vpop.f32.mrf.mxu3  ;;  %v7468_v43 = vadd.f32 %v7467_v51, %v7440_v6  ;;  %v7441_v46 = vpop.f32.mrf.mxu1  ;;  %v7414_v11 = vadd.f32 %v7413_v13, %v7386_v50  ;;  %v12797_v6 = vld [vmem:[%s14126_s23 + $0x7b0] sm:$0xf0]  ;;  %v13821_v50 = vld [vmem:[%s14126_s23 + $0x7b4] sm:$0xf0] }
 0x48d   : > { %v12803_v51 = vld [vmem:[%s14126_s23 + $0x794] sm:$0xf]  ;;  %v12800_v24 = vor.u32 %v13816_v56, %v12797_v6  ;;  %v7368_v38 = vadd.f32 %v15891_v32, %v7340_v21 }
 0x48e   : > { %12511 = vst [vmem:[%s14477_s27 + $0x150] sm:$0xff] %v7468_v43  ;;  %v7442_v53 = vadd.f32 %v7441_v46, %v7414_v11  ;;  %v7394_v11 = vadd.f32 %v15879_v19, %v7366_v59  ;;  %v12804_v17 = vor.u32 %v13821_v50, %v12803_v51  ;;  %v7315_v19 = vadd.f32 %v15895_v16, %v15793_v54 }
 0x48f   : > { %v7396_v31 = vadd.f32 %v15893_v27, %v7368_v38 }
 0x493   : > { %v7469_v26 = vpop.f32.mrf.mxu2  ;;  %v7416_v14 = vpop.f32.mrf.mxu0 }
 0x494   : > { %v15938_v41 = vpop.f32.mrf.mxu3  ;;  %v7470_v7 = vadd.f32 %v7469_v26, %v7442_v53  ;;  %v7444_v47 = vpop.f32.mrf.mxu1  ;;  %v7417_v44 = vadd.f32 %v7416_v14, %v7389_v48  ;;  %v12551_v26 = vld [vmem:[%s14126_s23 + $0x7d4] sm:$0x11]  ;;  %v7769_v48 = vunpack.c.h.b16 %v15887_v4 }
 0x495   : > { %v7771_v16 = vunpack.c.h.b16 %v12551_v26 }
 0x496   : > { %12512 = vst [vmem:[%s14477_s27 + $0x158] sm:$0xff] %v7470_v7  ;;  %8430 = vmatmul.bf16.gmra.mxu0 %v12756_v28  ;;  %v7445_v20 = vadd.f32 %v7444_v47, %v7417_v44  ;;  %v12552_v28 = vld [vmem:[%s14126_s23 + $0x7dc] sm:$0x1]  ;;  %v7770_v7 = vunpack.c.l.b16 %v12551_v26 }
 0x497   : > { %8458 = vmatmul.bf16.gmra.mxu1 %v12760_v49  ;;  %v7343_v49 = vadd.f32 %v15897_v55, %v7315_v19  ;;  %v7772_v14 = vunpack.c.l.b16 %v12552_v28 }
 0x498   : > { %8486 = vmatmul.bf16.gmra.mxu2 %v12764_v37  ;;  %v7806_v30 = vpack.c.b16 %v7770_v7, %v7770_v7 }
 0x499   : > { %8514 = vmatmul.bf16.gmra.mxu3 %v12768_v62  ;;  %v7371_v54 = vadd.f32 %v15901_v15, %v7343_v49  ;;  %v7805_v62 = vpack.c.b16 %v7769_v48, %v7769_v48  ;;  %v7808_v4 = vpack.c.b16 %v7772_v14, %v7772_v14 }
 0x49b   : > { %v7472_v45 = vpop.f32.mrf.mxu2  ;;  %v7418_v5 = vpop.f32.mrf.mxu0  ;;  %v7399_v44 = vadd.f32 %v15903_v42, %v7371_v54 }
 0x49c   : > { %v15946_v2 = vpop.f32.mrf.mxu3  ;;  %v7473_v33 = vadd.f32 %v7472_v45, %v7445_v20  ;;  %v7446_v22 = vpop.f32.mrf.mxu1  ;;  %v7419_v61 = vadd.f32 %v7418_v5, %v7391_v35  ;;  %v7807_v20 = vpack.c.b16 %v7771_v16, %v7771_v16 }
 0x49e   : > { %12513 = vst [vmem:[%s14477_s27 + $0x160] sm:$0xff] %v7473_v33  ;;  %v7447_v43 = vadd.f32 %v7446_v22, %v7419_v61 }
 0x4a3   : > { %v7474_v13 = vpop.f32.mrf.mxu2  ;;  %v7421_v63 = vpop.f32.mrf.mxu0 }
 0x4a4   : > { %v15962_v46 = vpop.f32.mrf.mxu3  ;;  %v7475_v40 = vadd.f32 %v7474_v13, %v7447_v43  ;;  %v7449_v9 = vpop.f32.mrf.mxu1  ;;  %v7422_v23 = vadd.f32 %v7421_v63, %v7394_v11 }
 0x4a6   : > { %12514 = vst [vmem:[%s14477_s27 + $0x168] sm:$0xff] %v7475_v40  ;;  %8435 = vmatmul.bf16.gmra.mxu0 %v12792_v36  ;;  %v7450_v1 = vadd.f32 %v7449_v9, %v7422_v23 }
 0x4a7   : > { %8463 = vmatmul.bf16.gmra.mxu1 %v12796_v52 }
 0x4a8   : > { %8491 = vmatmul.bf16.gmra.mxu2 %v12800_v24 }
 0x4a9   : > { %8519 = vmatmul.bf16.gmra.mxu3 %v12804_v17 }
 0x4ab   : > { %v7477_v8 = vpop.f32.mrf.mxu2  ;;  %v7423_v18 = vpop.f32.mrf.mxu0 }
 0x4ac   : > { %v15970_v3 = vpop.f32.mrf.mxu3  ;;  %v7478_v34 = vadd.f32 %v7477_v8, %v7450_v1  ;;  %v7451_v53 = vpop.f32.mrf.mxu1  ;;  %v7424_v32 = vadd.f32 %v7423_v18, %v7396_v31 }
 0x4ae   : > { %12515 = vst [vmem:[%s14477_s27 + $0x170] sm:$0xff] %v7478_v34  ;;  %v7452_v47 = vadd.f32 %v7451_v53, %v7424_v32 }
 0x4b3   : > { %v7479_v37 = vpop.f32.mrf.mxu2  ;;  %v7426_v55 = vpop.f32.mrf.mxu0 }
 0x4b4   : > { %v15979_v27 = vpop.f32.mrf.mxu3  ;;  %v7480_v58 = vadd.f32 %v7479_v37, %v7452_v47  ;;  %v7454_v60 = vpop.f32.mrf.mxu1  ;;  %v7427_v45 = vadd.f32 %v7426_v55, %v7399_v44 }
 0x4b6   : > { %12516 = vst [vmem:[%s14477_s27 + $0x178] sm:$0xff] %v7480_v58  ;;  %8440 = vmatmul.bf16.gmra.mxu0 %v7805_v62  ;;  %v7455_v15 = vadd.f32 %v7454_v60, %v7427_v45 }
 0x4b7   : > { %8468 = vmatmul.bf16.gmra.mxu1 %v7806_v30 }
 0x4b8   : > { %8496 = vmatmul.bf16.gmra.mxu2 %v7807_v20 }
 0x4b9   : > { %8524 = vmatmul.bf16.gmra.mxu3 %v7808_v4 }
 0x4bb   : > { %v7482_v35 = vpop.f32.mrf.mxu2  ;;  %v7428_v22 = vpop.f32.mrf.mxu0 }
 0x4bc   : > { %v15983_v33 = vpop.f32.mrf.mxu3  ;;  %v7483_v5 = vadd.f32 %v7482_v35, %v7455_v15  ;;  %v7456_v10 = vpop.f32.mrf.mxu1 }
 0x4be   : > { %12517 = vst [vmem:[%s14477_s27 + $0x180] sm:$0x1] %v7483_v5 }
 0x4c3   : > { %v7484_v42 = vpop.f32.mrf.mxu2  ;;  %v8314_v25 = vpop.f32.mrf.mxu0 }
 0x4c4   : > { %v8303_v61 = vpop.f32.mrf.mxu3  ;;  %v8342_v29 = vpop.f32.mrf.mxu1  ;;  %v8315_v31 = vadd.f32 %v8314_v25, %v15922_v0 }
 0x4c6   : > { %v8343_v28 = vadd.f32 %v8342_v29, %v8315_v31 }
 0x4cb   : > { %v8370_v59 = vpop.f32.mrf.mxu2  ;;  %v8316_v39 = vpop.f32.mrf.mxu0 }
 0x4cc   : > { %v8398_v12 = vpop.f32.mrf.mxu3  ;;  %v8344_v56 = vpop.f32.mrf.mxu1  ;;  %v8371_v49 = vadd.f32 %v8370_v59, %v8343_v28  ;;  %v8317_v32 = vadd.f32 %v8316_v39, %v15938_v41 }
 0x4ce   : > { %v8399_v54 = vadd.f32 %v8398_v12, %v8371_v49  ;;  %v8345_v47 = vadd.f32 %v8344_v56, %v8317_v32 }
 0x4d3   : > { %v8372_v6 = vpop.f32.mrf.mxu2  ;;  %v8319_v50 = vpop.f32.mrf.mxu0 }
 0x4d4   : > { %v8400_v51 = vpop.f32.mrf.mxu3  ;;  %v8347_v57 = vpop.f32.mrf.mxu1  ;;  %v8373_v62 = vadd.f32 %v8372_v6, %v8345_v47  ;;  %v8320_v0 = vadd.f32 %v8319_v50, %v15946_v2 }
 0x4d6   : > { %v8401_v55 = vadd.f32 %v8400_v51, %v8373_v62  ;;  %v8348_v45 = vadd.f32 %v8347_v57, %v8320_v0 }
 0x4db   : > { %v8375_v43 = vpop.f32.mrf.mxu2  ;;  %v8321_v36 = vpop.f32.mrf.mxu0 }
 0x4dc   : > { %v8403_v13 = vpop.f32.mrf.mxu3  ;;  %v8349_v52 = vpop.f32.mrf.mxu1  ;;  %v8376_v35 = vadd.f32 %v8375_v43, %v8348_v45  ;;  %v8322_v5 = vadd.f32 %v8321_v36, %v15962_v46 }
 0x4de   : > { %v8404_v61 = vadd.f32 %v8403_v13, %v8376_v35  ;;  %v8350_v59 = vadd.f32 %v8349_v52, %v8322_v5 }
 0x4e3   : > { %v8377_v11 = vpop.f32.mrf.mxu2  ;;  %v8324_v63 = vpop.f32.mrf.mxu0 }
 0x4e4   : > { %v8405_v40 = vpop.f32.mrf.mxu3  ;;  %v8352_v9 = vpop.f32.mrf.mxu1  ;;  %v8378_v56 = vadd.f32 %v8377_v11, %v8350_v59  ;;  %v8325_v6 = vadd.f32 %v8324_v63, %v15970_v3 }
 0x4e6   : > { %v8406_v43 = vadd.f32 %v8405_v40, %v8378_v56 }
 0x4eb   : > { %v8380_v24 = vpop.f32.mrf.mxu2  ;;  %v8326_v21 = vpop.f32.mrf.mxu0 }
 0x4ec   : > { %v15986_v17 = vpop.f32.mrf.mxu3  ;;  %v15988_v23 = vpop.f32.mrf.mxu1  ;;  %v8327_v52 = vadd.f32 %v8326_v21, %v15979_v27 }
 0x4ee   : > { %v8355_v40 = vadd.f32 %v15988_v23, %v8327_v52 }
 0x4f3   : > { %v15990_v38 = vpop.f32.mrf.mxu2  ;;  %v15994_v1 = vpop.f32.mrf.mxu0 }
 0x4f4   : > { %v15992_v19 = vpop.f32.mrf.mxu3  ;;  %v15996_v8 = vpop.f32.mrf.mxu1 }
 0x4fb   : > { %v15999_v34 = vpop.f32.mrf.mxu2  ;;  %v8331_v53 = vpop.f32.mrf.mxu0 }
 0x4fc   : > { %v16001_v18 = vpop.f32.mrf.mxu3  ;;  %v8359_v26 = vpop.f32.mrf.mxu1  ;;  %v8353_v53 = vadd.f32 %v8352_v9, %v8325_v6 }
 0x4fe   : > { %v8381_v28 = vadd.f32 %v8380_v24, %v8353_v53  ;;  %v8330_v24 = vadd.f32 %v15994_v1, %v15983_v33 }
 0x500   : > { %v8409_v3 = vadd.f32 %v15986_v17, %v8381_v28  ;;  %v8358_v23 = vadd.f32 %v15996_v8, %v8330_v24 }
 0x503   : > { %v8387_v48 = vpop.f32.mrf.mxu2  ;;  %v8426_v16 = vpop.f32.mrf.mxu0 }
 0x504   : > { %v8415_v7 = vpop.f32.mrf.mxu3  ;;  %v8454_v14 = vpop.f32.mrf.mxu1  ;;  %v8427_v37 = vadd.f32 %v8426_v16, %v8399_v54  ;;  %v8383_v16 = vadd.f32 %v15990_v38, %v8355_v40 }
 0x506   : > { %v8455_v30 = vadd.f32 %v8454_v14, %v8427_v37  ;;  %v8411_v47 = vadd.f32 %v15992_v19, %v8383_v16 }
 0x50b   : > { %v8482_v44 = vpop.f32.mrf.mxu2  ;;  %v8428_v20 = vpop.f32.mrf.mxu0 }
 0x50c   : > { %v8510_v58 = vpop.f32.mrf.mxu3  ;;  %v8483_v60 = vadd.f32 %v8482_v44, %v8455_v30  ;;  %v8456_v4 = vpop.f32.mrf.mxu1  ;;  %v8429_v15 = vadd.f32 %v8428_v20, %v8401_v55  ;;  %v8386_v44 = vadd.f32 %v15999_v34, %v8358_v23 }
 0x50e   : > { %v8511_v41 = vadd.f32 %v8510_v58, %v8483_v60  ;;  %v8457_v22 = vadd.f32 %v8456_v4, %v8429_v15  ;;  %v8414_v1 = vadd.f32 %v16001_v18, %v8386_v44 }
 0x510   : > { %13093 = vst [vmem:[%s14477_s27 + $0x188] sm:$0xff] %v8511_v41 }
 0x513   : > { %v8484_v10 = vpop.f32.mrf.mxu2  ;;  %v8431_v25 = vpop.f32.mrf.mxu0 }
 0x514   : > { %v8512_v42 = vpop.f32.mrf.mxu3  ;;  %v8485_v2 = vadd.f32 %v8484_v10, %v8457_v22  ;;  %v8459_v29 = vpop.f32.mrf.mxu1  ;;  %v8432_v39 = vadd.f32 %v8431_v25, %v8404_v61 }
 0x516   : > { %v8513_v12 = vadd.f32 %v8512_v42, %v8485_v2  ;;  %v8460_v51 = vadd.f32 %v8459_v29, %v8432_v39 }
 0x518   : > { %13094 = vst [vmem:[%s14477_s27 + $0x190] sm:$0xff] %v8513_v12 }
 0x51b   : > { %v8487_v50 = vpop.f32.mrf.mxu2  ;;  %v8433_v36 = vpop.f32.mrf.mxu0 }
 0x51c   : > { %v8515_v57 = vpop.f32.mrf.mxu3  ;;  %v8488_v46 = vadd.f32 %v8487_v50, %v8460_v51  ;;  %v8461_v31 = vpop.f32.mrf.mxu1  ;;  %v8434_v26 = vadd.f32 %v8433_v36, %v8406_v43 }
 0x51e   : > { %v8516_v13 = vadd.f32 %v8515_v57, %v8488_v46  ;;  %v8462_v49 = vadd.f32 %v8461_v31, %v8434_v26 }
 0x520   : > { %13095 = vst [vmem:[%s14477_s27 + $0x198] sm:$0xff] %v8516_v13 }
 0x523   : > { %v8489_v11 = vpop.f32.mrf.mxu2  ;;  %v8436_v48 = vpop.f32.mrf.mxu0 }
 0x524   : > { %v8517_v32 = vpop.f32.mrf.mxu3  ;;  %v8490_v63 = vadd.f32 %v8489_v11, %v8462_v49  ;;  %v8464_v7 = vpop.f32.mrf.mxu1  ;;  %v8437_v9 = vadd.f32 %v8436_v48, %v8409_v3 }
 0x526   : > { %v8518_v54 = vadd.f32 %v8517_v32, %v8490_v63  ;;  %v8465_v27 = vadd.f32 %v8464_v7, %v8437_v9 }
 0x528   : > { %13096 = vst [vmem:[%s14477_s27 + $0x1a0] sm:$0xff] %v8518_v54 }
 0x52b   : > { %v8492_v21 = vpop.f32.mrf.mxu2  ;;  %v8438_v37 = vpop.f32.mrf.mxu0 }
 0x52c   : > { %v8520_v14 = vpop.f32.mrf.mxu3  ;;  %v8493_v17 = vadd.f32 %v8492_v21, %v8465_v27  ;;  %v8466_v62 = vpop.f32.mrf.mxu1  ;;  %v8439_v30 = vadd.f32 %v8438_v37, %v8411_v47 }
 0x52e   : > { %v8521_v0 = vadd.f32 %v8520_v14, %v8493_v17  ;;  %v8467_v38 = vadd.f32 %v8466_v62, %v8439_v30 }
 0x530   : > { %13097 = vst [vmem:[%s14477_s27 + $0x1a8] sm:$0xff] %v8521_v0 }
 0x533   : > { %v8494_v58 = vpop.f32.mrf.mxu2  ;;  %v8441_v60 = vpop.f32.mrf.mxu0 }
 0x534   : > { %v8522_v33 = vpop.f32.mrf.mxu3  ;;  %v8495_v55 = vadd.f32 %v8494_v58, %v8467_v38  ;;  %v8469_v19 = vpop.f32.mrf.mxu1  ;;  %v8442_v4 = vadd.f32 %v8441_v60, %v8414_v1 }
 0x536   : > { %v8523_v20 = vadd.f32 %v8522_v33, %v8495_v55  ;;  %v8470_v45 = vadd.f32 %v8469_v19, %v8442_v4 }
 0x538   : > { %13098 = vst [vmem:[%s14477_s27 + $0x1b0] sm:$0xff] %v8523_v20 }
 0x53b   : > { %v8497_v41 = vpop.f32.mrf.mxu2  ;;  %v8443_v35 = vpop.f32.mrf.mxu0 }
 0x53c   : > { %v8525_v8 = vpop.f32.mrf.mxu3  ;;  %v8498_v15 = vadd.f32 %v8497_v41, %v8470_v45  ;;  %v8471_v5 = vpop.f32.mrf.mxu1 }
 0x53e   : > { %v8526_v34 = vadd.f32 %v8525_v8, %v8498_v15 }
 0x540   : > { %13099 = vst [vmem:[%s14477_s27 + $0x1b8] sm:$0x1] %v8526_v34 }
 0x543   : > { %v8499_v22 = vpop.f32.mrf.mxu2 }
 0x544   : > { %v8527_v10 = vpop.f32.mrf.mxu3 }
 0x545 PF: > { %p12_p7 = scmp.ge.s32.totalorder %s14043_s14, 4   ;;  %s16042_s9 = smov %s13996_s10 }
 0x546   : > { %s16043_s10 = smov %s14000_s11  ;;  %s16044_s11 = smov %s14053_s17 }
 0x547   : > { %s16045_s12 = smov %s14043_s14  ;;  %14 = sbr.rel (!%p12_p7) target bundleno = 3 (0x3), region = 92 }
 0x54c   :  { %8561 = vsyncpa [#allocation3], 1 }
 0x54d   :  { %8563 = vsyncpa [#allocation3 + $0x1], 1 }

</bundles_post_ra>
